<compile_context>
chip_gen: v7x
topology: tpu7x:2x2x1
jax: 0.10.0
libtpu: 0.0.40
codegen_flags: <defaults>
</compile_context>

<pallas_src>
import functools
import math

import jax
import jax.numpy as jnp
from jax.experimental import pallas as pl
from jax.experimental.pallas import tpu as pltpu


def _layer_norm(h, gamma, beta, eps=1e-5):
    mu = jnp.mean(h, axis=-1, keepdims=True)
    var = jnp.mean((h - mu) ** 2, axis=-1, keepdims=True)
    return (h - mu) * jax.lax.rsqrt(var + eps) * gamma + beta


def transformer_layer_kernel(
    # scalar-prefetch
    lens_ref,
    # tensor inputs
    xq_ref, xkv_ref,
    wq_ref, bq_ref, wk_ref, bk_ref, wv_ref, bv_ref, wo_ref, bo_ref,
    g1_ref, be1_ref, w1_ref, b1_ref, w2_ref, b2_ref, g2_ref, be2_ref,
    # output
    out_ref,
    # scratch (persists across grid steps)
    k_scr, v_scr,
    *, num_heads, compute_dtype,
):
    f32 = jnp.float32
    cd = compute_dtype
    H = num_heads
    _, S, Dh = k_scr.shape
    D = H * Dh
    scale = 1.0 / math.sqrt(Dh)

    b = pl.program_id(0)

    # ---- K/V projections: once per batch (q-tile axis is "arbitrary", so this VMEM
    #      scratch legally carries across query tiles).  Lane-dense (S,D)@(D,D) matmuls.
    @pl.when(pl.program_id(1) == 0)
    def _():
        xkv = xkv_ref[0]                                                # (S, D) cd
        k = jnp.dot(xkv, wk_ref[...], preferred_element_type=f32) + bk_ref[...]
        v = jnp.dot(xkv, wv_ref[...], preferred_element_type=f32) + bv_ref[...]
        k = k.astype(cd)
        v = v.astype(cd)
        for h in range(H):                       # head-split the *values* once per batch
            sl = slice(h * Dh, (h + 1) * Dh)
            k_scr[h] = k[:, sl]
            v_scr[h] = v[:, sl]

    # ---- Q projection for this query tile: one lane-dense (TQ,D)@(D,D) matmul.
    #      The 1/sqrt(Dh) scale is folded into q (TQ*D muls instead of H*TQ*S).
    x_q = xq_ref[0]                                                     # (TQ, D) f32
    q = jnp.dot(x_q.astype(cd), wq_ref[...], preferred_element_type=f32) + bq_ref[...]
    q = (q * scale).astype(cd)                                          # (TQ, D) cd

    # ---- key-padding mask from scalar-prefetched lengths; built once at (1, S).
    length = lens_ref[b]
    key_ok = jax.lax.broadcasted_iota(jnp.int32, (1, S), 1) < length    # (1, S)

    # ---- attention per head.  Heads are static views (lane slice of q, leading index
    #      of the K/V scratch); every matmul stays a plain 2-D MXU op (a batched einsum
    #      would serialize over the head dim on the MXU anyway).
    ctx_parts = []
    for h in range(H):
        q_h = q[:, h * Dh:(h + 1) * Dh]                                 # (TQ, Dh) cd
        k_h = k_scr[h]                                                  # (S,  Dh) cd
        v_h = v_scr[h]                                                  # (S,  Dh) cd

        # scores = q_h @ k_h.T (contract Dh on both operands; no explicit transpose).
        s = jax.lax.dot_general(q_h, k_h, (((1,), (1,)), ((), ())),
                                preferred_element_type=f32)             # (TQ, S) f32
        s = jnp.where(key_ok, s, -1e9)

        # softmax in f32 (EUP exp + approximate reciprocal).
        m = jnp.max(s, axis=-1, keepdims=True)
        p = jnp.exp(s - m)
        p = p * pl.reciprocal(jnp.sum(p, axis=-1, keepdims=True), approx=True)

        ctx_parts.append(jnp.dot(p.astype(cd), v_h,
                                 preferred_element_type=f32))           # (TQ, Dh) f32

    # head concat -> (TQ, D); single fused output projection (TQ,D)@(D,D).
    ctx = jnp.concatenate(ctx_parts, axis=-1).astype(cd)
    sa = jnp.dot(ctx, wo_ref[...], preferred_element_type=f32) + bo_ref[...]

    # dropout == identity (eval); residual + LayerNorm 1 (f32).
    h1 = _layer_norm(sa + x_q, g1_ref[...], be1_ref[...])

    # ---- FFN: Linear -> ReLU -> Linear (compute-dtype matmuls, f32 accumulation).
    ff = jnp.dot(h1.astype(cd), w1_ref[...], preferred_element_type=f32) + b1_ref[...]
    ff = jnp.maximum(ff, 0.0)
    ff = jnp.dot(ff.astype(cd), w2_ref[...], preferred_element_type=f32) + b2_ref[...]

    # dropout == identity (eval); residual + LayerNorm 2 (f32).
    out_ref[0] = _layer_norm(ff + h1, g2_ref[...], be2_ref[...]).astype(out_ref.dtype)


def _vmem_limit_bytes():
    """Generation-aware VMEM budget: headroom under v7x's 64 MiB, generous on v5e/v6e."""
    cap = 128 * 1024 * 1024
    try:
        cap = int(pltpu.get_tpu_info().vmem_capacity_bytes)
    except Exception:
        pass
    return int(max(32 * 1024 * 1024, min(cap - 8 * 1024 * 1024, 100 * 1024 * 1024)))


def base_transformer_layer(x, key_lengths, params, num_heads, *,
                           q_tile=None, compute_dtype=jnp.bfloat16):
    """x: (B, S, D) f32; key_lengths: (B,) int32 valid-key counts (padding mask)."""
    (wq, bq, wk, bk, wv, bv, wo, bo, g1, be1, w1, b1, w2, b2, g2, be2) = params
    B, S, D = x.shape
    H = num_heads
    assert D % H == 0, "input_dim must be divisible by num_heads"
    Dh = D // H
    if q_tile is None:
        q_tile = min(S, 128)
    assert S % q_tile == 0, "seq len must be divisible by the query tile"
    n_q_tiles = S // q_tile

    cd = compute_dtype
    f32 = jnp.float32

    weights = (
        wq.astype(cd), bq.astype(f32), wk.astype(cd), bk.astype(f32),
        wv.astype(cd), bv.astype(f32), wo.astype(cd), bo.astype(f32),
        g1.astype(f32), be1.astype(f32),
        w1.astype(cd), b1.astype(f32), w2.astype(cd), b2.astype(f32),
        g2.astype(f32), be2.astype(f32),
    )

    x_q = x.astype(f32)   # f32 query/residual path (per-tile block)
    x_kv = x.astype(cd)   # compute-dtype K/V source (full-seq block, fetched once per batch)

    kernel = functools.partial(
        transformer_layer_kernel, num_heads=H, compute_dtype=cd)

    def _call(weight_pipeline_mode):
        def _rep_spec(arr):  # full-array block, constant index -> fetched exactly once
            n = arr.ndim
            kwargs = {}
            if weight_pipeline_mode is not None:
                kwargs["pipeline_mode"] = weight_pipeline_mode
            return pl.BlockSpec(arr.shape, lambda b_, qt_, lens_, n=n: (0,) * n, **kwargs)

        in_specs = [
            pl.BlockSpec((1, q_tile, D), lambda b_, qt_, lens_: (b_, qt_, 0)),  # x_q (f32)
            pl.BlockSpec((1, S, D), lambda b_, qt_, lens_: (b_, 0, 0)),         # x_kv (cd)
        ]
        in_specs += [_rep_spec(a) for a in weights]

        grid_spec = pltpu.PrefetchScalarGridSpec(
            num_scalar_prefetch=1,
            grid=(B, n_q_tiles),
            in_specs=in_specs,
            out_specs=pl.BlockSpec((1, q_tile, D), lambda b_, qt_, lens_: (b_, qt_, 0)),
            scratch_shapes=[
                pltpu.VMEM((H, S, Dh), cd),   # K, head-split, computed once per batch
                pltpu.VMEM((H, S, Dh), cd),   # V, head-split, computed once per batch
            ],
        )

        return pl.pallas_call(
            kernel,
            out_shape=jax.ShapeDtypeStruct((B, S, D), jnp.float32),
            grid_spec=grid_spec,
            compiler_params=pltpu.CompilerParams(
                # q-tile axis carries the per-batch K/V scratch -> must be "arbitrary".
                dimension_semantics=("parallel", "arbitrary"),
                vmem_limit_bytes=_vmem_limit_bytes(),
            ),
        )(key_lengths.astype(jnp.int32), x_q, x_kv, *weights)

    try:
        # Constant weights never change across grid steps -> single buffer them
        # (halves weight VMEM residency; important on v7x's 64 MiB VMEM).
        return _call(pl.Buffered(1))
    except Exception:
        # TODO(synk): this jax version rejects single-buffered / pipeline_mode
        #             BlockSpecs; fall back to default double buffering.
        return _call(None)


def reference_layer(x, attn_mask, params, num_heads):
    (wq, bq, wk, bk, wv, bv, wo, bo, g1, be1, w1, b1, w2, b2, g2, be2) = params
    B, S, D = x.shape
    H = num_heads
    Dh = D // H

    def ln(h, g, b):
        mu = jnp.mean(h, axis=-1, keepdims=True)
        var = jnp.mean((h - mu) ** 2, axis=-1, keepdims=True)
        return (h - mu) / jnp.sqrt(var + 1e-5) * g + b

    q = x @ wq + bq
    k = x @ wk + bk
    v = x @ wv + bv
    qh = q.reshape(B, S, H, Dh).transpose(0, 2, 1, 3)
    kh = k.reshape(B, S, H, Dh).transpose(0, 2, 1, 3)
    vh = v.reshape(B, S, H, Dh).transpose(0, 2, 1, 3)
    scores = jnp.einsum("bhqd,bhkd->bhqk", qh, kh) / math.sqrt(Dh)
    scores = scores + attn_mask[:, None, :, :]
    p = jax.nn.softmax(scores, axis=-1)
    ctx = jnp.einsum("bhqk,bhkd->bhqd", p, vh).transpose(0, 2, 1, 3).reshape(B, S, D)
    sa = ctx @ wo + bo
    h1 = ln(sa + x, g1, be1)
    ff = jnp.maximum(h1 @ w1 + b1, 0.0) @ w2 + b2
    return ln(ff + h1, g2, be2)


def init_params(key, input_dim, feature_dim):
    ks = jax.random.split(key, 8)
    s = 0.05
    wq = jax.random.normal(ks[0], (input_dim, input_dim), jnp.float32) * s
    wk = jax.random.normal(ks[1], (input_dim, input_dim), jnp.float32) * s
    wv = jax.random.normal(ks[2], (input_dim, input_dim), jnp.float32) * s
    wo = jax.random.normal(ks[3], (input_dim, input_dim), jnp.float32) * s
    w1 = jax.random.normal(ks[4], (input_dim, feature_dim), jnp.float32) * s
    w2 = jax.random.normal(ks[5], (feature_dim, input_dim), jnp.float32) * s
    bq = jnp.zeros((1, input_dim), jnp.float32)
    bk = jnp.full((1, input_dim), 0.01, jnp.float32)
    bv = jnp.full((1, input_dim), -0.01, jnp.float32)
    bo = jnp.zeros((1, input_dim), jnp.float32)
    b1 = jnp.full((1, feature_dim), 0.02, jnp.float32)
    b2 = jnp.zeros((1, input_dim), jnp.float32)
    g1 = jnp.ones((1, input_dim), jnp.float32)
    be1 = jnp.zeros((1, input_dim), jnp.float32)
    g2 = jnp.ones((1, input_dim), jnp.float32)
    be2 = jnp.zeros((1, input_dim), jnp.float32)
    return (wq, bq, wk, bk, wv, bv, wo, bo, g1, be1, w1, b1, w2, b2, g2, be2)


if __name__ == "__main__":
    B, S, D, H, F = 2, 16, 32, 4, 64   # batch, seq, input_dim, num_heads, feature_dim
    TQ = 8                             # query tile -> grid (B, S//TQ) = (2, 2); exercises the K/V hoist

    key = jax.random.PRNGKey(0)
    kx, kp = jax.random.split(key, 2)

    x = jax.random.normal(kx, (B, S, D), jnp.float32)
    params = init_params(kp, D, F)

    # Key-padding: batch 0 attends to all S keys, batch 1 only to the first S-3.
    lengths = jnp.array([S, S - 3], dtype=jnp.int32)

    # Dense additive mask is only needed by the plain-JAX reference.
    key_ok = jnp.arange(S)[None, :] < lengths[:, None]
    attn_mask = jnp.where(key_ok[:, None, :], 0.0, -1e9).astype(jnp.float32)
    attn_mask = jnp.broadcast_to(attn_mask, (B, S, S))

    ref = reference_layer(x, attn_mask, params, num_heads=H)

    out_f32 = jax.block_until_ready(
        base_transformer_layer(x, lengths, params, num_heads=H,
                               q_tile=TQ, compute_dtype=jnp.float32))
    out_bf16 = jax.block_until_ready(
        base_transformer_layer(x, lengths, params, num_heads=H,
                               q_tile=TQ, compute_dtype=jnp.bfloat16))

    assert out_f32.shape == (B, S, D)
    assert out_bf16.shape == (B, S, D)
    assert jnp.allclose(out_f32, ref, rtol=5e-3, atol=5e-3), "f32 kernel mismatch vs reference"
    assert jnp.allclose(out_bf16, ref, rtol=2e-2, atol=2e-2), "bf16 kernel mismatch vs reference"

    print("KERNEL_OK")
</pallas_src>

<mosaic_0001>
module attributes {stable_mosaic.version = 11 : i64} {
  func.func @transformer_layer_kernel(%arg0: i32, %arg1: i32, %arg2: memref<2xi32, #tpu.memory_space<smem>>, %arg3: memref<1x8x32xf32, #tpu.memory_space<vmem>>, %arg4: memref<1x16x32xf32, #tpu.memory_space<vmem>>, %arg5: memref<32x32xf32, #tpu.memory_space<vmem>>, %arg6: memref<1x32xf32, #tpu.memory_space<vmem>>, %arg7: memref<32x32xf32, #tpu.memory_space<vmem>>, %arg8: memref<1x32xf32, #tpu.memory_space<vmem>>, %arg9: memref<32x32xf32, #tpu.memory_space<vmem>>, %arg10: memref<1x32xf32, #tpu.memory_space<vmem>>, %arg11: memref<32x32xf32, #tpu.memory_space<vmem>>, %arg12: memref<1x32xf32, #tpu.memory_space<vmem>>, %arg13: memref<1x32xf32, #tpu.memory_space<vmem>>, %arg14: memref<1x32xf32, #tpu.memory_space<vmem>>, %arg15: memref<32x64xf32, #tpu.memory_space<vmem>>, %arg16: memref<1x64xf32, #tpu.memory_space<vmem>>, %arg17: memref<64x32xf32, #tpu.memory_space<vmem>>, %arg18: memref<1x32xf32, #tpu.memory_space<vmem>>, %arg19: memref<1x32xf32, #tpu.memory_space<vmem>>, %arg20: memref<1x32xf32, #tpu.memory_space<vmem>>, %arg21: memref<1x8x32xf32, #tpu.memory_space<vmem>>, %arg22: memref<4x16x8xf32, #tpu.memory_space<vmem>>, %arg23: memref<4x16x8xf32, #tpu.memory_space<vmem>>) attributes {dimension_semantics = [#tpu.dimension_semantics<parallel>, #tpu.dimension_semantics<arbitrary>], iteration_bounds = array<i64: 2, 2>, scalar_prefetch = 1 : i64, scratch_operands = 2 : i64, tpu.core_type = #tpu.core_type<tc>, window_params = [{transform_indices = @transform_0, window_bounds = array<i64: 1, 8, 32>}, {transform_indices = @transform_1, window_bounds = array<i64: 1, 16, 32>}, {pipeline_mode = #tpu.pipeline_mode<synchronous>, transform_indices = @transform_2, window_bounds = array<i64: 32, 32>}, {pipeline_mode = #tpu.pipeline_mode<synchronous>, transform_indices = @transform_3, window_bounds = array<i64: 1, 32>}, {pipeline_mode = #tpu.pipeline_mode<synchronous>, transform_indices = @transform_4, window_bounds = array<i64: 32, 32>}, {pipeline_mode = #tpu.pipeline_mode<synchronous>, transform_indices = @transform_5, window_bounds = array<i64: 1, 32>}, {pipeline_mode = #tpu.pipeline_mode<synchronous>, transform_indices = @transform_6, window_bounds = array<i64: 32, 32>}, {pipeline_mode = #tpu.pipeline_mode<synchronous>, transform_indices = @transform_7, window_bounds = array<i64: 1, 32>}, {pipeline_mode = #tpu.pipeline_mode<synchronous>, transform_indices = @transform_8, window_bounds = array<i64: 32, 32>}, {pipeline_mode = #tpu.pipeline_mode<synchronous>, transform_indices = @transform_9, window_bounds = array<i64: 1, 32>}, {pipeline_mode = #tpu.pipeline_mode<synchronous>, transform_indices = @transform_10, window_bounds = array<i64: 1, 32>}, {pipeline_mode = #tpu.pipeline_mode<synchronous>, transform_indices = @transform_11, window_bounds = array<i64: 1, 32>}, {pipeline_mode = #tpu.pipeline_mode<synchronous>, transform_indices = @transform_12, window_bounds = array<i64: 32, 64>}, {pipeline_mode = #tpu.pipeline_mode<synchronous>, transform_indices = @transform_13, window_bounds = array<i64: 1, 64>}, {pipeline_mode = #tpu.pipeline_mode<synchronous>, transform_indices = @transform_14, window_bounds = array<i64: 64, 32>}, {pipeline_mode = #tpu.pipeline_mode<synchronous>, transform_indices = @transform_15, window_bounds = array<i64: 1, 32>}, {pipeline_mode = #tpu.pipeline_mode<synchronous>, transform_indices = @transform_16, window_bounds = array<i64: 1, 32>}, {pipeline_mode = #tpu.pipeline_mode<synchronous>, transform_indices = @transform_17, window_bounds = array<i64: 1, 32>}, {transform_indices = @transform_18, window_bounds = array<i64: 1, 8, 32>}]} {
    %c0_i32 = arith.constant 0 : i32
    %0 = arith.cmpi eq, %arg1, %c0_i32 : i32
    %1 = arith.extui %0 : i1 to i32
    %c0_i32_0 = arith.constant 0 : i32
    %2 = arith.cmpi ne, %1, %c0_i32_0 : i32
    scf.if %2 {
      %c0_86 = arith.constant 0 : index
      %c0_87 = arith.constant 0 : index
      %c0_88 = arith.constant 0 : index
      %172 = vector.load %arg4[%c0_86, %c0_87, %c0_88] : memref<1x16x32xf32, #tpu.memory_space<vmem>>, vector<1x16x32xf32>
      %173 = vector.shape_cast %172 : vector<1x16x32xf32> to vector<16x32xf32>
      %c0_89 = arith.constant 0 : index
      %c0_90 = arith.constant 0 : index
      %174 = vector.load %arg7[%c0_89, %c0_90] : memref<32x32xf32, #tpu.memory_space<vmem>>, vector<32x32xf32>
      %cst_91 = arith.constant dense<0.000000e+00> : vector<16x32xf32>
      %175 = tpu.matmul %173, %174, %cst_91 {dimension_numbers = #tpu.dot_dimension_numbers<[1], [0], [0], [1], [0, 0, 1, 1], [], []>} : vector<16x32xf32>, vector<32x32xf32>, vector<16x32xf32> -> vector<16x32xf32>
      %c0_92 = arith.constant 0 : index
      %c0_93 = arith.constant 0 : index
      %176 = vector.load %arg8[%c0_92, %c0_93] : memref<1x32xf32, #tpu.memory_space<vmem>>, vector<1x32xf32>
      %177 = vector.broadcast %176 : vector<1x32xf32> to vector<16x32xf32>
      %178 = arith.addf %175, %177 : vector<16x32xf32>
      %c0_94 = arith.constant 0 : index
      %c0_95 = arith.constant 0 : index
      %179 = vector.load %arg9[%c0_94, %c0_95] : memref<32x32xf32, #tpu.memory_space<vmem>>, vector<32x32xf32>
      %cst_96 = arith.constant dense<0.000000e+00> : vector<16x32xf32>
      %180 = tpu.matmul %173, %179, %cst_96 {dimension_numbers = #tpu.dot_dimension_numbers<[1], [0], [0], [1], [0, 0, 1, 1], [], []>} : vector<16x32xf32>, vector<32x32xf32>, vector<16x32xf32> -> vector<16x32xf32>
      %c0_97 = arith.constant 0 : index
      %c0_98 = arith.constant 0 : index
      %181 = vector.load %arg10[%c0_97, %c0_98] : memref<1x32xf32, #tpu.memory_space<vmem>>, vector<1x32xf32>
      %182 = vector.broadcast %181 : vector<1x32xf32> to vector<16x32xf32>
      %183 = arith.addf %180, %182 : vector<16x32xf32>
      %184 = vector.extract_strided_slice %178 {offsets = [0, 0], sizes = [16, 8], strides = [1, 1]} : vector<16x32xf32> to vector<16x8xf32>
      %c0_99 = arith.constant 0 : index
      %c0_100 = arith.constant 0 : index
      %c0_101 = arith.constant 0 : index
      %185 = vector.load %arg22[%c0_99, %c0_100, %c0_101] : memref<4x16x8xf32, #tpu.memory_space<vmem>>, vector<1x16x8xf32>
      %186 = vector.shape_cast %185 : vector<1x16x8xf32> to vector<16x8xf32>
      %187 = vector.shape_cast %184 : vector<16x8xf32> to vector<1x16x8xf32>
      tpu.vector_store %arg22[%c0_99, %c0_100, %c0_101], %187 {strides = array<i32>} : memref<4x16x8xf32, #tpu.memory_space<vmem>>, vector<1x16x8xf32>,
      %188 = vector.extract_strided_slice %183 {offsets = [0, 0], sizes = [16, 8], strides = [1, 1]} : vector<16x32xf32> to vector<16x8xf32>
      %c0_102 = arith.constant 0 : index
      %c0_103 = arith.constant 0 : index
      %c0_104 = arith.constant 0 : index
      %189 = vector.load %arg23[%c0_102, %c0_103, %c0_104] : memref<4x16x8xf32, #tpu.memory_space<vmem>>, vector<1x16x8xf32>
      %190 = vector.shape_cast %189 : vector<1x16x8xf32> to vector<16x8xf32>
      %191 = vector.shape_cast %188 : vector<16x8xf32> to vector<1x16x8xf32>
      tpu.vector_store %arg23[%c0_102, %c0_103, %c0_104], %191 {strides = array<i32>} : memref<4x16x8xf32, #tpu.memory_space<vmem>>, vector<1x16x8xf32>,
      %192 = vector.extract_strided_slice %178 {offsets = [0, 8], sizes = [16, 8], strides = [1, 1]} : vector<16x32xf32> to vector<16x8xf32>
      %c1_105 = arith.constant 1 : index
      %c0_106 = arith.constant 0 : index
      %c0_107 = arith.constant 0 : index
      %193 = vector.load %arg22[%c1_105, %c0_106, %c0_107] : memref<4x16x8xf32, #tpu.memory_space<vmem>>, vector<1x16x8xf32>
      %194 = vector.shape_cast %193 : vector<1x16x8xf32> to vector<16x8xf32>
      %195 = vector.shape_cast %192 : vector<16x8xf32> to vector<1x16x8xf32>
      tpu.vector_store %arg22[%c1_105, %c0_106, %c0_107], %195 {strides = array<i32>} : memref<4x16x8xf32, #tpu.memory_space<vmem>>, vector<1x16x8xf32>,
      %196 = vector.extract_strided_slice %183 {offsets = [0, 8], sizes = [16, 8], strides = [1, 1]} : vector<16x32xf32> to vector<16x8xf32>
      %c1_108 = arith.constant 1 : index
      %c0_109 = arith.constant 0 : index
      %c0_110 = arith.constant 0 : index
      %197 = vector.load %arg23[%c1_108, %c0_109, %c0_110] : memref<4x16x8xf32, #tpu.memory_space<vmem>>, vector<1x16x8xf32>
      %198 = vector.shape_cast %197 : vector<1x16x8xf32> to vector<16x8xf32>
      %199 = vector.shape_cast %196 : vector<16x8xf32> to vector<1x16x8xf32>
      tpu.vector_store %arg23[%c1_108, %c0_109, %c0_110], %199 {strides = array<i32>} : memref<4x16x8xf32, #tpu.memory_space<vmem>>, vector<1x16x8xf32>,
      %200 = vector.extract_strided_slice %178 {offsets = [0, 16], sizes = [16, 8], strides = [1, 1]} : vector<16x32xf32> to vector<16x8xf32>
      %c2_111 = arith.constant 2 : index
      %c0_112 = arith.constant 0 : index
      %c0_113 = arith.constant 0 : index
      %201 = vector.load %arg22[%c2_111, %c0_112, %c0_113] : memref<4x16x8xf32, #tpu.memory_space<vmem>>, vector<1x16x8xf32>
      %202 = vector.shape_cast %201 : vector<1x16x8xf32> to vector<16x8xf32>
      %203 = vector.shape_cast %200 : vector<16x8xf32> to vector<1x16x8xf32>
      tpu.vector_store %arg22[%c2_111, %c0_112, %c0_113], %203 {strides = array<i32>} : memref<4x16x8xf32, #tpu.memory_space<vmem>>, vector<1x16x8xf32>,
      %204 = vector.extract_strided_slice %183 {offsets = [0, 16], sizes = [16, 8], strides = [1, 1]} : vector<16x32xf32> to vector<16x8xf32>
      %c2_114 = arith.constant 2 : index
      %c0_115 = arith.constant 0 : index
      %c0_116 = arith.constant 0 : index
      %205 = vector.load %arg23[%c2_114, %c0_115, %c0_116] : memref<4x16x8xf32, #tpu.memory_space<vmem>>, vector<1x16x8xf32>
      %206 = vector.shape_cast %205 : vector<1x16x8xf32> to vector<16x8xf32>
      %207 = vector.shape_cast %204 : vector<16x8xf32> to vector<1x16x8xf32>
      tpu.vector_store %arg23[%c2_114, %c0_115, %c0_116], %207 {strides = array<i32>} : memref<4x16x8xf32, #tpu.memory_space<vmem>>, vector<1x16x8xf32>,
      %208 = vector.extract_strided_slice %178 {offsets = [0, 24], sizes = [16, 8], strides = [1, 1]} : vector<16x32xf32> to vector<16x8xf32>
      %c3_117 = arith.constant 3 : index
      %c0_118 = arith.constant 0 : index
      %c0_119 = arith.constant 0 : index
      %209 = vector.load %arg22[%c3_117, %c0_118, %c0_119] : memref<4x16x8xf32, #tpu.memory_space<vmem>>, vector<1x16x8xf32>
      %210 = vector.shape_cast %209 : vector<1x16x8xf32> to vector<16x8xf32>
      %211 = vector.shape_cast %208 : vector<16x8xf32> to vector<1x16x8xf32>
      tpu.vector_store %arg22[%c3_117, %c0_118, %c0_119], %211 {strides = array<i32>} : memref<4x16x8xf32, #tpu.memory_space<vmem>>, vector<1x16x8xf32>,
      %212 = vector.extract_strided_slice %183 {offsets = [0, 24], sizes = [16, 8], strides = [1, 1]} : vector<16x32xf32> to vector<16x8xf32>
      %c3_120 = arith.constant 3 : index
      %c0_121 = arith.constant 0 : index
      %c0_122 = arith.constant 0 : index
      %213 = vector.load %arg23[%c3_120, %c0_121, %c0_122] : memref<4x16x8xf32, #tpu.memory_space<vmem>>, vector<1x16x8xf32>
      %214 = vector.shape_cast %213 : vector<1x16x8xf32> to vector<16x8xf32>
      %215 = vector.shape_cast %212 : vector<16x8xf32> to vector<1x16x8xf32>
      tpu.vector_store %arg23[%c3_120, %c0_121, %c0_122], %215 {strides = array<i32>} : memref<4x16x8xf32, #tpu.memory_space<vmem>>, vector<1x16x8xf32>,
    } else {
    }
    %c0 = arith.constant 0 : index
    %c0_1 = arith.constant 0 : index
    %c0_2 = arith.constant 0 : index
    %3 = vector.load %arg3[%c0, %c0_1, %c0_2] : memref<1x8x32xf32, #tpu.memory_space<vmem>>, vector<1x8x32xf32>
    %4 = vector.shape_cast %3 : vector<1x8x32xf32> to vector<8x32xf32>
    %c0_3 = arith.constant 0 : index
    %c0_4 = arith.constant 0 : index
    %5 = vector.load %arg5[%c0_3, %c0_4] : memref<32x32xf32, #tpu.memory_space<vmem>>, vector<32x32xf32>
    %cst = arith.constant dense<0.000000e+00> : vector<8x32xf32>
    %6 = tpu.matmul %4, %5, %cst {dimension_numbers = #tpu.dot_dimension_numbers<[1], [0], [0], [1], [0, 0, 1, 1], [], []>} : vector<8x32xf32>, vector<32x32xf32>, vector<8x32xf32> -> vector<8x32xf32>
    %c0_5 = arith.constant 0 : index
    %c0_6 = arith.constant 0 : index
    %7 = vector.load %arg6[%c0_5, %c0_6] : memref<1x32xf32, #tpu.memory_space<vmem>>, vector<1x32xf32>
    %8 = vector.broadcast %7 : vector<1x32xf32> to vector<8x32xf32>
    %9 = arith.addf %6, %8 : vector<8x32xf32>
    %cst_7 = arith.constant 0.353553385 : f32
    %10 = vector.broadcast %cst_7 : f32 to vector<8x32xf32>
    %11 = arith.mulf %9, %10 : vector<8x32xf32>
    %12 = arith.index_cast %arg0 : i32 to index
    %13 = memref.load %arg2[%12] : memref<2xi32, #tpu.memory_space<smem>>
    %14 = tpu.iota {dimensions = array<i32: 1>} : vector<1x16xi32>
    %15 = vector.broadcast %13 : i32 to vector<1x16xi32>
    %16 = arith.cmpi slt, %14, %15 : vector<1x16xi32>
    %17 = vector.extract_strided_slice %11 {offsets = [0, 0], sizes = [8, 8], strides = [1, 1]} : vector<8x32xf32> to vector<8x8xf32>
    %c0_8 = arith.constant 0 : index
    %c0_9 = arith.constant 0 : index
    %c0_10 = arith.constant 0 : index
    %18 = vector.load %arg22[%c0_8, %c0_9, %c0_10] : memref<4x16x8xf32, #tpu.memory_space<vmem>>, vector<1x16x8xf32>
    %19 = vector.shape_cast %18 : vector<1x16x8xf32> to vector<16x8xf32>
    %c0_11 = arith.constant 0 : index
    %c0_12 = arith.constant 0 : index
    %c0_13 = arith.constant 0 : index
    %20 = vector.load %arg23[%c0_11, %c0_12, %c0_13] : memref<4x16x8xf32, #tpu.memory_space<vmem>>, vector<1x16x8xf32>
    %21 = vector.shape_cast %20 : vector<1x16x8xf32> to vector<16x8xf32>
    %cst_14 = arith.constant dense<0.000000e+00> : vector<8x16xf32>
    %22 = tpu.matmul %17, %19, %cst_14 {dimension_numbers = #tpu.dot_dimension_numbers<[1], [1], [0], [0], [0, 0, 1, 0], [], []>} : vector<8x8xf32>, vector<16x8xf32>, vector<8x16xf32> -> vector<8x16xf32>
    %cst_15 = arith.constant -1.000000e+09 : f32
    %23 = vector.shape_cast %16 : vector<1x16xi1> to vector<1x16xi1>
    %24 = vector.broadcast %23 : vector<1x16xi1> to vector<8x16xi1>
    %25 = vector.broadcast %cst_15 : f32 to vector<8x16xf32>
    %26 = arith.select %24, %22, %25 : vector<8x16xi1>, vector<8x16xf32>
    %cst_16 = arith.constant dense<0xFF800000> : vector<8xf32>
    %27 = vector.multi_reduction <maximumf>, %26, %cst_16 [1] : vector<8x16xf32> to vector<8xf32>
    %28 = vector.shape_cast %27 : vector<8xf32> to vector<8x1xf32>
    %29 = vector.broadcast %28 : vector<8x1xf32> to vector<8x16xf32>
    %30 = arith.subf %26, %29 : vector<8x16xf32>
    %31 = math.exp %30 : vector<8x16xf32>
    %cst_17 = arith.constant dense<0.000000e+00> : vector<8xf32>
    %32 = vector.multi_reduction <add>, %31, %cst_17 [1] : vector<8x16xf32> to vector<8xf32>
    %33 = vector.shape_cast %32 : vector<8xf32> to vector<8x1xf32>
    %34 = tpu.reciprocal %33 {approx = true} : vector<8x1xf32> -> vector<8x1xf32>
    %35 = vector.broadcast %34 : vector<8x1xf32> to vector<8x16xf32>
    %36 = arith.mulf %31, %35 : vector<8x16xf32>
    %cst_18 = arith.constant dense<0.000000e+00> : vector<8x8xf32>
    %37 = tpu.matmul %36, %21, %cst_18 {dimension_numbers = #tpu.dot_dimension_numbers<[1], [0], [0], [1], [0, 0, 1, 1], [], []>} : vector<8x16xf32>, vector<16x8xf32>, vector<8x8xf32> -> vector<8x8xf32>
    %38 = vector.extract_strided_slice %11 {offsets = [0, 8], sizes = [8, 8], strides = [1, 1]} : vector<8x32xf32> to vector<8x8xf32>
    %c1 = arith.constant 1 : index
    %c0_19 = arith.constant 0 : index
    %c0_20 = arith.constant 0 : index
    %39 = vector.load %arg22[%c1, %c0_19, %c0_20] : memref<4x16x8xf32, #tpu.memory_space<vmem>>, vector<1x16x8xf32>
    %40 = vector.shape_cast %39 : vector<1x16x8xf32> to vector<16x8xf32>
    %c1_21 = arith.constant 1 : index
    %c0_22 = arith.constant 0 : index
    %c0_23 = arith.constant 0 : index
    %41 = vector.load %arg23[%c1_21, %c0_22, %c0_23] : memref<4x16x8xf32, #tpu.memory_space<vmem>>, vector<1x16x8xf32>
    %42 = vector.shape_cast %41 : vector<1x16x8xf32> to vector<16x8xf32>
    %cst_24 = arith.constant dense<0.000000e+00> : vector<8x16xf32>
    %43 = tpu.matmul %38, %40, %cst_24 {dimension_numbers = #tpu.dot_dimension_numbers<[1], [1], [0], [0], [0, 0, 1, 0], [], []>} : vector<8x8xf32>, vector<16x8xf32>, vector<8x16xf32> -> vector<8x16xf32>
    %cst_25 = arith.constant -1.000000e+09 : f32
    %44 = vector.shape_cast %16 : vector<1x16xi1> to vector<1x16xi1>
    %45 = vector.broadcast %44 : vector<1x16xi1> to vector<8x16xi1>
    %46 = vector.broadcast %cst_25 : f32 to vector<8x16xf32>
    %47 = arith.select %45, %43, %46 : vector<8x16xi1>, vector<8x16xf32>
    %cst_26 = arith.constant dense<0xFF800000> : vector<8xf32>
    %48 = vector.multi_reduction <maximumf>, %47, %cst_26 [1] : vector<8x16xf32> to vector<8xf32>
    %49 = vector.shape_cast %48 : vector<8xf32> to vector<8x1xf32>
    %50 = vector.broadcast %49 : vector<8x1xf32> to vector<8x16xf32>
    %51 = arith.subf %47, %50 : vector<8x16xf32>
    %52 = math.exp %51 : vector<8x16xf32>
    %cst_27 = arith.constant dense<0.000000e+00> : vector<8xf32>
    %53 = vector.multi_reduction <add>, %52, %cst_27 [1] : vector<8x16xf32> to vector<8xf32>
    %54 = vector.shape_cast %53 : vector<8xf32> to vector<8x1xf32>
    %55 = tpu.reciprocal %54 {approx = true} : vector<8x1xf32> -> vector<8x1xf32>
    %56 = vector.broadcast %55 : vector<8x1xf32> to vector<8x16xf32>
    %57 = arith.mulf %52, %56 : vector<8x16xf32>
    %cst_28 = arith.constant dense<0.000000e+00> : vector<8x8xf32>
    %58 = tpu.matmul %57, %42, %cst_28 {dimension_numbers = #tpu.dot_dimension_numbers<[1], [0], [0], [1], [0, 0, 1, 1], [], []>} : vector<8x16xf32>, vector<16x8xf32>, vector<8x8xf32> -> vector<8x8xf32>
    %59 = vector.extract_strided_slice %11 {offsets = [0, 16], sizes = [8, 8], strides = [1, 1]} : vector<8x32xf32> to vector<8x8xf32>
    %c2 = arith.constant 2 : index
    %c0_29 = arith.constant 0 : index
    %c0_30 = arith.constant 0 : index
    %60 = vector.load %arg22[%c2, %c0_29, %c0_30] : memref<4x16x8xf32, #tpu.memory_space<vmem>>, vector<1x16x8xf32>
    %61 = vector.shape_cast %60 : vector<1x16x8xf32> to vector<16x8xf32>
    %c2_31 = arith.constant 2 : index
    %c0_32 = arith.constant 0 : index
    %c0_33 = arith.constant 0 : index
    %62 = vector.load %arg23[%c2_31, %c0_32, %c0_33] : memref<4x16x8xf32, #tpu.memory_space<vmem>>, vector<1x16x8xf32>
    %63 = vector.shape_cast %62 : vector<1x16x8xf32> to vector<16x8xf32>
    %cst_34 = arith.constant dense<0.000000e+00> : vector<8x16xf32>
    %64 = tpu.matmul %59, %61, %cst_34 {dimension_numbers = #tpu.dot_dimension_numbers<[1], [1], [0], [0], [0, 0, 1, 0], [], []>} : vector<8x8xf32>, vector<16x8xf32>, vector<8x16xf32> -> vector<8x16xf32>
    %cst_35 = arith.constant -1.000000e+09 : f32
    %65 = vector.shape_cast %16 : vector<1x16xi1> to vector<1x16xi1>
    %66 = vector.broadcast %65 : vector<1x16xi1> to vector<8x16xi1>
    %67 = vector.broadcast %cst_35 : f32 to vector<8x16xf32>
    %68 = arith.select %66, %64, %67 : vector<8x16xi1>, vector<8x16xf32>
    %cst_36 = arith.constant dense<0xFF800000> : vector<8xf32>
    %69 = vector.multi_reduction <maximumf>, %68, %cst_36 [1] : vector<8x16xf32> to vector<8xf32>
    %70 = vector.shape_cast %69 : vector<8xf32> to vector<8x1xf32>
    %71 = vector.broadcast %70 : vector<8x1xf32> to vector<8x16xf32>
    %72 = arith.subf %68, %71 : vector<8x16xf32>
    %73 = math.exp %72 : vector<8x16xf32>
    %cst_37 = arith.constant dense<0.000000e+00> : vector<8xf32>
    %74 = vector.multi_reduction <add>, %73, %cst_37 [1] : vector<8x16xf32> to vector<8xf32>
    %75 = vector.shape_cast %74 : vector<8xf32> to vector<8x1xf32>
    %76 = tpu.reciprocal %75 {approx = true} : vector<8x1xf32> -> vector<8x1xf32>
    %77 = vector.broadcast %76 : vector<8x1xf32> to vector<8x16xf32>
    %78 = arith.mulf %73, %77 : vector<8x16xf32>
    %cst_38 = arith.constant dense<0.000000e+00> : vector<8x8xf32>
    %79 = tpu.matmul %78, %63, %cst_38 {dimension_numbers = #tpu.dot_dimension_numbers<[1], [0], [0], [1], [0, 0, 1, 1], [], []>} : vector<8x16xf32>, vector<16x8xf32>, vector<8x8xf32> -> vector<8x8xf32>
    %80 = vector.extract_strided_slice %11 {offsets = [0, 24], sizes = [8, 8], strides = [1, 1]} : vector<8x32xf32> to vector<8x8xf32>
    %c3 = arith.constant 3 : index
    %c0_39 = arith.constant 0 : index
    %c0_40 = arith.constant 0 : index
    %81 = vector.load %arg22[%c3, %c0_39, %c0_40] : memref<4x16x8xf32, #tpu.memory_space<vmem>>, vector<1x16x8xf32>
    %82 = vector.shape_cast %81 : vector<1x16x8xf32> to vector<16x8xf32>
    %c3_41 = arith.constant 3 : index
    %c0_42 = arith.constant 0 : index
    %c0_43 = arith.constant 0 : index
    %83 = vector.load %arg23[%c3_41, %c0_42, %c0_43] : memref<4x16x8xf32, #tpu.memory_space<vmem>>, vector<1x16x8xf32>
    %84 = vector.shape_cast %83 : vector<1x16x8xf32> to vector<16x8xf32>
    %cst_44 = arith.constant dense<0.000000e+00> : vector<8x16xf32>
    %85 = tpu.matmul %80, %82, %cst_44 {dimension_numbers = #tpu.dot_dimension_numbers<[1], [1], [0], [0], [0, 0, 1, 0], [], []>} : vector<8x8xf32>, vector<16x8xf32>, vector<8x16xf32> -> vector<8x16xf32>
    %cst_45 = arith.constant -1.000000e+09 : f32
    %86 = vector.shape_cast %16 : vector<1x16xi1> to vector<1x16xi1>
    %87 = vector.broadcast %86 : vector<1x16xi1> to vector<8x16xi1>
    %88 = vector.broadcast %cst_45 : f32 to vector<8x16xf32>
    %89 = arith.select %87, %85, %88 : vector<8x16xi1>, vector<8x16xf32>
    %cst_46 = arith.constant dense<0xFF800000> : vector<8xf32>
    %90 = vector.multi_reduction <maximumf>, %89, %cst_46 [1] : vector<8x16xf32> to vector<8xf32>
    %91 = vector.shape_cast %90 : vector<8xf32> to vector<8x1xf32>
    %92 = vector.broadcast %91 : vector<8x1xf32> to vector<8x16xf32>
    %93 = arith.subf %89, %92 : vector<8x16xf32>
    %94 = math.exp %93 : vector<8x16xf32>
    %cst_47 = arith.constant dense<0.000000e+00> : vector<8xf32>
    %95 = vector.multi_reduction <add>, %94, %cst_47 [1] : vector<8x16xf32> to vector<8xf32>
    %96 = vector.shape_cast %95 : vector<8xf32> to vector<8x1xf32>
    %97 = tpu.reciprocal %96 {approx = true} : vector<8x1xf32> -> vector<8x1xf32>
    %98 = vector.broadcast %97 : vector<8x1xf32> to vector<8x16xf32>
    %99 = arith.mulf %94, %98 : vector<8x16xf32>
    %cst_48 = arith.constant dense<0.000000e+00> : vector<8x8xf32>
    %100 = tpu.matmul %99, %84, %cst_48 {dimension_numbers = #tpu.dot_dimension_numbers<[1], [0], [0], [1], [0, 0, 1, 1], [], []>} : vector<8x16xf32>, vector<16x8xf32>, vector<8x8xf32> -> vector<8x8xf32>
    %101 = tpu.concatenate %37, %58, %79, %100 in 1 : vector<8x8xf32>, vector<8x8xf32>, vector<8x8xf32>, vector<8x8xf32> -> vector<8x32xf32>
    %c0_49 = arith.constant 0 : index
    %c0_50 = arith.constant 0 : index
    %102 = vector.load %arg11[%c0_49, %c0_50] : memref<32x32xf32, #tpu.memory_space<vmem>>, vector<32x32xf32>
    %cst_51 = arith.constant dense<0.000000e+00> : vector<8x32xf32>
    %103 = tpu.matmul %101, %102, %cst_51 {dimension_numbers = #tpu.dot_dimension_numbers<[1], [0], [0], [1], [0, 0, 1, 1], [], []>} : vector<8x32xf32>, vector<32x32xf32>, vector<8x32xf32> -> vector<8x32xf32>
    %c0_52 = arith.constant 0 : index
    %c0_53 = arith.constant 0 : index
    %104 = vector.load %arg12[%c0_52, %c0_53] : memref<1x32xf32, #tpu.memory_space<vmem>>, vector<1x32xf32>
    %105 = vector.broadcast %104 : vector<1x32xf32> to vector<8x32xf32>
    %106 = arith.addf %103, %105 : vector<8x32xf32>
    %107 = arith.addf %106, %4 : vector<8x32xf32>
    %c0_54 = arith.constant 0 : index
    %c0_55 = arith.constant 0 : index
    %108 = vector.load %arg13[%c0_54, %c0_55] : memref<1x32xf32, #tpu.memory_space<vmem>>, vector<1x32xf32>
    %c0_56 = arith.constant 0 : index
    %c0_57 = arith.constant 0 : index
    %109 = vector.load %arg14[%c0_56, %c0_57] : memref<1x32xf32, #tpu.memory_space<vmem>>, vector<1x32xf32>
    %cst_58 = arith.constant dense<0.000000e+00> : vector<8xf32>
    %110 = vector.multi_reduction <add>, %107, %cst_58 [1] : vector<8x32xf32> to vector<8xf32>
    %111 = vector.shape_cast %110 : vector<8xf32> to vector<8x1xf32>
    %cst_59 = arith.constant 3.200000e+01 : f32
    %112 = vector.broadcast %cst_59 : f32 to vector<8x1xf32>
    %113 = arith.divf %111, %112 : vector<8x1xf32>
    %114 = vector.broadcast %113 : vector<8x1xf32> to vector<8x32xf32>
    %115 = arith.subf %107, %114 : vector<8x32xf32>
    %116 = arith.mulf %115, %115 : vector<8x32xf32>
    %cst_60 = arith.constant dense<0.000000e+00> : vector<8xf32>
    %117 = vector.multi_reduction <add>, %116, %cst_60 [1] : vector<8x32xf32> to vector<8xf32>
    %118 = vector.shape_cast %117 : vector<8xf32> to vector<8x1xf32>
    %cst_61 = arith.constant 3.200000e+01 : f32
    %119 = vector.broadcast %cst_61 : f32 to vector<8x1xf32>
    %120 = arith.divf %118, %119 : vector<8x1xf32>
    %121 = vector.broadcast %113 : vector<8x1xf32> to vector<8x32xf32>
    %122 = arith.subf %107, %121 : vector<8x32xf32>
    %cst_62 = arith.constant 9.99999974E-6 : f32
    %123 = vector.broadcast %cst_62 : f32 to vector<8x1xf32>
    %124 = arith.addf %120, %123 : vector<8x1xf32>
    %125 = math.rsqrt %124 : vector<8x1xf32>
    %126 = vector.broadcast %125 : vector<8x1xf32> to vector<8x32xf32>
    %127 = arith.mulf %122, %126 : vector<8x32xf32>
    %128 = vector.broadcast %108 : vector<1x32xf32> to vector<8x32xf32>
    %129 = arith.mulf %127, %128 : vector<8x32xf32>
    %130 = vector.broadcast %109 : vector<1x32xf32> to vector<8x32xf32>
    %131 = arith.addf %129, %130 : vector<8x32xf32>
    %c0_63 = arith.constant 0 : index
    %c0_64 = arith.constant 0 : index
    %132 = vector.load %arg15[%c0_63, %c0_64] : memref<32x64xf32, #tpu.memory_space<vmem>>, vector<32x64xf32>
    %cst_65 = arith.constant dense<0.000000e+00> : vector<8x64xf32>
    %133 = tpu.matmul %131, %132, %cst_65 {dimension_numbers = #tpu.dot_dimension_numbers<[1], [0], [0], [1], [0, 0, 1, 1], [], []>} : vector<8x32xf32>, vector<32x64xf32>, vector<8x64xf32> -> vector<8x64xf32>
    %c0_66 = arith.constant 0 : index
    %c0_67 = arith.constant 0 : index
    %134 = vector.load %arg16[%c0_66, %c0_67] : memref<1x64xf32, #tpu.memory_space<vmem>>, vector<1x64xf32>
    %135 = vector.broadcast %134 : vector<1x64xf32> to vector<8x64xf32>
    %136 = arith.addf %133, %135 : vector<8x64xf32>
    %cst_68 = arith.constant 0.000000e+00 : f32
    %137 = vector.broadcast %cst_68 : f32 to vector<8x64xf32>
    %138 = arith.maximumf %136, %137 : vector<8x64xf32>
    %c0_69 = arith.constant 0 : index
    %c0_70 = arith.constant 0 : index
    %139 = vector.load %arg17[%c0_69, %c0_70] : memref<64x32xf32, #tpu.memory_space<vmem>>, vector<64x32xf32>
    %cst_71 = arith.constant dense<0.000000e+00> : vector<8x32xf32>
    %140 = tpu.matmul %138, %139, %cst_71 {dimension_numbers = #tpu.dot_dimension_numbers<[1], [0], [0], [1], [0, 0, 1, 1], [], []>} : vector<8x64xf32>, vector<64x32xf32>, vector<8x32xf32> -> vector<8x32xf32>
    %c0_72 = arith.constant 0 : index
    %c0_73 = arith.constant 0 : index
    %141 = vector.load %arg18[%c0_72, %c0_73] : memref<1x32xf32, #tpu.memory_space<vmem>>, vector<1x32xf32>
    %142 = vector.broadcast %141 : vector<1x32xf32> to vector<8x32xf32>
    %143 = arith.addf %140, %142 : vector<8x32xf32>
    %144 = arith.addf %143, %131 : vector<8x32xf32>
    %c0_74 = arith.constant 0 : index
    %c0_75 = arith.constant 0 : index
    %145 = vector.load %arg19[%c0_74, %c0_75] : memref<1x32xf32, #tpu.memory_space<vmem>>, vector<1x32xf32>
    %c0_76 = arith.constant 0 : index
    %c0_77 = arith.constant 0 : index
    %146 = vector.load %arg20[%c0_76, %c0_77] : memref<1x32xf32, #tpu.memory_space<vmem>>, vector<1x32xf32>
    %cst_78 = arith.constant dense<0.000000e+00> : vector<8xf32>
    %147 = vector.multi_reduction <add>, %144, %cst_78 [1] : vector<8x32xf32> to vector<8xf32>
    %148 = vector.shape_cast %147 : vector<8xf32> to vector<8x1xf32>
    %cst_79 = arith.constant 3.200000e+01 : f32
    %149 = vector.broadcast %cst_79 : f32 to vector<8x1xf32>
    %150 = arith.divf %148, %149 : vector<8x1xf32>
    %151 = vector.broadcast %150 : vector<8x1xf32> to vector<8x32xf32>
    %152 = arith.subf %144, %151 : vector<8x32xf32>
    %153 = arith.mulf %152, %152 : vector<8x32xf32>
    %cst_80 = arith.constant dense<0.000000e+00> : vector<8xf32>
    %154 = vector.multi_reduction <add>, %153, %cst_80 [1] : vector<8x32xf32> to vector<8xf32>
    %155 = vector.shape_cast %154 : vector<8xf32> to vector<8x1xf32>
    %cst_81 = arith.constant 3.200000e+01 : f32
    %156 = vector.broadcast %cst_81 : f32 to vector<8x1xf32>
    %157 = arith.divf %155, %156 : vector<8x1xf32>
    %158 = vector.broadcast %150 : vector<8x1xf32> to vector<8x32xf32>
    %159 = arith.subf %144, %158 : vector<8x32xf32>
    %cst_82 = arith.constant 9.99999974E-6 : f32
    %160 = vector.broadcast %cst_82 : f32 to vector<8x1xf32>
    %161 = arith.addf %157, %160 : vector<8x1xf32>
    %162 = math.rsqrt %161 : vector<8x1xf32>
    %163 = vector.broadcast %162 : vector<8x1xf32> to vector<8x32xf32>
    %164 = arith.mulf %159, %163 : vector<8x32xf32>
    %165 = vector.broadcast %145 : vector<1x32xf32> to vector<8x32xf32>
    %166 = arith.mulf %164, %165 : vector<8x32xf32>
    %167 = vector.broadcast %146 : vector<1x32xf32> to vector<8x32xf32>
    %168 = arith.addf %166, %167 : vector<8x32xf32>
    %c0_83 = arith.constant 0 : index
    %c0_84 = arith.constant 0 : index
    %c0_85 = arith.constant 0 : index
    %169 = vector.load %arg21[%c0_83, %c0_84, %c0_85] : memref<1x8x32xf32, #tpu.memory_space<vmem>>, vector<1x8x32xf32>
    %170 = vector.shape_cast %169 : vector<1x8x32xf32> to vector<8x32xf32>
    %171 = vector.shape_cast %168 : vector<8x32xf32> to vector<1x8x32xf32>
    tpu.vector_store %arg21[%c0_83, %c0_84, %c0_85], %171 {strides = array<i32>} : memref<1x8x32xf32, #tpu.memory_space<vmem>>, vector<1x8x32xf32>,
    return
  }
  func.func @transform_0(%arg0: i32, %arg1: i32, %arg2: memref<2xi32, #tpu.memory_space<smem>>) -> (i32, i32, i32) {
    %c0_i32 = arith.constant 0 : i32
    %c0_i32_0 = arith.constant 0 : i32
    return %arg0, %arg1, %c0_i32 : i32, i32, i32
  }
  func.func @transform_1(%arg0: i32, %arg1: i32, %arg2: memref<2xi32, #tpu.memory_space<smem>>) -> (i32, i32, i32) {
    %c0_i32 = arith.constant 0 : i32
    %c0_i32_0 = arith.constant 0 : i32
    %c0_i32_1 = arith.constant 0 : i32
    return %arg0, %c0_i32, %c0_i32_0 : i32, i32, i32
  }
  func.func @transform_2(%arg0: i32, %arg1: i32, %arg2: memref<2xi32, #tpu.memory_space<smem>>) -> (i32, i32) {
    %c0_i32 = arith.constant 0 : i32
    %c0_i32_0 = arith.constant 0 : i32
    %c0_i32_1 = arith.constant 0 : i32
    return %c0_i32, %c0_i32_0 : i32, i32
  }
  func.func @transform_3(%arg0: i32, %arg1: i32, %arg2: memref<2xi32, #tpu.memory_space<smem>>) -> (i32, i32) {
    %c0_i32 = arith.constant 0 : i32
    %c0_i32_0 = arith.constant 0 : i32
    %c0_i32_1 = arith.constant 0 : i32
    return %c0_i32, %c0_i32_0 : i32, i32
  }
  func.func @transform_4(%arg0: i32, %arg1: i32, %arg2: memref<2xi32, #tpu.memory_space<smem>>) -> (i32, i32) {
    %c0_i32 = arith.constant 0 : i32
    %c0_i32_0 = arith.constant 0 : i32
    %c0_i32_1 = arith.constant 0 : i32
    return %c0_i32, %c0_i32_0 : i32, i32
  }
  func.func @transform_5(%arg0: i32, %arg1: i32, %arg2: memref<2xi32, #tpu.memory_space<smem>>) -> (i32, i32) {
    %c0_i32 = arith.constant 0 : i32
    %c0_i32_0 = arith.constant 0 : i32
    %c0_i32_1 = arith.constant 0 : i32
    return %c0_i32, %c0_i32_0 : i32, i32
  }
  func.func @transform_6(%arg0: i32, %arg1: i32, %arg2: memref<2xi32, #tpu.memory_space<smem>>) -> (i32, i32) {
    %c0_i32 = arith.constant 0 : i32
    %c0_i32_0 = arith.constant 0 : i32
    %c0_i32_1 = arith.constant 0 : i32
    return %c0_i32, %c0_i32_0 : i32, i32
  }
  func.func @transform_7(%arg0: i32, %arg1: i32, %arg2: memref<2xi32, #tpu.memory_space<smem>>) -> (i32, i32) {
    %c0_i32 = arith.constant 0 : i32
    %c0_i32_0 = arith.constant 0 : i32
    %c0_i32_1 = arith.constant 0 : i32
    return %c0_i32, %c0_i32_0 : i32, i32
  }
  func.func @transform_8(%arg0: i32, %arg1: i32, %arg2: memref<2xi32, #tpu.memory_space<smem>>) -> (i32, i32) {
    %c0_i32 = arith.constant 0 : i32
    %c0_i32_0 = arith.constant 0 : i32
    %c0_i32_1 = arith.constant 0 : i32
    return %c0_i32, %c0_i32_0 : i32, i32
  }
  func.func @transform_9(%arg0: i32, %arg1: i32, %arg2: memref<2xi32, #tpu.memory_space<smem>>) -> (i32, i32) {
    %c0_i32 = arith.constant 0 : i32
    %c0_i32_0 = arith.constant 0 : i32
    %c0_i32_1 = arith.constant 0 : i32
    return %c0_i32, %c0_i32_0 : i32, i32
  }
  func.func @transform_10(%arg0: i32, %arg1: i32, %arg2: memref<2xi32, #tpu.memory_space<smem>>) -> (i32, i32) {
    %c0_i32 = arith.constant 0 : i32
    %c0_i32_0 = arith.constant 0 : i32
    %c0_i32_1 = arith.constant 0 : i32
    return %c0_i32, %c0_i32_0 : i32, i32
  }
  func.func @transform_11(%arg0: i32, %arg1: i32, %arg2: memref<2xi32, #tpu.memory_space<smem>>) -> (i32, i32) {
    %c0_i32 = arith.constant 0 : i32
    %c0_i32_0 = arith.constant 0 : i32
    %c0_i32_1 = arith.constant 0 : i32
    return %c0_i32, %c0_i32_0 : i32, i32
  }
  func.func @transform_12(%arg0: i32, %arg1: i32, %arg2: memref<2xi32, #tpu.memory_space<smem>>) -> (i32, i32) {
    %c0_i32 = arith.constant 0 : i32
    %c0_i32_0 = arith.constant 0 : i32
    %c0_i32_1 = arith.constant 0 : i32
    return %c0_i32, %c0_i32_0 : i32, i32
  }
  func.func @transform_13(%arg0: i32, %arg1: i32, %arg2: memref<2xi32, #tpu.memory_space<smem>>) -> (i32, i32) {
    %c0_i32 = arith.constant 0 : i32
    %c0_i32_0 = arith.constant 0 : i32
    %c0_i32_1 = arith.constant 0 : i32
    return %c0_i32, %c0_i32_0 : i32, i32
  }
  func.func @transform_14(%arg0: i32, %arg1: i32, %arg2: memref<2xi32, #tpu.memory_space<smem>>) -> (i32, i32) {
    %c0_i32 = arith.constant 0 : i32
    %c0_i32_0 = arith.constant 0 : i32
    %c0_i32_1 = arith.constant 0 : i32
    return %c0_i32, %c0_i32_0 : i32, i32
  }
  func.func @transform_15(%arg0: i32, %arg1: i32, %arg2: memref<2xi32, #tpu.memory_space<smem>>) -> (i32, i32) {
    %c0_i32 = arith.constant 0 : i32
    %c0_i32_0 = arith.constant 0 : i32
    %c0_i32_1 = arith.constant 0 : i32
    return %c0_i32, %c0_i32_0 : i32, i32
  }
  func.func @transform_16(%arg0: i32, %arg1: i32, %arg2: memref<2xi32, #tpu.memory_space<smem>>) -> (i32, i32) {
    %c0_i32 = arith.constant 0 : i32
    %c0_i32_0 = arith.constant 0 : i32
    %c0_i32_1 = arith.constant 0 : i32
    return %c0_i32, %c0_i32_0 : i32, i32
  }
  func.func @transform_17(%arg0: i32, %arg1: i32, %arg2: memref<2xi32, #tpu.memory_space<smem>>) -> (i32, i32) {
    %c0_i32 = arith.constant 0 : i32
    %c0_i32_0 = arith.constant 0 : i32
    %c0_i32_1 = arith.constant 0 : i32
    return %c0_i32, %c0_i32_0 : i32, i32
  }
  func.func @transform_18(%arg0: i32, %arg1: i32, %arg2: memref<2xi32, #tpu.memory_space<smem>>) -> (i32, i32, i32) {
    %c0_i32 = arith.constant 0 : i32
    %c0_i32_0 = arith.constant 0 : i32
    return %arg0, %arg1, %c0_i32 : i32, i32, i32
  }
}

module attributes {stable_mosaic.version = 11 : i64} {
  func.func @transformer_layer_kernel(%arg0: i32, %arg1: i32, %arg2: memref<2xi32, #tpu.memory_space<smem>>, %arg3: memref<1x8x32xf32, #tpu.memory_space<vmem>>, %arg4: memref<1x16x32xf32, #tpu.memory_space<vmem>>, %arg5: memref<32x32xf32, #tpu.memory_space<vmem>>, %arg6: memref<1x32xf32, #tpu.memory_space<vmem>>, %arg7: memref<32x32xf32, #tpu.memory_space<vmem>>, %arg8: memref<1x32xf32, #tpu.memory_space<vmem>>, %arg9: memref<32x32xf32, #tpu.memory_space<vmem>>, %arg10: memref<1x32xf32, #tpu.memory_space<vmem>>, %arg11: memref<32x32xf32, #tpu.memory_space<vmem>>, %arg12: memref<1x32xf32, #tpu.memory_space<vmem>>, %arg13: memref<1x32xf32, #tpu.memory_space<vmem>>, %arg14: memref<1x32xf32, #tpu.memory_space<vmem>>, %arg15: memref<32x64xf32, #tpu.memory_space<vmem>>, %arg16: memref<1x64xf32, #tpu.memory_space<vmem>>, %arg17: memref<64x32xf32, #tpu.memory_space<vmem>>, %arg18: memref<1x32xf32, #tpu.memory_space<vmem>>, %arg19: memref<1x32xf32, #tpu.memory_space<vmem>>, %arg20: memref<1x32xf32, #tpu.memory_space<vmem>>, %arg21: memref<1x8x32xf32, #tpu.memory_space<vmem>>, %arg22: memref<4x16x8xf32, #tpu.memory_space<vmem>>, %arg23: memref<4x16x8xf32, #tpu.memory_space<vmem>>) attributes {dimension_semantics = [#tpu.dimension_semantics<parallel>, #tpu.dimension_semantics<arbitrary>], iteration_bounds = array<i64: 2, 2>, scalar_prefetch = 1 : i64, scratch_operands = 2 : i64, tpu.core_type = #tpu.core_type<tc>, window_params = [{transform_indices = @transform_0, window_bounds = array<i64: 1, 8, 32>}, {transform_indices = @transform_1, window_bounds = array<i64: 1, 16, 32>}, {pipeline_mode = #tpu.pipeline_mode<synchronous>, transform_indices = @transform_2, window_bounds = array<i64: 32, 32>}, {pipeline_mode = #tpu.pipeline_mode<synchronous>, transform_indices = @transform_3, window_bounds = array<i64: 1, 32>}, {pipeline_mode = #tpu.pipeline_mode<synchronous>, transform_indices = @transform_4, window_bounds = array<i64: 32, 32>}, {pipeline_mode = #tpu.pipeline_mode<synchronous>, transform_indices = @transform_5, window_bounds = array<i64: 1, 32>}, {pipeline_mode = #tpu.pipeline_mode<synchronous>, transform_indices = @transform_6, window_bounds = array<i64: 32, 32>}, {pipeline_mode = #tpu.pipeline_mode<synchronous>, transform_indices = @transform_7, window_bounds = array<i64: 1, 32>}, {pipeline_mode = #tpu.pipeline_mode<synchronous>, transform_indices = @transform_8, window_bounds = array<i64: 32, 32>}, {pipeline_mode = #tpu.pipeline_mode<synchronous>, transform_indices = @transform_9, window_bounds = array<i64: 1, 32>}, {pipeline_mode = #tpu.pipeline_mode<synchronous>, transform_indices = @transform_10, window_bounds = array<i64: 1, 32>}, {pipeline_mode = #tpu.pipeline_mode<synchronous>, transform_indices = @transform_11, window_bounds = array<i64: 1, 32>}, {pipeline_mode = #tpu.pipeline_mode<synchronous>, transform_indices = @transform_12, window_bounds = array<i64: 32, 64>}, {pipeline_mode = #tpu.pipeline_mode<synchronous>, transform_indices = @transform_13, window_bounds = array<i64: 1, 64>}, {pipeline_mode = #tpu.pipeline_mode<synchronous>, transform_indices = @transform_14, window_bounds = array<i64: 64, 32>}, {pipeline_mode = #tpu.pipeline_mode<synchronous>, transform_indices = @transform_15, window_bounds = array<i64: 1, 32>}, {pipeline_mode = #tpu.pipeline_mode<synchronous>, transform_indices = @transform_16, window_bounds = array<i64: 1, 32>}, {pipeline_mode = #tpu.pipeline_mode<synchronous>, transform_indices = @transform_17, window_bounds = array<i64: 1, 32>}, {transform_indices = @transform_18, window_bounds = array<i64: 1, 8, 32>}]} {
    %c0_i32 = arith.constant 0 : i32
    %0 = arith.cmpi eq, %arg1, %c0_i32 : i32
    %1 = arith.extui %0 : i1 to i32
    %c0_i32_0 = arith.constant 0 : i32
    %2 = arith.cmpi ne, %1, %c0_i32_0 : i32
    scf.if %2 {
      %c0_86 = arith.constant 0 : index
      %c0_87 = arith.constant 0 : index
      %c0_88 = arith.constant 0 : index
      %172 = vector.load %arg4[%c0_86, %c0_87, %c0_88] : memref<1x16x32xf32, #tpu.memory_space<vmem>>, vector<1x16x32xf32>
      %173 = vector.shape_cast %172 : vector<1x16x32xf32> to vector<16x32xf32>
      %c0_89 = arith.constant 0 : index
      %c0_90 = arith.constant 0 : index
      %174 = vector.load %arg7[%c0_89, %c0_90] : memref<32x32xf32, #tpu.memory_space<vmem>>, vector<32x32xf32>
      %cst_91 = arith.constant dense<0.000000e+00> : vector<16x32xf32>
      %175 = tpu.matmul %173, %174, %cst_91 {dimension_numbers = #tpu.dot_dimension_numbers<[1], [0], [0], [1], [0, 0, 1, 1], [], []>} : vector<16x32xf32>, vector<32x32xf32>, vector<16x32xf32> -> vector<16x32xf32>
      %c0_92 = arith.constant 0 : index
      %c0_93 = arith.constant 0 : index
      %176 = vector.load %arg8[%c0_92, %c0_93] : memref<1x32xf32, #tpu.memory_space<vmem>>, vector<1x32xf32>
      %177 = vector.broadcast %176 : vector<1x32xf32> to vector<16x32xf32>
      %178 = arith.addf %175, %177 : vector<16x32xf32>
      %c0_94 = arith.constant 0 : index
      %c0_95 = arith.constant 0 : index
      %179 = vector.load %arg9[%c0_94, %c0_95] : memref<32x32xf32, #tpu.memory_space<vmem>>, vector<32x32xf32>
      %cst_96 = arith.constant dense<0.000000e+00> : vector<16x32xf32>
      %180 = tpu.matmul %173, %179, %cst_96 {dimension_numbers = #tpu.dot_dimension_numbers<[1], [0], [0], [1], [0, 0, 1, 1], [], []>} : vector<16x32xf32>, vector<32x32xf32>, vector<16x32xf32> -> vector<16x32xf32>
      %c0_97 = arith.constant 0 : index
      %c0_98 = arith.constant 0 : index
      %181 = vector.load %arg10[%c0_97, %c0_98] : memref<1x32xf32, #tpu.memory_space<vmem>>, vector<1x32xf32>
      %182 = vector.broadcast %181 : vector<1x32xf32> to vector<16x32xf32>
      %183 = arith.addf %180, %182 : vector<16x32xf32>
      %184 = vector.extract_strided_slice %178 {offsets = [0, 0], sizes = [16, 8], strides = [1, 1]} : vector<16x32xf32> to vector<16x8xf32>
      %c0_99 = arith.constant 0 : index
      %c0_100 = arith.constant 0 : index
      %c0_101 = arith.constant 0 : index
      %185 = vector.load %arg22[%c0_99, %c0_100, %c0_101] : memref<4x16x8xf32, #tpu.memory_space<vmem>>, vector<1x16x8xf32>
      %186 = vector.shape_cast %185 : vector<1x16x8xf32> to vector<16x8xf32>
      %187 = vector.shape_cast %184 : vector<16x8xf32> to vector<1x16x8xf32>
      tpu.vector_store %arg22[%c0_99, %c0_100, %c0_101], %187 {strides = array<i32>} : memref<4x16x8xf32, #tpu.memory_space<vmem>>, vector<1x16x8xf32>,
      %188 = vector.extract_strided_slice %183 {offsets = [0, 0], sizes = [16, 8], strides = [1, 1]} : vector<16x32xf32> to vector<16x8xf32>
      %c0_102 = arith.constant 0 : index
      %c0_103 = arith.constant 0 : index
      %c0_104 = arith.constant 0 : index
      %189 = vector.load %arg23[%c0_102, %c0_103, %c0_104] : memref<4x16x8xf32, #tpu.memory_space<vmem>>, vector<1x16x8xf32>
      %190 = vector.shape_cast %189 : vector<1x16x8xf32> to vector<16x8xf32>
      %191 = vector.shape_cast %188 : vector<16x8xf32> to vector<1x16x8xf32>
      tpu.vector_store %arg23[%c0_102, %c0_103, %c0_104], %191 {strides = array<i32>} : memref<4x16x8xf32, #tpu.memory_space<vmem>>, vector<1x16x8xf32>,
      %192 = vector.extract_strided_slice %178 {offsets = [0, 8], sizes = [16, 8], strides = [1, 1]} : vector<16x32xf32> to vector<16x8xf32>
      %c1_105 = arith.constant 1 : index
      %c0_106 = arith.constant 0 : index
      %c0_107 = arith.constant 0 : index
      %193 = vector.load %arg22[%c1_105, %c0_106, %c0_107] : memref<4x16x8xf32, #tpu.memory_space<vmem>>, vector<1x16x8xf32>
      %194 = vector.shape_cast %193 : vector<1x16x8xf32> to vector<16x8xf32>
      %195 = vector.shape_cast %192 : vector<16x8xf32> to vector<1x16x8xf32>
      tpu.vector_store %arg22[%c1_105, %c0_106, %c0_107], %195 {strides = array<i32>} : memref<4x16x8xf32, #tpu.memory_space<vmem>>, vector<1x16x8xf32>,
      %196 = vector.extract_strided_slice %183 {offsets = [0, 8], sizes = [16, 8], strides = [1, 1]} : vector<16x32xf32> to vector<16x8xf32>
      %c1_108 = arith.constant 1 : index
      %c0_109 = arith.constant 0 : index
      %c0_110 = arith.constant 0 : index
      %197 = vector.load %arg23[%c1_108, %c0_109, %c0_110] : memref<4x16x8xf32, #tpu.memory_space<vmem>>, vector<1x16x8xf32>
      %198 = vector.shape_cast %197 : vector<1x16x8xf32> to vector<16x8xf32>
      %199 = vector.shape_cast %196 : vector<16x8xf32> to vector<1x16x8xf32>
      tpu.vector_store %arg23[%c1_108, %c0_109, %c0_110], %199 {strides = array<i32>} : memref<4x16x8xf32, #tpu.memory_space<vmem>>, vector<1x16x8xf32>,
      %200 = vector.extract_strided_slice %178 {offsets = [0, 16], sizes = [16, 8], strides = [1, 1]} : vector<16x32xf32> to vector<16x8xf32>
      %c2_111 = arith.constant 2 : index
      %c0_112 = arith.constant 0 : index
      %c0_113 = arith.constant 0 : index
      %201 = vector.load %arg22[%c2_111, %c0_112, %c0_113] : memref<4x16x8xf32, #tpu.memory_space<vmem>>, vector<1x16x8xf32>
      %202 = vector.shape_cast %201 : vector<1x16x8xf32> to vector<16x8xf32>
      %203 = vector.shape_cast %200 : vector<16x8xf32> to vector<1x16x8xf32>
      tpu.vector_store %arg22[%c2_111, %c0_112, %c0_113], %203 {strides = array<i32>} : memref<4x16x8xf32, #tpu.memory_space<vmem>>, vector<1x16x8xf32>,
      %204 = vector.extract_strided_slice %183 {offsets = [0, 16], sizes = [16, 8], strides = [1, 1]} : vector<16x32xf32> to vector<16x8xf32>
      %c2_114 = arith.constant 2 : index
      %c0_115 = arith.constant 0 : index
      %c0_116 = arith.constant 0 : index
      %205 = vector.load %arg23[%c2_114, %c0_115, %c0_116] : memref<4x16x8xf32, #tpu.memory_space<vmem>>, vector<1x16x8xf32>
      %206 = vector.shape_cast %205 : vector<1x16x8xf32> to vector<16x8xf32>
      %207 = vector.shape_cast %204 : vector<16x8xf32> to vector<1x16x8xf32>
      tpu.vector_store %arg23[%c2_114, %c0_115, %c0_116], %207 {strides = array<i32>} : memref<4x16x8xf32, #tpu.memory_space<vmem>>, vector<1x16x8xf32>,
      %208 = vector.extract_strided_slice %178 {offsets = [0, 24], sizes = [16, 8], strides = [1, 1]} : vector<16x32xf32> to vector<16x8xf32>
      %c3_117 = arith.constant 3 : index
      %c0_118 = arith.constant 0 : index
      %c0_119 = arith.constant 0 : index
      %209 = vector.load %arg22[%c3_117, %c0_118, %c0_119] : memref<4x16x8xf32, #tpu.memory_space<vmem>>, vector<1x16x8xf32>
      %210 = vector.shape_cast %209 : vector<1x16x8xf32> to vector<16x8xf32>
      %211 = vector.shape_cast %208 : vector<16x8xf32> to vector<1x16x8xf32>
      tpu.vector_store %arg22[%c3_117, %c0_118, %c0_119], %211 {strides = array<i32>} : memref<4x16x8xf32, #tpu.memory_space<vmem>>, vector<1x16x8xf32>,
      %212 = vector.extract_strided_slice %183 {offsets = [0, 24], sizes = [16, 8], strides = [1, 1]} : vector<16x32xf32> to vector<16x8xf32>
      %c3_120 = arith.constant 3 : index
      %c0_121 = arith.constant 0 : index
      %c0_122 = arith.constant 0 : index
      %213 = vector.load %arg23[%c3_120, %c0_121, %c0_122] : memref<4x16x8xf32, #tpu.memory_space<vmem>>, vector<1x16x8xf32>
      %214 = vector.shape_cast %213 : vector<1x16x8xf32> to vector<16x8xf32>
      %215 = vector.shape_cast %212 : vector<16x8xf32> to vector<1x16x8xf32>
      tpu.vector_store %arg23[%c3_120, %c0_121, %c0_122], %215 {strides = array<i32>} : memref<4x16x8xf32, #tpu.memory_space<vmem>>, vector<1x16x8xf32>,
    } else {
    }
    %c0 = arith.constant 0 : index
    %c0_1 = arith.constant 0 : index
    %c0_2 = arith.constant 0 : index
    %3 = vector.load %arg3[%c0, %c0_1, %c0_2] : memref<1x8x32xf32, #tpu.memory_space<vmem>>, vector<1x8x32xf32>
    %4 = vector.shape_cast %3 : vector<1x8x32xf32> to vector<8x32xf32>
    %c0_3 = arith.constant 0 : index
    %c0_4 = arith.constant 0 : index
    %5 = vector.load %arg5[%c0_3, %c0_4] : memref<32x32xf32, #tpu.memory_space<vmem>>, vector<32x32xf32>
    %cst = arith.constant dense<0.000000e+00> : vector<8x32xf32>
    %6 = tpu.matmul %4, %5, %cst {dimension_numbers = #tpu.dot_dimension_numbers<[1], [0], [0], [1], [0, 0, 1, 1], [], []>} : vector<8x32xf32>, vector<32x32xf32>, vector<8x32xf32> -> vector<8x32xf32>
    %c0_5 = arith.constant 0 : index
    %c0_6 = arith.constant 0 : index
    %7 = vector.load %arg6[%c0_5, %c0_6] : memref<1x32xf32, #tpu.memory_space<vmem>>, vector<1x32xf32>
    %8 = vector.broadcast %7 : vector<1x32xf32> to vector<8x32xf32>
    %9 = arith.addf %6, %8 : vector<8x32xf32>
    %cst_7 = arith.constant 0.353553385 : f32
    %10 = vector.broadcast %cst_7 : f32 to vector<8x32xf32>
    %11 = arith.mulf %9, %10 : vector<8x32xf32>
    %12 = arith.index_cast %arg0 : i32 to index
    %13 = memref.load %arg2[%12] : memref<2xi32, #tpu.memory_space<smem>>
    %14 = tpu.iota {dimensions = array<i32: 1>} : vector<1x16xi32>
    %15 = vector.broadcast %13 : i32 to vector<1x16xi32>
    %16 = arith.cmpi slt, %14, %15 : vector<1x16xi32>
    %17 = vector.extract_strided_slice %11 {offsets = [0, 0], sizes = [8, 8], strides = [1, 1]} : vector<8x32xf32> to vector<8x8xf32>
    %c0_8 = arith.constant 0 : index
    %c0_9 = arith.constant 0 : index
    %c0_10 = arith.constant 0 : index
    %18 = vector.load %arg22[%c0_8, %c0_9, %c0_10] : memref<4x16x8xf32, #tpu.memory_space<vmem>>, vector<1x16x8xf32>
    %19 = vector.shape_cast %18 : vector<1x16x8xf32> to vector<16x8xf32>
    %c0_11 = arith.constant 0 : index
    %c0_12 = arith.constant 0 : index
    %c0_13 = arith.constant 0 : index
    %20 = vector.load %arg23[%c0_11, %c0_12, %c0_13] : memref<4x16x8xf32, #tpu.memory_space<vmem>>, vector<1x16x8xf32>
    %21 = vector.shape_cast %20 : vector<1x16x8xf32> to vector<16x8xf32>
    %cst_14 = arith.constant dense<0.000000e+00> : vector<8x16xf32>
    %22 = tpu.matmul %17, %19, %cst_14 {dimension_numbers = #tpu.dot_dimension_numbers<[1], [1], [0], [0], [0, 0, 1, 0], [], []>} : vector<8x8xf32>, vector<16x8xf32>, vector<8x16xf32> -> vector<8x16xf32>
    %cst_15 = arith.constant -1.000000e+09 : f32
    %23 = vector.shape_cast %16 : vector<1x16xi1> to vector<1x16xi1>
    %24 = vector.broadcast %23 : vector<1x16xi1> to vector<8x16xi1>
    %25 = vector.broadcast %cst_15 : f32 to vector<8x16xf32>
    %26 = arith.select %24, %22, %25 : vector<8x16xi1>, vector<8x16xf32>
    %cst_16 = arith.constant dense<0xFF800000> : vector<8xf32>
    %27 = vector.multi_reduction <maximumf>, %26, %cst_16 [1] : vector<8x16xf32> to vector<8xf32>
    %28 = vector.shape_cast %27 : vector<8xf32> to vector<8x1xf32>
    %29 = vector.broadcast %28 : vector<8x1xf32> to vector<8x16xf32>
    %30 = arith.subf %26, %29 : vector<8x16xf32>
    %31 = math.exp %30 : vector<8x16xf32>
    %cst_17 = arith.constant dense<0.000000e+00> : vector<8xf32>
    %32 = vector.multi_reduction <add>, %31, %cst_17 [1] : vector<8x16xf32> to vector<8xf32>
    %33 = vector.shape_cast %32 : vector<8xf32> to vector<8x1xf32>
    %34 = tpu.reciprocal %33 {approx = true} : vector<8x1xf32> -> vector<8x1xf32>
    %35 = vector.broadcast %34 : vector<8x1xf32> to vector<8x16xf32>
    %36 = arith.mulf %31, %35 : vector<8x16xf32>
    %cst_18 = arith.constant dense<0.000000e+00> : vector<8x8xf32>
    %37 = tpu.matmul %36, %21, %cst_18 {dimension_numbers = #tpu.dot_dimension_numbers<[1], [0], [0], [1], [0, 0, 1, 1], [], []>} : vector<8x16xf32>, vector<16x8xf32>, vector<8x8xf32> -> vector<8x8xf32>
    %38 = vector.extract_strided_slice %11 {offsets = [0, 8], sizes = [8, 8], strides = [1, 1]} : vector<8x32xf32> to vector<8x8xf32>
    %c1 = arith.constant 1 : index
    %c0_19 = arith.constant 0 : index
    %c0_20 = arith.constant 0 : index
    %39 = vector.load %arg22[%c1, %c0_19, %c0_20] : memref<4x16x8xf32, #tpu.memory_space<vmem>>, vector<1x16x8xf32>
    %40 = vector.shape_cast %39 : vector<1x16x8xf32> to vector<16x8xf32>
    %c1_21 = arith.constant 1 : index
    %c0_22 = arith.constant 0 : index
    %c0_23 = arith.constant 0 : index
    %41 = vector.load %arg23[%c1_21, %c0_22, %c0_23] : memref<4x16x8xf32, #tpu.memory_space<vmem>>, vector<1x16x8xf32>
    %42 = vector.shape_cast %41 : vector<1x16x8xf32> to vector<16x8xf32>
    %cst_24 = arith.constant dense<0.000000e+00> : vector<8x16xf32>
    %43 = tpu.matmul %38, %40, %cst_24 {dimension_numbers = #tpu.dot_dimension_numbers<[1], [1], [0], [0], [0, 0, 1, 0], [], []>} : vector<8x8xf32>, vector<16x8xf32>, vector<8x16xf32> -> vector<8x16xf32>
    %cst_25 = arith.constant -1.000000e+09 : f32
    %44 = vector.shape_cast %16 : vector<1x16xi1> to vector<1x16xi1>
    %45 = vector.broadcast %44 : vector<1x16xi1> to vector<8x16xi1>
    %46 = vector.broadcast %cst_25 : f32 to vector<8x16xf32>
    %47 = arith.select %45, %43, %46 : vector<8x16xi1>, vector<8x16xf32>
    %cst_26 = arith.constant dense<0xFF800000> : vector<8xf32>
    %48 = vector.multi_reduction <maximumf>, %47, %cst_26 [1] : vector<8x16xf32> to vector<8xf32>
    %49 = vector.shape_cast %48 : vector<8xf32> to vector<8x1xf32>
    %50 = vector.broadcast %49 : vector<8x1xf32> to vector<8x16xf32>
    %51 = arith.subf %47, %50 : vector<8x16xf32>
    %52 = math.exp %51 : vector<8x16xf32>
    %cst_27 = arith.constant dense<0.000000e+00> : vector<8xf32>
    %53 = vector.multi_reduction <add>, %52, %cst_27 [1] : vector<8x16xf32> to vector<8xf32>
    %54 = vector.shape_cast %53 : vector<8xf32> to vector<8x1xf32>
    %55 = tpu.reciprocal %54 {approx = true} : vector<8x1xf32> -> vector<8x1xf32>
    %56 = vector.broadcast %55 : vector<8x1xf32> to vector<8x16xf32>
    %57 = arith.mulf %52, %56 : vector<8x16xf32>
    %cst_28 = arith.constant dense<0.000000e+00> : vector<8x8xf32>
    %58 = tpu.matmul %57, %42, %cst_28 {dimension_numbers = #tpu.dot_dimension_numbers<[1], [0], [0], [1], [0, 0, 1, 1], [], []>} : vector<8x16xf32>, vector<16x8xf32>, vector<8x8xf32> -> vector<8x8xf32>
    %59 = vector.extract_strided_slice %11 {offsets = [0, 16], sizes = [8, 8], strides = [1, 1]} : vector<8x32xf32> to vector<8x8xf32>
    %c2 = arith.constant 2 : index
    %c0_29 = arith.constant 0 : index
    %c0_30 = arith.constant 0 : index
    %60 = vector.load %arg22[%c2, %c0_29, %c0_30] : memref<4x16x8xf32, #tpu.memory_space<vmem>>, vector<1x16x8xf32>
    %61 = vector.shape_cast %60 : vector<1x16x8xf32> to vector<16x8xf32>
    %c2_31 = arith.constant 2 : index
    %c0_32 = arith.constant 0 : index
    %c0_33 = arith.constant 0 : index
    %62 = vector.load %arg23[%c2_31, %c0_32, %c0_33] : memref<4x16x8xf32, #tpu.memory_space<vmem>>, vector<1x16x8xf32>
    %63 = vector.shape_cast %62 : vector<1x16x8xf32> to vector<16x8xf32>
    %cst_34 = arith.constant dense<0.000000e+00> : vector<8x16xf32>
    %64 = tpu.matmul %59, %61, %cst_34 {dimension_numbers = #tpu.dot_dimension_numbers<[1], [1], [0], [0], [0, 0, 1, 0], [], []>} : vector<8x8xf32>, vector<16x8xf32>, vector<8x16xf32> -> vector<8x16xf32>
    %cst_35 = arith.constant -1.000000e+09 : f32
    %65 = vector.shape_cast %16 : vector<1x16xi1> to vector<1x16xi1>
    %66 = vector.broadcast %65 : vector<1x16xi1> to vector<8x16xi1>
    %67 = vector.broadcast %cst_35 : f32 to vector<8x16xf32>
    %68 = arith.select %66, %64, %67 : vector<8x16xi1>, vector<8x16xf32>
    %cst_36 = arith.constant dense<0xFF800000> : vector<8xf32>
    %69 = vector.multi_reduction <maximumf>, %68, %cst_36 [1] : vector<8x16xf32> to vector<8xf32>
    %70 = vector.shape_cast %69 : vector<8xf32> to vector<8x1xf32>
    %71 = vector.broadcast %70 : vector<8x1xf32> to vector<8x16xf32>
    %72 = arith.subf %68, %71 : vector<8x16xf32>
    %73 = math.exp %72 : vector<8x16xf32>
    %cst_37 = arith.constant dense<0.000000e+00> : vector<8xf32>
    %74 = vector.multi_reduction <add>, %73, %cst_37 [1] : vector<8x16xf32> to vector<8xf32>
    %75 = vector.shape_cast %74 : vector<8xf32> to vector<8x1xf32>
    %76 = tpu.reciprocal %75 {approx = true} : vector<8x1xf32> -> vector<8x1xf32>
    %77 = vector.broadcast %76 : vector<8x1xf32> to vector<8x16xf32>
    %78 = arith.mulf %73, %77 : vector<8x16xf32>
    %cst_38 = arith.constant dense<0.000000e+00> : vector<8x8xf32>
    %79 = tpu.matmul %78, %63, %cst_38 {dimension_numbers = #tpu.dot_dimension_numbers<[1], [0], [0], [1], [0, 0, 1, 1], [], []>} : vector<8x16xf32>, vector<16x8xf32>, vector<8x8xf32> -> vector<8x8xf32>
    %80 = vector.extract_strided_slice %11 {offsets = [0, 24], sizes = [8, 8], strides = [1, 1]} : vector<8x32xf32> to vector<8x8xf32>
    %c3 = arith.constant 3 : index
    %c0_39 = arith.constant 0 : index
    %c0_40 = arith.constant 0 : index
    %81 = vector.load %arg22[%c3, %c0_39, %c0_40] : memref<4x16x8xf32, #tpu.memory_space<vmem>>, vector<1x16x8xf32>
    %82 = vector.shape_cast %81 : vector<1x16x8xf32> to vector<16x8xf32>
    %c3_41 = arith.constant 3 : index
    %c0_42 = arith.constant 0 : index
    %c0_43 = arith.constant 0 : index
    %83 = vector.load %arg23[%c3_41, %c0_42, %c0_43] : memref<4x16x8xf32, #tpu.memory_space<vmem>>, vector<1x16x8xf32>
    %84 = vector.shape_cast %83 : vector<1x16x8xf32> to vector<16x8xf32>
    %cst_44 = arith.constant dense<0.000000e+00> : vector<8x16xf32>
    %85 = tpu.matmul %80, %82, %cst_44 {dimension_numbers = #tpu.dot_dimension_numbers<[1], [1], [0], [0], [0, 0, 1, 0], [], []>} : vector<8x8xf32>, vector<16x8xf32>, vector<8x16xf32> -> vector<8x16xf32>
    %cst_45 = arith.constant -1.000000e+09 : f32
    %86 = vector.shape_cast %16 : vector<1x16xi1> to vector<1x16xi1>
    %87 = vector.broadcast %86 : vector<1x16xi1> to vector<8x16xi1>
    %88 = vector.broadcast %cst_45 : f32 to vector<8x16xf32>
    %89 = arith.select %87, %85, %88 : vector<8x16xi1>, vector<8x16xf32>
    %cst_46 = arith.constant dense<0xFF800000> : vector<8xf32>
    %90 = vector.multi_reduction <maximumf>, %89, %cst_46 [1] : vector<8x16xf32> to vector<8xf32>
    %91 = vector.shape_cast %90 : vector<8xf32> to vector<8x1xf32>
    %92 = vector.broadcast %91 : vector<8x1xf32> to vector<8x16xf32>
    %93 = arith.subf %89, %92 : vector<8x16xf32>
    %94 = math.exp %93 : vector<8x16xf32>
    %cst_47 = arith.constant dense<0.000000e+00> : vector<8xf32>
    %95 = vector.multi_reduction <add>, %94, %cst_47 [1] : vector<8x16xf32> to vector<8xf32>
    %96 = vector.shape_cast %95 : vector<8xf32> to vector<8x1xf32>
    %97 = tpu.reciprocal %96 {approx = true} : vector<8x1xf32> -> vector<8x1xf32>
    %98 = vector.broadcast %97 : vector<8x1xf32> to vector<8x16xf32>
    %99 = arith.mulf %94, %98 : vector<8x16xf32>
    %cst_48 = arith.constant dense<0.000000e+00> : vector<8x8xf32>
    %100 = tpu.matmul %99, %84, %cst_48 {dimension_numbers = #tpu.dot_dimension_numbers<[1], [0], [0], [1], [0, 0, 1, 1], [], []>} : vector<8x16xf32>, vector<16x8xf32>, vector<8x8xf32> -> vector<8x8xf32>
    %101 = tpu.concatenate %37, %58, %79, %100 in 1 : vector<8x8xf32>, vector<8x8xf32>, vector<8x8xf32>, vector<8x8xf32> -> vector<8x32xf32>
    %c0_49 = arith.constant 0 : index
    %c0_50 = arith.constant 0 : index
    %102 = vector.load %arg11[%c0_49, %c0_50] : memref<32x32xf32, #tpu.memory_space<vmem>>, vector<32x32xf32>
    %cst_51 = arith.constant dense<0.000000e+00> : vector<8x32xf32>
    %103 = tpu.matmul %101, %102, %cst_51 {dimension_numbers = #tpu.dot_dimension_numbers<[1], [0], [0], [1], [0, 0, 1, 1], [], []>} : vector<8x32xf32>, vector<32x32xf32>, vector<8x32xf32> -> vector<8x32xf32>
    %c0_52 = arith.constant 0 : index
    %c0_53 = arith.constant 0 : index
    %104 = vector.load %arg12[%c0_52, %c0_53] : memref<1x32xf32, #tpu.memory_space<vmem>>, vector<1x32xf32>
    %105 = vector.broadcast %104 : vector<1x32xf32> to vector<8x32xf32>
    %106 = arith.addf %103, %105 : vector<8x32xf32>
    %107 = arith.addf %106, %4 : vector<8x32xf32>
    %c0_54 = arith.constant 0 : index
    %c0_55 = arith.constant 0 : index
    %108 = vector.load %arg13[%c0_54, %c0_55] : memref<1x32xf32, #tpu.memory_space<vmem>>, vector<1x32xf32>
    %c0_56 = arith.constant 0 : index
    %c0_57 = arith.constant 0 : index
    %109 = vector.load %arg14[%c0_56, %c0_57] : memref<1x32xf32, #tpu.memory_space<vmem>>, vector<1x32xf32>
    %cst_58 = arith.constant dense<0.000000e+00> : vector<8xf32>
    %110 = vector.multi_reduction <add>, %107, %cst_58 [1] : vector<8x32xf32> to vector<8xf32>
    %111 = vector.shape_cast %110 : vector<8xf32> to vector<8x1xf32>
    %cst_59 = arith.constant 3.200000e+01 : f32
    %112 = vector.broadcast %cst_59 : f32 to vector<8x1xf32>
    %113 = arith.divf %111, %112 : vector<8x1xf32>
    %114 = vector.broadcast %113 : vector<8x1xf32> to vector<8x32xf32>
    %115 = arith.subf %107, %114 : vector<8x32xf32>
    %116 = arith.mulf %115, %115 : vector<8x32xf32>
    %cst_60 = arith.constant dense<0.000000e+00> : vector<8xf32>
    %117 = vector.multi_reduction <add>, %116, %cst_60 [1] : vector<8x32xf32> to vector<8xf32>
    %118 = vector.shape_cast %117 : vector<8xf32> to vector<8x1xf32>
    %cst_61 = arith.constant 3.200000e+01 : f32
    %119 = vector.broadcast %cst_61 : f32 to vector<8x1xf32>
    %120 = arith.divf %118, %119 : vector<8x1xf32>
    %121 = vector.broadcast %113 : vector<8x1xf32> to vector<8x32xf32>
    %122 = arith.subf %107, %121 : vector<8x32xf32>
    %cst_62 = arith.constant 9.99999974E-6 : f32
    %123 = vector.broadcast %cst_62 : f32 to vector<8x1xf32>
    %124 = arith.addf %120, %123 : vector<8x1xf32>
    %125 = math.rsqrt %124 : vector<8x1xf32>
    %126 = vector.broadcast %125 : vector<8x1xf32> to vector<8x32xf32>
    %127 = arith.mulf %122, %126 : vector<8x32xf32>
    %128 = vector.broadcast %108 : vector<1x32xf32> to vector<8x32xf32>
    %129 = arith.mulf %127, %128 : vector<8x32xf32>
    %130 = vector.broadcast %109 : vector<1x32xf32> to vector<8x32xf32>
    %131 = arith.addf %129, %130 : vector<8x32xf32>
    %c0_63 = arith.constant 0 : index
    %c0_64 = arith.constant 0 : index
    %132 = vector.load %arg15[%c0_63, %c0_64] : memref<32x64xf32, #tpu.memory_space<vmem>>, vector<32x64xf32>
    %cst_65 = arith.constant dense<0.000000e+00> : vector<8x64xf32>
    %133 = tpu.matmul %131, %132, %cst_65 {dimension_numbers = #tpu.dot_dimension_numbers<[1], [0], [0], [1], [0, 0, 1, 1], [], []>} : vector<8x32xf32>, vector<32x64xf32>, vector<8x64xf32> -> vector<8x64xf32>
    %c0_66 = arith.constant 0 : index
    %c0_67 = arith.constant 0 : index
    %134 = vector.load %arg16[%c0_66, %c0_67] : memref<1x64xf32, #tpu.memory_space<vmem>>, vector<1x64xf32>
    %135 = vector.broadcast %134 : vector<1x64xf32> to vector<8x64xf32>
    %136 = arith.addf %133, %135 : vector<8x64xf32>
    %cst_68 = arith.constant 0.000000e+00 : f32
    %137 = vector.broadcast %cst_68 : f32 to vector<8x64xf32>
    %138 = arith.maximumf %136, %137 : vector<8x64xf32>
    %c0_69 = arith.constant 0 : index
    %c0_70 = arith.constant 0 : index
    %139 = vector.load %arg17[%c0_69, %c0_70] : memref<64x32xf32, #tpu.memory_space<vmem>>, vector<64x32xf32>
    %cst_71 = arith.constant dense<0.000000e+00> : vector<8x32xf32>
    %140 = tpu.matmul %138, %139, %cst_71 {dimension_numbers = #tpu.dot_dimension_numbers<[1], [0], [0], [1], [0, 0, 1, 1], [], []>} : vector<8x64xf32>, vector<64x32xf32>, vector<8x32xf32> -> vector<8x32xf32>
    %c0_72 = arith.constant 0 : index
    %c0_73 = arith.constant 0 : index
    %141 = vector.load %arg18[%c0_72, %c0_73] : memref<1x32xf32, #tpu.memory_space<vmem>>, vector<1x32xf32>
    %142 = vector.broadcast %141 : vector<1x32xf32> to vector<8x32xf32>
    %143 = arith.addf %140, %142 : vector<8x32xf32>
    %144 = arith.addf %143, %131 : vector<8x32xf32>
    %c0_74 = arith.constant 0 : index
    %c0_75 = arith.constant 0 : index
    %145 = vector.load %arg19[%c0_74, %c0_75] : memref<1x32xf32, #tpu.memory_space<vmem>>, vector<1x32xf32>
    %c0_76 = arith.constant 0 : index
    %c0_77 = arith.constant 0 : index
    %146 = vector.load %arg20[%c0_76, %c0_77] : memref<1x32xf32, #tpu.memory_space<vmem>>, vector<1x32xf32>
    %cst_78 = arith.constant dense<0.000000e+00> : vector<8xf32>
    %147 = vector.multi_reduction <add>, %144, %cst_78 [1] : vector<8x32xf32> to vector<8xf32>
    %148 = vector.shape_cast %147 : vector<8xf32> to vector<8x1xf32>
    %cst_79 = arith.constant 3.200000e+01 : f32
    %149 = vector.broadcast %cst_79 : f32 to vector<8x1xf32>
    %150 = arith.divf %148, %149 : vector<8x1xf32>
    %151 = vector.broadcast %150 : vector<8x1xf32> to vector<8x32xf32>
    %152 = arith.subf %144, %151 : vector<8x32xf32>
    %153 = arith.mulf %152, %152 : vector<8x32xf32>
    %cst_80 = arith.constant dense<0.000000e+00> : vector<8xf32>
    %154 = vector.multi_reduction <add>, %153, %cst_80 [1] : vector<8x32xf32> to vector<8xf32>
    %155 = vector.shape_cast %154 : vector<8xf32> to vector<8x1xf32>
    %cst_81 = arith.constant 3.200000e+01 : f32
    %156 = vector.broadcast %cst_81 : f32 to vector<8x1xf32>
    %157 = arith.divf %155, %156 : vector<8x1xf32>
    %158 = vector.broadcast %150 : vector<8x1xf32> to vector<8x32xf32>
    %159 = arith.subf %144, %158 : vector<8x32xf32>
    %cst_82 = arith.constant 9.99999974E-6 : f32
    %160 = vector.broadcast %cst_82 : f32 to vector<8x1xf32>
    %161 = arith.addf %157, %160 : vector<8x1xf32>
    %162 = math.rsqrt %161 : vector<8x1xf32>
    %163 = vector.broadcast %162 : vector<8x1xf32> to vector<8x32xf32>
    %164 = arith.mulf %159, %163 : vector<8x32xf32>
    %165 = vector.broadcast %145 : vector<1x32xf32> to vector<8x32xf32>
    %166 = arith.mulf %164, %165 : vector<8x32xf32>
    %167 = vector.broadcast %146 : vector<1x32xf32> to vector<8x32xf32>
    %168 = arith.addf %166, %167 : vector<8x32xf32>
    %c0_83 = arith.constant 0 : index
    %c0_84 = arith.constant 0 : index
    %c0_85 = arith.constant 0 : index
    %169 = vector.load %arg21[%c0_83, %c0_84, %c0_85] : memref<1x8x32xf32, #tpu.memory_space<vmem>>, vector<1x8x32xf32>
    %170 = vector.shape_cast %169 : vector<1x8x32xf32> to vector<8x32xf32>
    %171 = vector.shape_cast %168 : vector<8x32xf32> to vector<1x8x32xf32>
    tpu.vector_store %arg21[%c0_83, %c0_84, %c0_85], %171 {strides = array<i32>} : memref<1x8x32xf32, #tpu.memory_space<vmem>>, vector<1x8x32xf32>,
    return
  }
  func.func @transform_0(%arg0: i32, %arg1: i32, %arg2: memref<2xi32, #tpu.memory_space<smem>>) -> (i32, i32, i32) {
    %c0_i32 = arith.constant 0 : i32
    %c0_i32_0 = arith.constant 0 : i32
    return %arg0, %arg1, %c0_i32 : i32, i32, i32
  }
  func.func @transform_1(%arg0: i32, %arg1: i32, %arg2: memref<2xi32, #tpu.memory_space<smem>>) -> (i32, i32, i32) {
    %c0_i32 = arith.constant 0 : i32
    %c0_i32_0 = arith.constant 0 : i32
    %c0_i32_1 = arith.constant 0 : i32
    return %arg0, %c0_i32, %c0_i32_0 : i32, i32, i32
  }
  func.func @transform_2(%arg0: i32, %arg1: i32, %arg2: memref<2xi32, #tpu.memory_space<smem>>) -> (i32, i32) {
    %c0_i32 = arith.constant 0 : i32
    %c0_i32_0 = arith.constant 0 : i32
    %c0_i32_1 = arith.constant 0 : i32
    return %c0_i32, %c0_i32_0 : i32, i32
  }
  func.func @transform_3(%arg0: i32, %arg1: i32, %arg2: memref<2xi32, #tpu.memory_space<smem>>) -> (i32, i32) {
    %c0_i32 = arith.constant 0 : i32
    %c0_i32_0 = arith.constant 0 : i32
    %c0_i32_1 = arith.constant 0 : i32
    return %c0_i32, %c0_i32_0 : i32, i32
  }
  func.func @transform_4(%arg0: i32, %arg1: i32, %arg2: memref<2xi32, #tpu.memory_space<smem>>) -> (i32, i32) {
    %c0_i32 = arith.constant 0 : i32
    %c0_i32_0 = arith.constant 0 : i32
    %c0_i32_1 = arith.constant 0 : i32
    return %c0_i32, %c0_i32_0 : i32, i32
  }
  func.func @transform_5(%arg0: i32, %arg1: i32, %arg2: memref<2xi32, #tpu.memory_space<smem>>) -> (i32, i32) {
    %c0_i32 = arith.constant 0 : i32
    %c0_i32_0 = arith.constant 0 : i32
    %c0_i32_1 = arith.constant 0 : i32
    return %c0_i32, %c0_i32_0 : i32, i32
  }
  func.func @transform_6(%arg0: i32, %arg1: i32, %arg2: memref<2xi32, #tpu.memory_space<smem>>) -> (i32, i32) {
    %c0_i32 = arith.constant 0 : i32
    %c0_i32_0 = arith.constant 0 : i32
    %c0_i32_1 = arith.constant 0 : i32
    return %c0_i32, %c0_i32_0 : i32, i32
  }
  func.func @transform_7(%arg0: i32, %arg1: i32, %arg2: memref<2xi32, #tpu.memory_space<smem>>) -> (i32, i32) {
    %c0_i32 = arith.constant 0 : i32
    %c0_i32_0 = arith.constant 0 : i32
    %c0_i32_1 = arith.constant 0 : i32
    return %c0_i32, %c0_i32_0 : i32, i32
  }
  func.func @transform_8(%arg0: i32, %arg1: i32, %arg2: memref<2xi32, #tpu.memory_space<smem>>) -> (i32, i32) {
    %c0_i32 = arith.constant 0 : i32
    %c0_i32_0 = arith.constant 0 : i32
    %c0_i32_1 = arith.constant 0 : i32
    return %c0_i32, %c0_i32_0 : i32, i32
  }
  func.func @transform_9(%arg0: i32, %arg1: i32, %arg2: memref<2xi32, #tpu.memory_space<smem>>) -> (i32, i32) {
    %c0_i32 = arith.constant 0 : i32
    %c0_i32_0 = arith.constant 0 : i32
    %c0_i32_1 = arith.constant 0 : i32
    return %c0_i32, %c0_i32_0 : i32, i32
  }
  func.func @transform_10(%arg0: i32, %arg1: i32, %arg2: memref<2xi32, #tpu.memory_space<smem>>) -> (i32, i32) {
    %c0_i32 = arith.constant 0 : i32
    %c0_i32_0 = arith.constant 0 : i32
    %c0_i32_1 = arith.constant 0 : i32
    return %c0_i32, %c0_i32_0 : i32, i32
  }
  func.func @transform_11(%arg0: i32, %arg1: i32, %arg2: memref<2xi32, #tpu.memory_space<smem>>) -> (i32, i32) {
    %c0_i32 = arith.constant 0 : i32
    %c0_i32_0 = arith.constant 0 : i32
    %c0_i32_1 = arith.constant 0 : i32
    return %c0_i32, %c0_i32_0 : i32, i32
  }
  func.func @transform_12(%arg0: i32, %arg1: i32, %arg2: memref<2xi32, #tpu.memory_space<smem>>) -> (i32, i32) {
    %c0_i32 = arith.constant 0 : i32
    %c0_i32_0 = arith.constant 0 : i32
    %c0_i32_1 = arith.constant 0 : i32
    return %c0_i32, %c0_i32_0 : i32, i32
  }
  func.func @transform_13(%arg0: i32, %arg1: i32, %arg2: memref<2xi32, #tpu.memory_space<smem>>) -> (i32, i32) {
    %c0_i32 = arith.constant 0 : i32
    %c0_i32_0 = arith.constant 0 : i32
    %c0_i32_1 = arith.constant 0 : i32
    return %c0_i32, %c0_i32_0 : i32, i32
  }
  func.func @transform_14(%arg0: i32, %arg1: i32, %arg2: memref<2xi32, #tpu.memory_space<smem>>) -> (i32, i32) {
    %c0_i32 = arith.constant 0 : i32
    %c0_i32_0 = arith.constant 0 : i32
    %c0_i32_1 = arith.constant 0 : i32
    return %c0_i32, %c0_i32_0 : i32, i32
  }
  func.func @transform_15(%arg0: i32, %arg1: i32, %arg2: memref<2xi32, #tpu.memory_space<smem>>) -> (i32, i32) {
    %c0_i32 = arith.constant 0 : i32
    %c0_i32_0 = arith.constant 0 : i32
    %c0_i32_1 = arith.constant 0 : i32
    return %c0_i32, %c0_i32_0 : i32, i32
  }
  func.func @transform_16(%arg0: i32, %arg1: i32, %arg2: memref<2xi32, #tpu.memory_space<smem>>) -> (i32, i32) {
    %c0_i32 = arith.constant 0 : i32
    %c0_i32_0 = arith.constant 0 : i32
    %c0_i32_1 = arith.constant 0 : i32
    return %c0_i32, %c0_i32_0 : i32, i32
  }
  func.func @transform_17(%arg0: i32, %arg1: i32, %arg2: memref<2xi32, #tpu.memory_space<smem>>) -> (i32, i32) {
    %c0_i32 = arith.constant 0 : i32
    %c0_i32_0 = arith.constant 0 : i32
    %c0_i32_1 = arith.constant 0 : i32
    return %c0_i32, %c0_i32_0 : i32, i32
  }
  func.func @transform_18(%arg0: i32, %arg1: i32, %arg2: memref<2xi32, #tpu.memory_space<smem>>) -> (i32, i32, i32) {
    %c0_i32 = arith.constant 0 : i32
    %c0_i32_0 = arith.constant 0 : i32
    return %arg0, %arg1, %c0_i32 : i32, i32, i32
  }
}

</mosaic_0001>

<bundles_post_ra>
// kernel: tpu_custom_call.1
= control target key start
LH: loop header
LB: loop body
LE: loop exit
PB: predicated region body
PF: predicated region fallthrough
CT: control target
= control target key end

     0   :  { %s4825_s0 = inlined_call_operand.hbm [shape: s32[2], index: 0, kind: input, shape index: {}]   ;;  %s4826_s1 = inlined_call_operand.hbm [shape: f32[2,16,32], index: 1, kind: input, shape index: {}]   ;;  %s4827_s2 = inlined_call_operand.hbm [shape: f32[2,16,32], index: 2, kind: input, shape index: {}]   ;;  %s4828_s3 = inlined_call_operand.hbm [shape: f32[32,32], index: 3, kind: input, shape index: {}]   ;;  %s4829_s4 = inlined_call_operand.hbm [shape: f32[1,32], index: 4, kind: input, shape index: {}]   ;;  %s4830_s5 = inlined_call_operand.hbm [shape: f32[32,32], index: 5, kind: input, shape index: {}]   ;;  %s4831_s6 = inlined_call_operand.hbm [shape: f32[1,32], index: 6, kind: input, shape index: {}]   ;;  %s4832_s7 = inlined_call_operand.hbm [shape: f32[32,32], index: 7, kind: input, shape index: {}]   ;;  %s4833_s8 = inlined_call_operand.hbm [shape: f32[1,32], index: 8, kind: input, shape index: {}]   ;;  %s4834_s9 = inlined_call_operand.hbm [shape: f32[32,32], index: 9, kind: input, shape index: {}]   ;;  %s4835_s10 = inlined_call_operand.hbm [shape: f32[1,32], index: 10, kind: input, shape index: {}]   ;;  %s4836_s11 = inlined_call_operand.hbm [shape: f32[1,32], index: 11, kind: input, shape index: {}]   ;;  %s4837_s12 = inlined_call_operand.hbm [shape: f32[1,32], index: 12, kind: input, shape index: {}]   ;;  %s4838_s13 = inlined_call_operand.hbm [shape: f32[32,64], index: 13, kind: input, shape index: {}]   ;;  %s4839_s14 = inlined_call_operand.hbm [shape: f32[1,64], index: 14, kind: input, shape index: {}]   ;;  %s4840_s15 = inlined_call_operand.hbm [shape: f32[64,32], index: 15, kind: input, shape index: {}]   ;;  %s4841_s16 = inlined_call_operand.hbm [shape: f32[1,32], index: 16, kind: input, shape index: {}]   ;;  %s4842_s17 = inlined_call_operand.hbm [shape: f32[1,32], index: 17, kind: input, shape index: {}]   ;;  %s4843_s18 = inlined_call_operand.hbm [shape: f32[1,32], index: 18, kind: input, shape index: {}]   ;;  %s4844_s19 = inlined_call_operand.hbm [shape: f32[2,16,32], index: 19, kind: output, shape index: {}]  }
   0x1   :  { %4875 = sst [smem:[#allocation62_spill]] %s4825_s0 }
   0x2   :  { %4876 = sst [smem:[#allocation63_spill]] %s4826_s1  ;;  %s4894_s20 = sld [smem:[#allocation62_spill]] }
   0x3   :  { %4877 = sst [smem:[#allocation64_spill]] %s4827_s2 }
   0x4   :  { %4878 = sst [smem:[#allocation65_spill]] %s4828_s3 }
   0x5   :  { %4879 = sst [smem:[#allocation66_spill]] %s4829_s4 }
   0x6   :  { %4880 = sst [smem:[#allocation67_spill]] %s4830_s5 }
   0x7   :  { %4881 = sst [smem:[#allocation68_spill]] %s4831_s6 }
   0x8   :  { %4882 = sst [smem:[#allocation69_spill]] %s4832_s7 }
   0x9   :  { %4883 = sst [smem:[#allocation70_spill]] %s4833_s8 }
   0xa   :  { %4884 = sst [smem:[#allocation71_spill]] %s4834_s9 }
   0xb   :  { %4885 = sst [smem:[#allocation72_spill]] %s4835_s10 }
   0xc   :  { %4886 = sst [smem:[#allocation73_spill]] %s4836_s11 }
   0xd   :  { %4887 = sst [smem:[#allocation74_spill]] %s4837_s12 }
   0xe   :  { %4888 = sst [smem:[#allocation75_spill]] %s4838_s13  ;;  %s3157_s13 = scalar_lea.hbm %s4894_s20, 16 }
   0xf   :  { %4889 = sst [smem:[#allocation76_spill]] %s4839_s14  ;;  %p3158_p0 = scmp.ne.s32.totalorder %s4894_s20, %s3157_s13 }
  0x10   :  { %4890 = sst [smem:[#allocation77_spill]] %s4840_s15  ;;  %p3161_p1 = scmp.lt.u32.totalorder %s3157_s13, %s4894_s20 }
  0x11   :  { %4891 = sst [smem:[#allocation78_spill]] %s4841_s16 }
  0x12   :  { %4892 = sst [smem:[#allocation79_spill]] %s4842_s17  ;;  %p3163_p2 = pnand %p3161_p1, %p3158_p0 }
  0x13   :  { %4893 = sst [smem:[#allocation80_spill]] %s4844_s19 }
  0x14   :  { %3166 = shalt.err (!%p3163_p2)  }
  0x15   :  { %s3841_s23 = smov [#allocation5]  }
  0x16   :  { %25 = dma.hbm_to_smem %s4894_s20, 16, %s3841_s23, [#allocation4] }
  0x17   :  { %3747 = dma.done.wait [#allocation4], 16 }
  0x18   :  { %3748 = vsyncadd [#allocation4], 4294967280 }
  0x19   :  { %27 = sfence }
  0x1a   :  { %28 = vsyncpa [#allocation7], 0 }
  0x1b   :  { %30 = vsyncpa [#allocation7 + $0x1], 0 }
  0x1c   :  { %31 = vsyncpa [#allocation10], 0 }
  0x1d   :  { %33 = vsyncpa [#allocation10 + $0x1], 0 }
  0x1e   :  { %34 = vsyncpa [#allocation13], 0 }
  0x1f   :  { %35 = vsyncpa [#allocation16], 0 }
  0x20   :  { %36 = vsyncpa [#allocation19], 0 }
  0x21   :  { %37 = vsyncpa [#allocation22], 0 }
  0x22   :  { %38 = vsyncpa [#allocation25], 0 }
  0x23   :  { %39 = vsyncpa [#allocation28], 0 }
  0x24   :  { %40 = vsyncpa [#allocation31], 0 }
  0x25   :  { %41 = vsyncpa [#allocation34], 0 }
  0x26   :  { %42 = vsyncpa [#allocation8], 0 }
  0x27   :  { %44 = vsyncpa [#allocation8 + $0x1], 0  ;;  %s3987_s13 = smov 0   ;;  %s3989_s3 = smov 0  }
  0x28   :  { %s3991_s26 = smov 0   ;;  %s3993_s27 = smov 0  }
  0x29   :  { %s3995_s28 = smov 0   ;;  %s3997_s29 = smov 0  }
  0x2a   :  { %s3999_s0 = smov 0   ;;  %s4001_s30 = smov 0  }
  0x2b   :  { %s4003_s20 = smov 0   ;;  %s4005_s21 = smov 0  }
  0x2c   :  { %s4007_s1 = smov 0  }
  0x2d LB: > { %4895 = sst [smem:[#allocation49_spill]] %s3799_s13  ;;  %s4043_s22 = sadd.s32 4294967295, %s3839_s1   ;;  %s3839_s1 = sphi %s4007_s1, %s5002_s1   ;;  %s3835_s21 = sphi %s4005_s21, %s5001_s21   ;;  %s3831_s20 = sphi %s4003_s20, %s5000_s20   ;;  %s3827_s30 = sphi %s4001_s30, %s4999_s30   ;;  %s3823_s0 = sphi %s3999_s0, %s4993_s0   ;;  %s3819_s29 = sphi %s3997_s29, %s4998_s29   ;;  %s3815_s28 = sphi %s3995_s28, %s4992_s28   ;;  %s3811_s27 = sphi %s3993_s27, %s4991_s27   ;;  %s3807_s26 = sphi %s3991_s26, %s4997_s26   ;;  %s3803_s3 = sphi %s3989_s3, %s4990_s3   ;;  %s3799_s13 = sphi %s3987_s13, %s4996_s13  }
  0x2e   : > { %4896 = sst [smem:[#allocation50_spill]] %s3803_s3  ;;  %p2505_p3 = scmp.ge.s32.totalorder %s3839_s1, 1 }
  0x2f   : > { %4897 = sst [smem:[#allocation51_spill]] %s3807_s26  ;;  %p4866_p4 = scmp.eq.s32.totalorder %s4043_s22, 0 }
  0x30   : > { %4898 = sst [smem:[#allocation52_spill]] %s3811_s27  ;;  %p485_p5 = scmp.lt.s32.totalorder %s3839_s1, 5 }
  0x31   : > { %4899 = sst [smem:[#allocation53_spill]] %s3815_s28  ;;  %s3842_s23 = smov [#allocation11]  }
  0x32   : > { %4900 = sst [smem:[#allocation54_spill]] %s3819_s29  ;;  %p4048_p6 = pnand %p2505_p3, %p485_p5 }
  0x33   : > { %4901 = sst [smem:[#allocation55_spill]] %s3823_s0  ;;  %s497_s24 = sshll.u32 %s3842_s23, 4  ;;  %s4052_s24 = int_to_ptr.vmem [resolvable:$true] %s497_s24 }
  0x34   : > { %4902 = sst [smem:[#allocation56_spill]] %s3827_s30  ;;  %p2924_p7 = pneg %p4048_p6 }
  0x35   : > { %4903 = sst [smem:[#allocation57_spill]] %s3831_s20  ;;  %s3843_s19 = smov [#allocation12]  }
  0x36   : > { %4904 = sst [smem:[#allocation58_spill]] %s3835_s21  ;;  %p4058_p8 = pnand %p2924_p7, %p4866_p4 }
  0x37   : > { %4905 = sst [smem:[#allocation59_spill]] %s3839_s1  ;;  %s511_s30 = sshll.u32 %s3843_s19, 4  ;;  %s4062_s30 = int_to_ptr.vmem [resolvable:$true] %s511_s30 }
  0x38   : > { %4906 = sst [smem:[#allocation60_spill]] %s4043_s22  ;;  %s3844_s0 = smov [#allocation15]  }
  0x39   : > { %s4907_s2 = scalar_select %p4048_p6, 1, 0 }
  0x3a   : > { %s4064_s13 = sshll.u32 %s3844_s0, 4  ;;  %s4910_s23 = sld [smem:[#allocation65_spill]]  ;;  %s536_s13 = int_to_ptr.vmem [resolvable:$true] %s4064_s13 }
  0x3b   : > { %4908 = sst [smem:[#allocation61_spill]] %s4907_s2  ;;  %p4074_p10 = pneg %p4058_p8 }
  0x40   : > { %s3167_s27 = scalar_lea.hbm %s4910_s23, 512 }
  0x41   : > { %p3168_p9 = scmp.ne.s32.totalorder %s4910_s23, %s3167_s27  ;;  %p3174_p13 = scmp.lt.u32.totalorder %s3167_s27, %s4910_s23 }
  0x43   : > { %p3170_p11 = pnand %p4074_p10, %p3168_p9 }
  0x45   : > { %p3171_p12 = pneg %p3170_p11 }
  0x47   : > { %p3176_p0 = pnand %p3174_p13, %p3171_p12 }
  0x49   : > { %3179 = shalt.err (!%p3176_p0)
}
  0x4a   : > { %s3180_s3 = scalar_lea.vmem %s4052_s24, 512  ;;  %p3188_p5 = scmp.lt.s32.totalorder %s4052_s24, %s4052_s24 }
  0x4b   : > { %p3181_p1 = scmp.ne.s32.totalorder %s4052_s24, %s3180_s3  ;;  %p3189_p7 = scmp.lt.s32.totalorder %s3180_s3, %s3180_s3 }
  0x4d   : > { %p3183_p2 = pnand %p3181_p1, %p4074_p10  ;;  %p3190_p9 = por %p3189_p7, %p3188_p5 }
  0x4f   : > { %p3184_p3 = pneg %p3183_p2 }
  0x51   : > { %p3191_p11 = pnand %p3190_p9, %p3184_p3 }
  0x53   : > { %3194 = shalt.err (!%p3191_p11)
}
  0x54   : > { %s4868_s26 = smov 128   ;;  %s4870_s27 = smov 8  }
  0x55   : > { %2927 = dma.hbm_to_vmem [thread:$0]  (!%p4058_p8), %s4910_s23, 512, %s4052_s24, [#allocation10], %s4868_s26, %s4868_s26, %s4870_s27  }
  0x56   : > { %s4912_s4 = sld [smem:[#allocation66_spill]] }
  0x5c   : > { %s3195_s3 = scalar_lea.hbm %s4912_s4, 16 }
  0x5d   : > { %p3196_p12 = scmp.ne.s32.totalorder %s4912_s4, %s3195_s3  ;;  %p3202_p1 = scmp.lt.u32.totalorder %s3195_s3, %s4912_s4 }
  0x5f   : > { %p3198_p13 = pnand %p3196_p12, %p4074_p10 }
  0x61   : > { %p3199_p0 = pneg %p3198_p13 }
  0x63   : > { %p3204_p2 = pnand %p3202_p1, %p3199_p0 }
  0x65   : > { %3207 = shalt.err (!%p3204_p2)
}
  0x66   : > { %s3208_s24 = scalar_lea.vmem %s4062_s30, 16  ;;  %s3215_s29 = scalar_lea.vmem %s4062_s30, 32 }
  0x67   : > { %p3209_p3 = scmp.ne.s32.totalorder %s4062_s30, %s3208_s24  ;;  %p3216_p9 = scmp.lt.s32.totalorder %s4062_s30, %s4062_s30 }
  0x68   : > { %p3217_p11 = scmp.lt.s32.totalorder %s3215_s29, %s3208_s24 }
  0x69   : > { %p3211_p5 = pnand %p3209_p3, %p4074_p10 }
  0x6a   : > { %p3218_p12 = por %p3217_p11, %p3216_p9 }
  0x6b   : > { %p3212_p7 = pneg %p3211_p5 }
  0x6d   : > { %p3219_p13 = pnand %p3218_p12, %p3212_p7 }
  0x6f   : > { %3222 = shalt.err (!%p3219_p13)
}
  0x70   : > { %2930 = dma.hbm_to_vmem [thread:$0]  (!%p4058_p8), %s4912_s4, 16, %s4062_s30, [#allocation13]  }
  0x71   : > { %s4913_s6 = sld [smem:[#allocation68_spill]] }
  0x77   : > { %s3223_s2 = scalar_lea.hbm %s4913_s6, 16 }
  0x78   : > { %p3224_p0 = scmp.ne.s32.totalorder %s4913_s6, %s3223_s2  ;;  %p3230_p3 = scmp.lt.u32.totalorder %s3223_s2, %s4913_s6 }
  0x7a   : > { %p3226_p1 = pnand %p3224_p0, %p4074_p10 }
  0x7c   : > { %p3227_p2 = pneg %p3226_p1 }
  0x7e   : > { %p3232_p5 = pnand %p3230_p3, %p3227_p2 }
  0x80   : > { %3235 = shalt.err (!%p3232_p5)
}
  0x81   : > { %s3236_s29 = scalar_lea.vmem %s536_s13, 16  ;;  %s3243_s30 = scalar_lea.vmem %s536_s13, 32 }
  0x82   : > { %p3237_p7 = scmp.ne.s32.totalorder %s536_s13, %s3236_s29  ;;  %p3244_p12 = scmp.lt.s32.totalorder %s536_s13, %s536_s13 }
  0x83   : > { %p3245_p13 = scmp.lt.s32.totalorder %s3243_s30, %s3236_s29 }
  0x84   : > { %p3239_p9 = pnand %p3237_p7, %p4074_p10 }
  0x85   : > { %p3246_p4 = por %p3245_p13, %p3244_p12 }
  0x86   : > { %p3240_p11 = pneg %p3239_p9 }
  0x88   : > { %p3247_p6 = pnand %p3246_p4, %p3240_p11 }
  0x8a   : > { %3250 = shalt.err (!%p3247_p6)
}
  0x8b   : > { %2936 = dma.hbm_to_vmem [thread:$0]  (!%p4058_p8), %s4913_s6, 16, %s536_s13, [#allocation16]  }
  0x8c   : > { %s3847_s1 = smov [#allocation18]   ;;  %s3848_s2 = smov [#allocation21]  }
  0x8d   : > { %s559_s28 = sshll.u32 %s3847_s1, 4  ;;  %s583_s19 = sshll.u32 %s3848_s2, 4  ;;  %s560_s28 = int_to_ptr.vmem [resolvable:$true] %s559_s28  ;;  %s584_s19 = int_to_ptr.vmem [resolvable:$true] %s583_s19 }
  0x8e   : > { %s4914_s8 = sld [smem:[#allocation70_spill]] }
  0x94   : > { %s3251_s24 = scalar_lea.hbm %s4914_s8, 16 }
  0x95   : > { %p3252_p4 = scmp.ne.s32.totalorder %s4914_s8, %s3251_s24  ;;  %p3258_p1 = scmp.lt.u32.totalorder %s3251_s24, %s4914_s8 }
  0x97   : > { %p3254_p6 = pnand %p3252_p4, %p4074_p10 }
  0x99   : > { %p3255_p0 = pneg %p3254_p6 }
  0x9b   : > { %p3260_p2 = pnand %p3258_p1, %p3255_p0 }
  0x9d   : > { %3263 = shalt.err (!%p3260_p2)
}
  0x9e   : > { %s3264_s13 = scalar_lea.vmem %s560_s28, 16  ;;  %s3271_s21 = scalar_lea.vmem %s560_s28, 32 }
  0x9f   : > { %p3265_p3 = scmp.ne.s32.totalorder %s560_s28, %s3264_s13  ;;  %p3272_p9 = scmp.lt.s32.totalorder %s560_s28, %s560_s28 }
  0xa0   : > { %p3273_p11 = scmp.lt.s32.totalorder %s3271_s21, %s3264_s13 }
  0xa1   : > { %p3267_p5 = pnand %p3265_p3, %p4074_p10 }
  0xa2   : > { %p3274_p12 = por %p3273_p11, %p3272_p9 }
  0xa3   : > { %p3268_p7 = pneg %p3267_p5 }
  0xa5   : > { %p3275_p13 = pnand %p3274_p12, %p3268_p7 }
  0xa7   : > { %3278 = shalt.err (!%p3275_p13)
}
  0xa8   : > { %2942 = dma.hbm_to_vmem [thread:$0]  (!%p4058_p8), %s4914_s8, 16, %s560_s28, [#allocation19]  }
  0xa9   : > { %s4915_s10 = sld [smem:[#allocation72_spill]] }
  0xaf   : > { %s3279_s3 = scalar_lea.hbm %s4915_s10, 16 }
  0xb0   : > { %p3280_p4 = scmp.ne.s32.totalorder %s4915_s10, %s3279_s3  ;;  %p3286_p1 = scmp.lt.u32.totalorder %s3279_s3, %s4915_s10 }
  0xb2   : > { %p3282_p6 = pnand %p3280_p4, %p4074_p10 }
  0xb4   : > { %p3283_p0 = pneg %p3282_p6 }
  0xb6   : > { %p3288_p2 = pnand %p3286_p1, %p3283_p0 }
  0xb8   : > { %3291 = shalt.err (!%p3288_p2)
}
  0xb9   : > { %s3292_s13 = scalar_lea.vmem %s584_s19, 16  ;;  %s3299_s28 = scalar_lea.vmem %s584_s19, 32 }
  0xba   : > { %p3293_p3 = scmp.ne.s32.totalorder %s584_s19, %s3292_s13  ;;  %p3300_p9 = scmp.lt.s32.totalorder %s584_s19, %s584_s19 }
  0xbb   : > { %p3301_p11 = scmp.lt.s32.totalorder %s3299_s28, %s3292_s13 }
  0xbc   : > { %p3295_p5 = pnand %p3293_p3, %p4074_p10 }
  0xbd   : > { %p3302_p12 = por %p3301_p11, %p3300_p9 }
  0xbe   : > { %p3296_p7 = pneg %p3295_p5 }
  0xc0   : > { %p3303_p13 = pnand %p3302_p12, %p3296_p7 }
  0xc2   : > { %3306 = shalt.err (!%p3303_p13)
}
  0xc3   : > { %2948 = dma.hbm_to_vmem [thread:$0]  (!%p4058_p8), %s4915_s10, 16, %s584_s19, [#allocation22]  }
  0xc4   : > { %s3849_s2 = smov [#allocation24]   ;;  %s3850_s0 = smov [#allocation27]  }
  0xc5   : > { %s605_s26 = sshll.u32 %s3849_s2, 4  ;;  %s629_s3 = sshll.u32 %s3850_s0, 4  ;;  %s606_s26 = int_to_ptr.vmem [resolvable:$true] %s605_s26  ;;  %s630_s3 = int_to_ptr.vmem [resolvable:$true] %s629_s3 }
  0xc6   : > { %s4916_s12 = sld [smem:[#allocation74_spill]] }
  0xcc   : > { %s3307_s30 = scalar_lea.hbm %s4916_s12, 16 }
  0xcd   : > { %p3308_p4 = scmp.ne.s32.totalorder %s4916_s12, %s3307_s30  ;;  %p3314_p1 = scmp.lt.u32.totalorder %s3307_s30, %s4916_s12 }
  0xcf   : > { %p3310_p6 = pnand %p3308_p4, %p4074_p10 }
  0xd1   : > { %p3311_p0 = pneg %p3310_p6 }
  0xd3   : > { %p3316_p2 = pnand %p3314_p1, %p3311_p0 }
  0xd5   : > { %3319 = shalt.err (!%p3316_p2)
}
  0xd6   : > { %s3320_s19 = scalar_lea.vmem %s606_s26, 16  ;;  %s3327_s1 = scalar_lea.vmem %s606_s26, 32 }
  0xd7   : > { %p3321_p3 = scmp.ne.s32.totalorder %s606_s26, %s3320_s19  ;;  %p3328_p9 = scmp.lt.s32.totalorder %s606_s26, %s606_s26 }
  0xd8   : > { %p3329_p11 = scmp.lt.s32.totalorder %s3327_s1, %s3320_s19 }
  0xd9   : > { %p3323_p5 = pnand %p3321_p3, %p4074_p10 }
  0xda   : > { %p3330_p12 = por %p3329_p11, %p3328_p9 }
  0xdb   : > { %p3324_p7 = pneg %p3323_p5 }
  0xdd   : > { %p3331_p13 = pnand %p3330_p12, %p3324_p7 }
  0xdf   : > { %3334 = shalt.err (!%p3331_p13)
}
  0xe0   : > { %2954 = dma.hbm_to_vmem [thread:$0]  (!%p4058_p8), %s4916_s12, 16, %s606_s26, [#allocation25]  }
  0xe1   : > { %s4917_s14 = sld [smem:[#allocation76_spill]] }
  0xe7   : > { %s3335_s30 = scalar_lea.hbm %s4917_s14, 16 }
  0xe8   : > { %p3336_p4 = scmp.ne.s32.totalorder %s4917_s14, %s3335_s30  ;;  %p3342_p1 = scmp.lt.u32.totalorder %s3335_s30, %s4917_s14 }
  0xea   : > { %p3338_p6 = pnand %p3336_p4, %p4074_p10 }
  0xec   : > { %p3339_p0 = pneg %p3338_p6 }
  0xee   : > { %p3344_p2 = pnand %p3342_p1, %p3339_p0 }
  0xf0   : > { %3347 = shalt.err (!%p3344_p2)
}
  0xf1   : > { %s3348_s19 = scalar_lea.vmem %s630_s3, 16  ;;  %s3355_s26 = scalar_lea.vmem %s630_s3, 32 }
  0xf2   : > { %p3349_p3 = scmp.ne.s32.totalorder %s630_s3, %s3348_s19  ;;  %p3356_p9 = scmp.lt.s32.totalorder %s630_s3, %s630_s3 }
  0xf3   : > { %p3357_p11 = scmp.lt.s32.totalorder %s3355_s26, %s3348_s19 }
  0xf4   : > { %p3351_p5 = pnand %p3349_p3, %p4074_p10 }
  0xf5   : > { %p3358_p12 = por %p3357_p11, %p3356_p9 }
  0xf6   : > { %p3352_p7 = pneg %p3351_p5 }
  0xf8   : > { %p3359_p13 = pnand %p3358_p12, %p3352_p7 }
  0xfa   : > { %3362 = shalt.err (!%p3359_p13)
}
  0xfb   : > { %2960 = dma.hbm_to_vmem [thread:$0]  (!%p4058_p8), %s4917_s14, 16, %s630_s3, [#allocation28]  }
  0xfc   : > { %s3851_s0 = smov [#allocation30]   ;;  %s3852_s29 = smov [#allocation14]  }
  0xfd   : > { %s653_s24 = sshll.u32 %s3851_s0, 4  ;;  %s521_s30 = sshll.u32 %s3852_s29, 4  ;;  %s654_s24 = int_to_ptr.vmem [resolvable:$true] %s653_s24  ;;  %s522_s30 = int_to_ptr.vmem [resolvable:$true] %s521_s30 }
  0xfe   : > { %s4918_s16 = sld [smem:[#allocation78_spill]] }
 0x104   : > { %s3363_s28 = scalar_lea.hbm %s4918_s16, 16 }
 0x105   : > { %p3364_p4 = scmp.ne.s32.totalorder %s4918_s16, %s3363_s28  ;;  %p3370_p1 = scmp.lt.u32.totalorder %s3363_s28, %s4918_s16 }
 0x107   : > { %p3366_p6 = pnand %p3364_p4, %p4074_p10 }
 0x109   : > { %p3367_p0 = pneg %p3366_p6 }
 0x10b   : > { %p3372_p2 = pnand %p3370_p1, %p3367_p0 }
 0x10d   : > { %3375 = shalt.err (!%p3372_p2)
}
 0x10e   : > { %s3376_s3 = scalar_lea.vmem %s654_s24, 16  ;;  %s3383_s2 = scalar_lea.vmem %s654_s24, 32 }
 0x10f   : > { %p3377_p3 = scmp.ne.s32.totalorder %s654_s24, %s3376_s3  ;;  %p3384_p9 = scmp.lt.s32.totalorder %s654_s24, %s654_s24 }
 0x110   : > { %p3385_p11 = scmp.lt.s32.totalorder %s3383_s2, %s3376_s3 }
 0x111   : > { %p3379_p5 = pnand %p3377_p3, %p4074_p10 }
 0x112   : > { %p3386_p12 = por %p3385_p11, %p3384_p9 }
 0x113   : > { %p3380_p7 = pneg %p3379_p5 }
 0x115   : > { %p3387_p13 = pnand %p3386_p12, %p3380_p7 }
 0x117   : > { %3390 = shalt.err (!%p3387_p13)
}
 0x118   : > { %2966 = dma.hbm_to_vmem [thread:$0]  (!%p4058_p8), %s4918_s16, 16, %s654_s24, [#allocation31]  }
 0x119   : > { %s4919_s5 = sld [smem:[#allocation67_spill]] }
 0x11f   : > { %s3391_s28 = scalar_lea.hbm %s4919_s5, 512 }
 0x120   : > { %p3392_p4 = scmp.ne.s32.totalorder %s4919_s5, %s3391_s28  ;;  %p3398_p1 = scmp.lt.u32.totalorder %s3391_s28, %s4919_s5 }
 0x122   : > { %p3394_p6 = pnand %p3392_p4, %p4074_p10 }
 0x124   : > { %p3395_p0 = pneg %p3394_p6 }
 0x126   : > { %p3400_p2 = pnand %p3398_p1, %p3395_p0 }
 0x128   : > { %3403 = shalt.err (!%p3400_p2)
}
 0x129   : > { %s3404_s3 = scalar_lea.vmem %s522_s30, 512  ;;  %p3412_p9 = scmp.lt.s32.totalorder %s522_s30, %s522_s30 }
 0x12a   : > { %p3405_p3 = scmp.ne.s32.totalorder %s522_s30, %s3404_s3  ;;  %p3413_p11 = scmp.lt.s32.totalorder %s3404_s3, %s3404_s3 }
 0x12c   : > { %p3407_p5 = pnand %p3405_p3, %p4074_p10  ;;  %p3414_p12 = por %p3413_p11, %p3412_p9 }
 0x12e   : > { %p3408_p7 = pneg %p3407_p5 }
 0x130   : > { %p3415_p13 = pnand %p3414_p12, %p3408_p7 }
 0x132   : > { %3418 = shalt.err (!%p3415_p13)
}
 0x133   : > { %s4920_s24 = smov 128   ;;  %s3853_s29 = smov [#allocation17]  }
 0x134   : > { %2933 = dma.hbm_to_vmem [thread:$0]  (!%p4058_p8), %s4919_s5, 512, %s522_s30, [#allocation13], %s4920_s24, %s4920_s24, %s4870_s27  }
 0x135   : > { %s545_s20 = sshll.u32 %s3853_s29, 4  ;;  %s3854_s13 = smov [#allocation20]   ;;  %s546_s20 = int_to_ptr.vmem [resolvable:$true] %s545_s20 }
 0x136   : > { %s569_s28 = sshll.u32 %s3854_s13, 4  ;;  %s4921_s7 = sld [smem:[#allocation69_spill]]  ;;  %s570_s28 = int_to_ptr.vmem [resolvable:$true] %s569_s28 }
 0x13c   : > { %s3419_s26 = scalar_lea.hbm %s4921_s7, 512 }
 0x13d   : > { %p3420_p4 = scmp.ne.s32.totalorder %s4921_s7, %s3419_s26  ;;  %p3426_p1 = scmp.lt.u32.totalorder %s3419_s26, %s4921_s7 }
 0x13f   : > { %p3422_p6 = pnand %p3420_p4, %p4074_p10 }
 0x141   : > { %p3423_p0 = pneg %p3422_p6 }
 0x143   : > { %p3428_p2 = pnand %p3426_p1, %p3423_p0 }
 0x145   : > { %3431 = shalt.err (!%p3428_p2)
}
 0x146   : > { %s3432_s30 = scalar_lea.vmem %s546_s20, 512  ;;  %p3440_p9 = scmp.lt.s32.totalorder %s546_s20, %s546_s20 }
 0x147   : > { %p3433_p3 = scmp.ne.s32.totalorder %s546_s20, %s3432_s30  ;;  %p3441_p11 = scmp.lt.s32.totalorder %s3432_s30, %s3432_s30 }
 0x149   : > { %p3435_p5 = pnand %p3433_p3, %p4074_p10  ;;  %p3442_p12 = por %p3441_p11, %p3440_p9 }
 0x14b   : > { %p3436_p7 = pneg %p3435_p5 }
 0x14d   : > { %p3443_p13 = pnand %p3442_p12, %p3436_p7 }
 0x14f   : > { %3446 = shalt.err (!%p3443_p13)
}
 0x150   : > { %2939 = dma.hbm_to_vmem [thread:$0]  (!%p4058_p8), %s4921_s7, 512, %s546_s20, [#allocation16], %s4920_s24, %s4920_s24, %s4870_s27  }
 0x151   : > { %s4922_s9 = sld [smem:[#allocation71_spill]] }
 0x157   : > { %s3447_s21 = scalar_lea.hbm %s4922_s9, 512 }
 0x158   : > { %p3448_p4 = scmp.ne.s32.totalorder %s4922_s9, %s3447_s21  ;;  %p3454_p1 = scmp.lt.u32.totalorder %s3447_s21, %s4922_s9 }
 0x15a   : > { %p3450_p6 = pnand %p3448_p4, %p4074_p10 }
 0x15c   : > { %p3451_p0 = pneg %p3450_p6 }
 0x15e   : > { %p3456_p2 = pnand %p3454_p1, %p3451_p0 }
 0x160   : > { %3459 = shalt.err (!%p3456_p2)
}
 0x161   : > { %s3460_s2 = scalar_lea.vmem %s570_s28, 512  ;;  %p3468_p9 = scmp.lt.s32.totalorder %s570_s28, %s570_s28 }
 0x162   : > { %p3461_p3 = scmp.ne.s32.totalorder %s570_s28, %s3460_s2  ;;  %p3469_p11 = scmp.lt.s32.totalorder %s3460_s2, %s3460_s2 }
 0x164   : > { %p3463_p5 = pnand %p3461_p3, %p4074_p10  ;;  %p3470_p12 = por %p3469_p11, %p3468_p9 }
 0x166   : > { %p3464_p7 = pneg %p3463_p5 }
 0x168   : > { %p3471_p13 = pnand %p3470_p12, %p3464_p7 }
 0x16a   : > { %3474 = shalt.err (!%p3471_p13)
}
 0x16b   : > { %2945 = dma.hbm_to_vmem [thread:$0]  (!%p4058_p8), %s4922_s9, 512, %s570_s28, [#allocation19], %s4920_s24, %s4920_s24, %s4870_s27  }
 0x16c   : > { %s3855_s4 = smov [#allocation23]   ;;  %s3856_s29 = smov [#allocation26]  }
 0x16d   : > { %s594_s0 = sshll.u32 %s3855_s4, 4  ;;  %s615_s13 = sshll.u32 %s3856_s29, 4  ;;  %s595_s0 = int_to_ptr.vmem [resolvable:$true] %s594_s0  ;;  %s616_s13 = int_to_ptr.vmem [resolvable:$true] %s615_s13 }
 0x16e   : > { %s4923_s11 = sld [smem:[#allocation73_spill]] }
 0x174   : > { %s3475_s26 = scalar_lea.hbm %s4923_s11, 16 }
 0x175   : > { %p3476_p4 = scmp.ne.s32.totalorder %s4923_s11, %s3475_s26  ;;  %p3482_p1 = scmp.lt.u32.totalorder %s3475_s26, %s4923_s11 }
 0x177   : > { %p3478_p6 = pnand %p3476_p4, %p4074_p10 }
 0x179   : > { %p3479_p0 = pneg %p3478_p6 }
 0x17b   : > { %p3484_p2 = pnand %p3482_p1, %p3479_p0 }
 0x17d   : > { %3487 = shalt.err (!%p3484_p2)
}
 0x17e   : > { %s3488_s28 = scalar_lea.vmem %s595_s0, 16  ;;  %s3495_s30 = scalar_lea.vmem %s595_s0, 32 }
 0x17f   : > { %p3489_p3 = scmp.ne.s32.totalorder %s595_s0, %s3488_s28  ;;  %p3496_p9 = scmp.lt.s32.totalorder %s595_s0, %s595_s0 }
 0x180   : > { %p3497_p11 = scmp.lt.s32.totalorder %s3495_s30, %s3488_s28 }
 0x181   : > { %p3491_p5 = pnand %p3489_p3, %p4074_p10 }
 0x182   : > { %p3498_p12 = por %p3497_p11, %p3496_p9 }
 0x183   : > { %p3492_p7 = pneg %p3491_p5 }
 0x185   : > { %p3499_p13 = pnand %p3498_p12, %p3492_p7 }
 0x187   : > { %3502 = shalt.err (!%p3499_p13)
}
 0x188   : > { %2951 = dma.hbm_to_vmem [thread:$0]  (!%p4058_p8), %s4923_s11, 16, %s595_s0, [#allocation22]  }
 0x189   : > { %s4924_s26 = sld [smem:[#allocation75_spill]] }
 0x18f   : > { %s4925_s2 = smov %s4924_s26  ;;  %s3503_s1 = scalar_lea.hbm %s4924_s26, 512 }
 0x190   : > { %p3504_p4 = scmp.ne.s32.totalorder %s4925_s2, %s3503_s1  ;;  %p3510_p1 = scmp.lt.u32.totalorder %s3503_s1, %s4925_s2 }
 0x192   : > { %p3506_p6 = pnand %p3504_p4, %p4074_p10 }
 0x194   : > { %p3507_p0 = pneg %p3506_p6 }
 0x196   : > { %p3512_p2 = pnand %p3510_p1, %p3507_p0 }
 0x198   : > { %3515 = shalt.err (!%p3512_p2)
}
 0x199   : > { %s3516_s4 = scalar_lea.vmem %s616_s13, 512  ;;  %p3524_p9 = scmp.lt.s32.totalorder %s616_s13, %s616_s13 }
 0x19a   : > { %p3517_p3 = scmp.ne.s32.totalorder %s616_s13, %s3516_s4  ;;  %p3525_p11 = scmp.lt.s32.totalorder %s3516_s4, %s3516_s4 }
 0x19c   : > { %p3519_p5 = pnand %p3517_p3, %p4074_p10  ;;  %p3526_p12 = por %p3525_p11, %p3524_p9 }
 0x19e   : > { %p3520_p7 = pneg %p3519_p5 }
 0x1a0   : > { %p3527_p13 = pnand %p3526_p12, %p3520_p7 }
 0x1a2   : > { %3530 = shalt.err (!%p3527_p13)
}
 0x1a3   : > { %2957 = dma.hbm_to_vmem [thread:$0]  (!%p4058_p8), %s4925_s2, 512, %s616_s13, [#allocation25], %s4920_s24, %s4920_s24, %s4870_s27  }
 0x1a4   : > { %s3857_s21 = smov [#allocation29]   ;;  %s3858_s26 = smov [#allocation32]  }
 0x1a5   : > { %s639_s19 = sshll.u32 %s3857_s21, 4  ;;  %s664_s1 = sshll.u32 %s3858_s26, 4  ;;  %s640_s19 = int_to_ptr.vmem [resolvable:$true] %s639_s19  ;;  %s665_s1 = int_to_ptr.vmem [resolvable:$true] %s664_s1 }
 0x1a6   : > { %s4926_s15 = sld [smem:[#allocation77_spill]] }
 0x1ac   : > { %s3531_s28 = scalar_lea.hbm %s4926_s15, 1024 }
 0x1ad   : > { %p3532_p4 = scmp.ne.s32.totalorder %s4926_s15, %s3531_s28  ;;  %p3538_p1 = scmp.lt.u32.totalorder %s3531_s28, %s4926_s15 }
 0x1af   : > { %p3534_p6 = pnand %p3532_p4, %p4074_p10 }
 0x1b1   : > { %p3535_p0 = pneg %p3534_p6 }
 0x1b3   : > { %p3540_p2 = pnand %p3538_p1, %p3535_p0 }
 0x1b5   : > { %3543 = shalt.err (!%p3540_p2)
}
 0x1b6   : > { %s3544_s13 = scalar_lea.vmem %s640_s19, 1024  ;;  %p3552_p9 = scmp.lt.s32.totalorder %s640_s19, %s640_s19 }
 0x1b7   : > { %p3545_p3 = scmp.ne.s32.totalorder %s640_s19, %s3544_s13  ;;  %p3553_p11 = scmp.lt.s32.totalorder %s3544_s13, %s3544_s13 }
 0x1b9   : > { %p3547_p5 = pnand %p3545_p3, %p4074_p10  ;;  %p3554_p12 = por %p3553_p11, %p3552_p9 }
 0x1bb   : > { %p3548_p7 = pneg %p3547_p5 }
 0x1bd   : > { %p3555_p13 = pnand %p3554_p12, %p3548_p7 }
 0x1bf   : > { %3558 = shalt.err (!%p3555_p13)
}
 0x1c0   : > { %2963 = dma.hbm_to_vmem [thread:$0]  (!%p4058_p8), %s4926_s15, 1024, %s640_s19, [#allocation28], %s4920_s24, %s4920_s24, %s4870_s27  }
 0x1c1   : > { %s4927_s17 = sld [smem:[#allocation79_spill]] }
 0x1c7   : > { %s3559_s3 = scalar_lea.hbm %s4927_s17, 16 }
 0x1c8   : > { %p3560_p4 = scmp.ne.s32.totalorder %s4927_s17, %s3559_s3  ;;  %p3566_p1 = scmp.lt.u32.totalorder %s3559_s3, %s4927_s17 }
 0x1ca   : > { %p3562_p6 = pnand %p3560_p4, %p4074_p10 }
 0x1cc   : > { %p3563_p0 = pneg %p3562_p6 }
 0x1ce   : > { %p3568_p2 = pnand %p3566_p1, %p3563_p0 }
 0x1d0   : > { %3571 = shalt.err (!%p3568_p2)
}
 0x1d1   : > { %s3572_s0 = scalar_lea.vmem %s665_s1, 16  ;;  %s3579_s19 = scalar_lea.vmem %s665_s1, 32 }
 0x1d2   : > { %p3573_p3 = scmp.ne.s32.totalorder %s665_s1, %s3572_s0  ;;  %p3580_p9 = scmp.lt.s32.totalorder %s665_s1, %s665_s1 }
 0x1d3   : > { %p3581_p11 = scmp.lt.s32.totalorder %s3579_s19, %s3572_s0 }
 0x1d4   : > { %p3575_p5 = pnand %p3573_p3, %p4074_p10 }
 0x1d5   : > { %p3582_p12 = por %p3581_p11, %p3580_p9 }
 0x1d6   : > { %p3576_p7 = pneg %p3575_p5 }
 0x1d8   : > { %p3583_p13 = pnand %p3582_p12, %p3576_p7 }
 0x1da   : > { %3586 = shalt.err (!%p3583_p13)
}
 0x1db   : > { %2969 = dma.hbm_to_vmem [thread:$0]  (!%p4058_p8), %s4927_s17, 16, %s665_s1, [#allocation31]  }
 0x1dc   : > { %s3859_s29 = smov [#allocation33]   ;;  %s3587_s20 = scalar_lea.hbm %s4843_s18, 16 }
 0x1dd   : > { %s675_s21 = sshll.u32 %s3859_s29, 4  ;;  %p3588_p4 = scmp.ne.s32.totalorder %s4843_s18, %s3587_s20  ;;  %s676_s21 = int_to_ptr.vmem [resolvable:$true] %s675_s21 }
 0x1de   : > { %p3594_p1 = scmp.lt.u32.totalorder %s3587_s20, %s4843_s18 }
 0x1df   : > { %p3590_p6 = pnand %p3588_p4, %p4074_p10 }
 0x1e1   : > { %p3591_p0 = pneg %p3590_p6 }
 0x1e3   : > { %p3596_p2 = pnand %p3594_p1, %p3591_p0 }
 0x1e5   : > { %3599 = shalt.err (!%p3596_p2)
}
 0x1e6   : > { %s3600_s1 = scalar_lea.vmem %s676_s21, 16  ;;  %s3607_s19 = scalar_lea.vmem %s676_s21, 32 }
 0x1e7   : > { %p3601_p3 = scmp.ne.s32.totalorder %s676_s21, %s3600_s1  ;;  %p3608_p9 = scmp.lt.s32.totalorder %s676_s21, %s676_s21 }
 0x1e8   : > { %p3609_p11 = scmp.lt.s32.totalorder %s3607_s19, %s3600_s1 }
 0x1e9   : > { %p3603_p5 = pnand %p3601_p3, %p4074_p10 }
 0x1ea   : > { %p3610_p12 = por %p3609_p11, %p3608_p9 }
 0x1eb   : > { %p3604_p7 = pneg %p3603_p5 }
 0x1ed   : > { %p3611_p13 = pnand %p3610_p12, %p3604_p7 }
 0x1ef   : > { %3614 = shalt.err (!%p3611_p13)
}
 0x1f0   : > { %s4928_s29 = sld [smem:[#allocation59_spill]]  ;;  %s4929_s26 = sld [smem:[#allocation57_spill]] }
 0x1f1   : > { %s4930_s3 = sld [smem:[#allocation58_spill]]  ;;  %s4931_s20 = sld [smem:[#allocation54_spill]] }
 0x1f2   : > { %s4932_s28 = sld [smem:[#allocation53_spill]]  ;;  %s4933_s22 = sld [smem:[#allocation52_spill]] }
 0x1f3   : > { %s4934_s30 = sld [smem:[#allocation51_spill]]  ;;  %s4935_s25 = sld [smem:[#allocation60_spill]] }
 0x1f4   : > { %2972 = dma.hbm_to_vmem [thread:$0]  (!%p4058_p8), %s4843_s18, 16, %s676_s21, [#allocation34]  }
 0x1f5   : > { %s4936_s0 = sld [smem:[#allocation50_spill]]  ;;  %s4937_s19 = sld [smem:[#allocation49_spill]] }
 0x1f6   : > { %s2504_s4 = sadd.s32 4294967294, %s4928_s29   ;;  %s59_s1 = sadd.s32 1, %s4929_s26 }
 0x1f7   : > { %p60_p10 = scmp.ge.s32.totalorder %s59_s1, 2  ;;  %s62_s13 = sadd.s32 1, %s4930_s3 }
 0x1f8   : > { %s71_s5 = sadd.s32 1, %s4931_s20  ;;  %p78_p4 = scmp.ne.s32.totalorder %s4931_s20, %s4932_s28 }
 0x1f9   : > { %s5004_s1 = smov (%p60_p10, %s59_s1), 0  ;;  %s5006_s13 = smov (!%p60_p10, %s62_s13), %s4930_s3 }
 0x1fa   : > { %s67_s21 = ssub.s32 %s4929_s26, %s5004_s1  ;;  %p79_p8 = scmp.eq.s32.totalorder %s4928_s29, 0 }
 0x1fb   : > { %p64_p6 = scmp.ge.s32.totalorder %s5006_s13, 2  ;;  %p84_p0 = scmp.ne.s32.totalorder %s4932_s28, %s4933_s22 }
 0x1fc   : > { %p4409_p1 = por %p79_p8, %p78_p4  ;;  %s97_s2 = sadd.s32 1, %s4934_s30 }
 0x1fd   : > { %s5008_s13 = smov (%p64_p6, %s5006_s13), 0  ;;  %p4939_p2 = scmp.eq.s32.totalorder %s4935_s25, 0 }
 0x1fe   : > { %p104_p5 = scmp.ne.s32.totalorder %s4934_s30, %s4936_s0  ;;  %s66_s7 = ssub.s32 %s4930_s3, %s5008_s13 }
 0x1ff   : > { %p4421_p3 = por %p4939_p2, %p84_p0  ;;  %p110_p7 = scmp.ne.s32.totalorder %s4936_s0, %s4937_s19 }
 0x200   : > { %s68_s8 = sor.u32 %s67_s21, %s66_s7  ;;  %p95_p9 = scmp.eq.s32.totalorder %s66_s7, 0 }
 0x201   : > { %s4940_s6 = scalar_select %p4421_p3, 1, 0 }
 0x202   : > { %p69_p11 = scmp.eq.s32.totalorder %s68_s8, 0  ;;  %p4433_p12 = por %p104_p5, %p79_p8 }
 0x203   : > { %s4438_s10 = scalar_select %p95_p9, %s4934_s30, %s97_s2  }
 0x204   : > { %s4441_s11 = scalar_select %p69_p11, %s4931_s20, %s71_s5  }
 0x205   : > { %p4942_p13 = pmov %p4939_p2  ;;  %p472_p6 = scmp.eq.s32.totalorder %s4935_s25, 3 }
 0x206   : > { %p478_p2 = scmp.eq.s32.totalorder %s2504_s4, 3  ;;  %p3000_p8 = scmp.lt.s32.totalorder %s4928_s29, 4 }
 0x207   : > { %p4445_p10 = por %p110_p7, %p4942_p13  ;;  %p4454_p5 = por %p472_p6, %p78_p4 }
 0x208   : > { %s686_s8 = sand.u32 1, %s4931_s20   ;;  %p4462_p9 = por %p478_p2, %p84_p0 }
 0x209   : > { %s4943_s12 = scalar_select %p4445_p10, 1, 0 }
 0x20a   : > { %s4944_s7 = scalar_select %p4454_p5, 1, 0 }
 0x20b   : > { %s4945_s2 = scalar_select %p4462_p9, 1, 0 }
 0x20c   : > { %s2523_s0 = sshll.u32 %s686_s8, 3  ;;  %s2524_s19 = sshll.u32 %s4930_s3, 1 }
 0x20d   : > { %s695_s5 = sadd.s32 %s4929_s26, %s2524_s19  ;;  %s690_s25 = scalar_lea.vmem [#allocation6], %s2523_s0 }
 0x20e   : > { %s2525_s21 = sshll.u32 %s695_s5, 7  ;;  %s699_s14 = sshll.u32 %s690_s25, 4  ;;  %s4473_s14 = int_to_ptr.vmem [resolvable:$true] %s699_s14 }
 0x20f   : > { %s4946_s16 = sld [smem:[#allocation63_spill]]  ;;  %p4479_p4 = pnand %p3000_p8, %p4409_p1 }
 0x210   : > { %p4487_p0 = pnand %p3000_p8, %p4433_p12  ;;  %s706_s26 = sand.u32 1, %s4928_s29  }
 0x211   : > { %s708_s28 = sand.u32 1, %s4934_s30   ;;  %s687_s22 = scalar_lea.sflag [#allocation7], %s686_s8 }
 0x212   : > { %p3617_p11 = pneg %p4479_p4 }
 0x215   : > { %s4471_s17 = scalar_lea.hbm %s4946_s16, %s2525_s21  ;;  %s3620_s19 = scalar_lea.hbm %s4946_s16, 512 }
 0x216   : > { %s3615_s0 = scalar_lea.hbm %s4471_s17, 128  ;;  %p3621_p12 = scmp.lt.u32.totalorder %s4471_s17, %s4946_s16 }
 0x217   : > { %p3616_p7 = scmp.ne.s32.totalorder %s4471_s17, %s3615_s0  ;;  %p3622_p6 = scmp.lt.u32.totalorder %s3620_s19, %s3615_s0 }
 0x218   : > { %p3624_p8 = scmp.lt.u32.totalorder %s3615_s0, %s4471_s17 }
 0x219   : > { %p3618_p1 = pnand %p3617_p11, %p3616_p7  ;;  %p3623_p2 = por %p3622_p6, %p3621_p12 }
 0x21b   : > { %p3619_p13 = pneg %p3618_p1  ;;  %p3625_p9 = por %p3624_p8, %p3623_p2 }
 0x21d   : > { %p3626_p5 = pnand %p3625_p9, %p3619_p13 }
 0x21f   : > { %3629 = shalt.err (!%p3626_p5)
}
 0x220   : > { %s3630_s8 = scalar_lea.vmem %s4473_s14, 128  ;;  %s3860_s25 = smov [#allocation6]  }
 0x221   : > { %p3631_p7 = scmp.ne.s32.totalorder %s4473_s14, %s3630_s8  ;;  %s3635_s4 = sshll.u32 %s3860_s25, 4  ;;  %s3636_s4 = int_to_ptr.vmem [resolvable:$false] %s3635_s4 }
 0x222   : > { %s3637_s27 = scalar_lea.vmem %s3636_s4, 256  ;;  %p3638_p3 = scmp.lt.s32.totalorder %s4473_s14, %s3636_s4 }
 0x223   : > { %p3633_p1 = pnand %p3631_p7, %p3617_p11  ;;  %p3639_p12 = scmp.lt.s32.totalorder %s3637_s27, %s3630_s8 }
 0x225   : > { %p3634_p10 = pneg %p3633_p1  ;;  %p3640_p6 = por %p3639_p12, %p3638_p3 }
 0x227   : > { %p3641_p2 = pnand %p3640_p6, %p3634_p10 }
 0x229   : > { %3644 = shalt.err (!%p3641_p2)
}
 0x22a   : > { %2976 = dma.hbm_to_vmem [thread:$0]  (!%p4479_p4), %s4471_s17, 128, %s4473_s14, %s687_s22  }
 0x22b   : > { %s2526_s0 = sshll.u32 %s708_s28, 4  ;;  %s2589_s9 = sshll.u32 %s4930_s3, 8 }
 0x22c   : > { %s4949_s21 = sld [smem:[#allocation64_spill]]  ;;  %s710_s20 = scalar_lea.vmem [#allocation9], %s2526_s0 }
 0x22d   : > { %s717_s4 = sshll.u32 %s710_s20, 4  ;;  %s4530_s27 = scalar_lea.sflag [#allocation10], %s706_s26  ;;  %s4526_s4 = int_to_ptr.vmem [resolvable:$true] %s717_s4 }
 0x22e   : > { %p3647_p10 = pneg %p4487_p0 }
 0x232   : > { %s4950_s25 = smov %s4949_s21  ;;  %s4524_s8 = scalar_lea.hbm %s4949_s21, %s2589_s9 }
 0x233   : > { %s3645_s14 = scalar_lea.hbm %s4524_s8, 256  ;;  %s3650_s30 = scalar_lea.hbm %s4950_s25, 512 }
 0x234   : > { %p3646_p3 = scmp.ne.s32.totalorder %s4524_s8, %s3645_s14  ;;  %p3651_p4 = scmp.lt.u32.totalorder %s4524_s8, %s4950_s25 }
 0x235   : > { %p3652_p11 = scmp.lt.u32.totalorder %s3650_s30, %s3645_s14  ;;  %p3654_p8 = scmp.lt.u32.totalorder %s3645_s14, %s4524_s8 }
 0x236   : > { %p3648_p5 = pnand %p3647_p10, %p3646_p3 }
 0x237   : > { %p3653_p13 = por %p3652_p11, %p3651_p4 }
 0x238   : > { %p3649_p9 = pneg %p3648_p5 }
 0x239   : > { %p3655_p7 = por %p3654_p8, %p3653_p13 }
 0x23b   : > { %p3656_p1 = pnand %p3655_p7, %p3649_p9 }
 0x23d   : > { %3659 = shalt.err (!%p3656_p1)
}
 0x23e   : > { %s3660_s29 = scalar_lea.vmem %s4526_s4, 256  ;;  %s3861_s26 = smov [#allocation9]  }
 0x23f   : > { %p3661_p12 = scmp.ne.s32.totalorder %s4526_s4, %s3660_s29  ;;  %s3665_s0 = sshll.u32 %s3861_s26, 4  ;;  %s3666_s0 = int_to_ptr.vmem [resolvable:$false] %s3665_s0 }
 0x240   : > { %s3667_s9 = scalar_lea.vmem %s3666_s0, 512  ;;  %p3668_p3 = scmp.lt.s32.totalorder %s4526_s4, %s3666_s0 }
 0x241   : > { %p3663_p6 = pnand %p3661_p12, %p3647_p10  ;;  %p3669_p5 = scmp.lt.s32.totalorder %s3667_s9, %s3660_s29 }
 0x243   : > { %p3664_p2 = pneg %p3663_p6  ;;  %p3670_p4 = por %p3669_p5, %p3668_p3 }
 0x245   : > { %p3671_p11 = pnand %p3670_p4, %p3664_p2 }
 0x247   : > { %3674 = shalt.err (!%p3671_p11)
}
 0x248   : > { %s4951_s19 = smov 8   ;;  %s4952_s5 = sld [smem:[#allocation61_spill]] }
 0x249   : > { %2979 = dma.hbm_to_vmem [thread:$0]  (!%p4487_p0), %s4524_s8, 256, %s4526_s4, %s4530_s27, %s4920_s24, %s4920_s24, %s4951_s19  }
 0x24e   : > { %p4953_p10 = scmp.ne.s32.totalorder %s4952_s5, 0 }
 0x24f   : > { %s4954_s21 = sld [smem:[#allocation53_spill]] (!%p4953_p10)  ;;  %p4955_p9 = scmp.ne.s32.totalorder (!%p4953_p10), %s4940_s6, 0 }
 0x250   : > { %729 = sbr.rel (%p4953_p10) target bundleno = 4563 (0x11d3), region = 92 }
 0x255   : > { %s4564_s20 = sand.u32 (!%p4953_p10), 1, %s4954_s21  }
 0x256   : > { %s2530_s14 = sshll.u32 (!%p4953_p10), %s4564_s20, 3  ;;  %s732_s17 = scalar_lea.sflag (!%p4953_p10), [#allocation7], %s4564_s20 }
 0x257   : > { %s4568_s3 = scalar_lea.vmem [#allocation6], %s2530_s14 }
 0x258   : > { %3750 = dma.done.wait (%p4955_p9), %s732_s17, 128  }
 0x259   : > { %3752 = vsyncadd (%p4955_p9), %s732_s17, 4294967168  ;;  %s4956_s15 = sld [smem:[#allocation60_spill]]  ;;  %s4957_s24 = sld [smem:[#allocation50_spill]] }
 0x25a   : > { %p4958_p0 = scmp.ne.s32.totalorder %s4943_s12, 0 }
 0x25f   : > { %s740_s8 = sand.u32 1, %s4956_s15   ;;  %s742_s4 = sand.u32 1, %s4957_s24  }
 0x260   : > { %s4576_s27 = sshll.u32 %s742_s4, 4  ;;  %s741_s30 = scalar_lea.sflag [#allocation10], %s740_s8 }
 0x261   : > { %s744_s28 = scalar_lea.vmem [#allocation9], %s4576_s27 }
 0x262   : > { %3754 = dma.done.wait (%p4958_p0), %s741_s30, 256  }
 0x263   : > { %3756 = vsyncadd (%p4958_p0), %s741_s30, 4294967040  ;;  %p4959_p13 = scmp.eq.s32.totalorder %s4956_s15, 0 }
 0x265   : > { %3758 = dma.done.wait (%p4959_p13), [#allocation10], 512   ;;  %p4960_p8 = pmov %p4959_p13 }
 0x267   : > { %3760 = vsyncadd (%p4960_p8), [#allocation10], 4294966784  ;;  %p4961_p7 = pmov %p4960_p8 }
 0x269   : > { %3762 = dma.done.wait (%p4961_p7), [#allocation13], 528   ;;  %p4962_p1 = pmov %p4961_p7 }
 0x26b   : > { %3764 = vsyncadd (%p4962_p1), [#allocation13], 4294966768  ;;  %p4963_p12 = pmov %p4962_p1 }
 0x26c   : > { %p4964_p6 = pmov %p4962_p1 }
 0x26d   : > { %3766 = dma.done.wait (%p4963_p12), [#allocation16], 528  }
 0x26e   : > { %3768 = vsyncadd (%p4964_p6), [#allocation16], 4294966768  ;;  %p4965_p2 = pmov %p4962_p1 }
 0x26f   : > { %p4966_p3 = pmov %p4962_p1 }
 0x270   : > { %3770 = dma.done.wait (%p4965_p2), [#allocation19], 528  }
 0x271   : > { %3772 = vsyncadd (%p4966_p3), [#allocation19], 4294966768  ;;  %p4967_p5 = pmov %p4962_p1 }
 0x272   : > { %p4968_p4 = pmov %p4962_p1 }
 0x273   : > { %3774 = dma.done.wait (%p4967_p5), [#allocation22], 32  }
 0x274   : > { %3776 = vsyncadd (%p4968_p4), [#allocation22], 4294967264  ;;  %p4969_p11 = pmov %p4962_p1 }
 0x275   : > { %p4970_p10 = pmov %p4962_p1 }
 0x276   : > { %3778 = dma.done.wait (%p4969_p11), [#allocation25], 528  }
 0x277   : > { %3780 = vsyncadd (%p4970_p10), [#allocation25], 4294966768  ;;  %p4971_p9 = pmov %p4962_p1 }
 0x278   : > { %p4972_p0 = pmov %p4962_p1 }
 0x279   : > { %3782 = dma.done.wait (%p4971_p9), [#allocation28], 1040  }
 0x27a   : > { %3784 = vsyncadd (%p4972_p0), [#allocation28], 4294966256  ;;  %p4973_p13 = pmov %p4972_p0 }
 0x27b   : > { %p4974_p8 = pmov %p4972_p0 }
 0x27c   : > { %3786 = dma.done.wait (%p4973_p13), [#allocation31], 32  }
 0x27d   : > { %3788 = vsyncadd (%p4974_p8), [#allocation31], 4294967264  ;;  %p4975_p7 = pmov %p4972_p0 }
 0x27e   : > { %p4976_p1 = pmov %p4972_p0 }
 0x27f   : > { %3790 = dma.done.wait (%p4975_p7), [#allocation34], 16  }
 0x280   : > { %3792 = vsyncadd (%p4976_p1), [#allocation34], 4294967280  ;;  %s4619_s6 = scalar_lea.vmem [#allocation35], %s2530_s14  ;;  %s4977_s12 = sld [smem:[#allocation55_spill]] }
 0x286   : > { %p2549_p12 = scmp.ne.s32.totalorder %s4977_s12, 0 }
 0x287   : > { %v872_v0 = vld [vmem:[#allocation14] sm:$0xff] (!%p2549_p12)  ;;  %v873_v1 = vld [vmem:[#allocation14 + $0x8] sm:$0xff] (!%p2549_p12)  ;;  %vm883_vm0 = vcmask (!%p2549_p12), 261120   ;;  %v874_v5 = vld [vmem:[#allocation14 + $0x10] sm:$0xff] (!%p2549_p12)  ;;  %vm1051_vm1 = vcmask (!%p2549_p12), 64512   ;;  %s3862_s22 = smov (!%p2549_p12), 120  }
 0x288   : > { %869 = sbr.rel (%p2549_p12) target bundleno = 1009 (0x3f1), region = 168  ;;  %v965_v2 = vld [vmem:[#allocation17] sm:$0xff] (!%p2549_p12)  ;;  %v2780_v3 = vpack.c.bf16 (!%p2549_p12), %v873_v1, %v872_v0  ;;  %v966_v4 = vld [vmem:[#allocation17 + $0x8] sm:$0xff] (!%p2549_p12)  ;;  %v875_v6 = vld [vmem:[#allocation14 + $0x18] sm:$0xff] (!%p2549_p12)  ;;  %s3863_s29 = smov (!%p2549_p12), 112  }
 0x289   : > { %v2788_v7 = vpack.c.bf16 (!%p2549_p12), %v966_v4, %v965_v2  ;;  %v2784_v8 = vpack.c.bf16 (!%p2549_p12), %v875_v6, %v874_v5  ;;  %v967_v9 = vld [vmem:[#allocation17 + $0x10] sm:$0xff] (!%p2549_p12)  ;;  %v968_v10 = vld [vmem:[#allocation17 + $0x18] sm:$0xff] (!%p2549_p12)  ;;  %v2553_v15 = vld [vmem:[#allocation18] ss:$0 sm:$0xff] (!%p2549_p12)  ;;  %s3864_s26 = smov (!%p2549_p12), 104  }
 0x28a   : > { %v870_v11 = vld [vmem:[%s744_s28] sm:$0xff] (!%p2549_p12)  ;;  %2781 = vmatprep.subr.bf16.mxu0 (!%p2549_p12), %v2780_v3  ;;  %v2792_v12 = vpack.c.bf16 (!%p2549_p12), %v968_v10, %v967_v9  ;;  %v871_v13 = vld [vmem:[%s744_s28 + $0x8] sm:$0xff] (!%p2549_p12) }
 0x28b   : > { %2658 = vmatprep.mubr.msk.f32.mxu0 (!%p2549_p12), %vm883_vm0, %v870_v11  ;;  %2789 = vmatprep.subr.bf16.mxu1 (!%p2549_p12), %v2788_v7  ;;  %v2550_v14 = vld [vmem:[#allocation15] ss:$0 sm:$0xff] (!%p2549_p12) }
 0x28c   : > { %2783 = vmatpush3.bf16.msra.mxu0 (!%p2549_p12), %v2780_v3  ;;  %2791 = vmatpush3.bf16.msra.mxu1 (!%p2549_p12), %v2788_v7 }
 0x28d   : > { %2785 = vmatprep.subr.bf16.mxu0 (!%p2549_p12), %v2784_v8  ;;  %2793 = vmatprep.subr.bf16.mxu1 (!%p2549_p12), %v2792_v12 }
 0x28e   : > { %2669 = vmatprep.mubr.msk.f32.mxu1 (!%p2549_p12), %vm883_vm0, %v870_v11 }
 0x290   : > { %2787 = vmatpush3.bf16.msra.mxu0 %v2784_v8  ;;  %2795 = vmatpush3.bf16.msra.mxu1 %v2792_v12 }
 0x293   : > { %2659 = vmatmul.mubr.msk.f32.vlgmr.msra.gmra.mrb[0].mxu0 %vm883_vm0, %v871_v13  ;;  %2670 = vmatmul.mubr.msk.f32.vlgmr.msra.gmra.mrb[0].mxu1 %vm883_vm0, %v871_v13 }
 0x366   : > { %v2660_v16 = vpop.f32.mrb[0].mxu0  ;;  %v2671_v18 = vpop.f32.mrb[0].mxu1 }
 0x367   : > { %v962_v17 = vadd.f32 %v2660_v16, %v2550_v14  ;;  %v956_v19 = vpop.f32.mrb[1].mxu0  ;;  %v1048_v20 = vadd.f32 %v2671_v18, %v2553_v15  ;;  %v1042_v22 = vpop.f32.mrb[1].mxu1 }
 0x368   : > { %v957_v21 = vadd.f32 %v2550_v14, %v956_v19  ;;  %v1043_v23 = vadd.f32 %v2553_v15, %v1042_v22 }
 0x369   : > { %1053 = vst.msk [vmem:[#allocation2 + $0x8] sm:$0xff] %vm1051_vm1, %v962_v17  ;;  %1060 = vrot.lane.b32.xlu0 %v962_v17, %s3862_s22  ;;  %1055 = vst.msk [vmem:[#allocation3 + $0x8] sm:$0xff] %vm1051_vm1, %v1048_v20  ;;  %1071 = vrot.lane.b32.xlu1 %v1048_v20, %s3862_s22 }
 0x36a   : > { %1052 = vst.msk [vmem:[#allocation2] sm:$0xff] %vm1051_vm1, %v957_v21  ;;  %1054 = vst.msk [vmem:[#allocation3] sm:$0xff] %vm1051_vm1, %v1043_v23 }
 0x36d   : > { %1058 = vrot.lane.b32.xlu0 %v957_v21, %s3862_s22  ;;  %1080 = vrot.lane.b32.xlu1 %v962_v17, %s3863_s29 }
 0x371   : > { %1078 = vrot.lane.b32.xlu0 %v957_v21, %s3863_s29  ;;  %1089 = vrot.lane.b32.xlu1 %v1048_v20, %s3863_s29 }
 0x375   : > { %1087 = vrot.lane.b32.xlu0 %v1043_v23, %s3863_s29  ;;  %1098 = vrot.lane.b32.xlu1 %v962_v17, %s3864_s26 }
 0x379   : > { %1096 = vrot.lane.b32.xlu0 %v957_v21, %s3864_s26  ;;  %1069 = vrot.lane.b32.xlu1 %v1043_v23, %s3862_s22 }
 0x37d   : > { %1105 = vrot.lane.b32.xlu0 %v1043_v23, %s3864_s26  ;;  %1107 = vrot.lane.b32.xlu1 %v1048_v20, %s3864_s26 }
 0x3db   : > { %v1061_v24 = vpop.permute.xlu0 %1060  ;;  %v1072_v25 = vpop.permute.xlu1 %1071 }
 0x3dc   : > { %1066 = vst.msk [vmem:[#allocation2 + $0x18] sm:$0xff] %vm1051_vm1, %v1061_v24  ;;  %1077 = vst.msk [vmem:[#allocation3 + $0x18] sm:$0xff] %vm1051_vm1, %v1072_v25 }
 0x3df   : > { %v1059_v26 = vpop.permute.xlu0 %1058  ;;  %v1081_v27 = vpop.permute.xlu1 %1080 }
 0x3e0   : > { %1065 = vst.msk [vmem:[#allocation2 + $0x10] sm:$0xff] %vm1051_vm1, %v1059_v26  ;;  %1086 = vst.msk [vmem:[#allocation2 + $0x28] sm:$0xff] %vm1051_vm1, %v1081_v27 }
 0x3e3   : > { %v1079_v28 = vpop.permute.xlu0 %1078  ;;  %v1090_v29 = vpop.permute.xlu1 %1089 }
 0x3e4   : > { %1085 = vst.msk [vmem:[#allocation2 + $0x20] sm:$0xff] %vm1051_vm1, %v1079_v28  ;;  %1095 = vst.msk [vmem:[#allocation3 + $0x28] sm:$0xff] %vm1051_vm1, %v1090_v29 }
 0x3e7   : > { %v1088_v30 = vpop.permute.xlu0 %1087  ;;  %v1099_v31 = vpop.permute.xlu1 %1098 }
 0x3e8   : > { %1094 = vst.msk [vmem:[#allocation3 + $0x20] sm:$0xff] %vm1051_vm1, %v1088_v30  ;;  %1104 = vst.msk [vmem:[#allocation2 + $0x38] sm:$0xff] %vm1051_vm1, %v1099_v31 }
 0x3eb   : > { %v1097_v32 = vpop.permute.xlu0 %1096  ;;  %v1070_v33 = vpop.permute.xlu1 %1069 }
 0x3ec   : > { %1103 = vst.msk [vmem:[#allocation2 + $0x30] sm:$0xff] %vm1051_vm1, %v1097_v32  ;;  %1076 = vst.msk [vmem:[#allocation3 + $0x10] sm:$0xff] %vm1051_vm1, %v1070_v33 }
 0x3ef   : > { %v1106_v34 = vpop.permute.xlu0 %1105  ;;  %v1108_v35 = vpop.permute.xlu1 %1107 }
 0x3f0   : > { %1112 = vst.msk [vmem:[#allocation3 + $0x30] sm:$0xff] %vm1051_vm1, %v1106_v34  ;;  %1113 = vst.msk [vmem:[#allocation3 + $0x38] sm:$0xff] %vm1051_vm1, %v1108_v35 }
 0x3f1 PF: > { %v1115_v36 = vld [vmem:[#allocation11] sm:$0xff]  ;;  %v1116_v37 = vld [vmem:[#allocation11 + $0x8] sm:$0xff]  ;;  %v1117_v38 = vld [vmem:[#allocation11 + $0x10] sm:$0xff]  ;;  %v3865_v39 = vmov 0.0|0.0   ;;  %vm3866_vm2 = vmmov 0   ;;  %v3867_v42 = vmov 0.0   ;;  %v1202_v58 = vlaneseq }
 0x3f2   : > { %2796 = vmatprep.subr.bf16.mxu1 %v3865_v39  ;;  %v2797_v40 = vpack.c.bf16 %v1116_v37, %v1115_v36  ;;  %v1118_v41 = vld [vmem:[#allocation11 + $0x18] sm:$0xff]  ;;  %2680 = vmatprep.mubr.msk.f32.mxu1 %vm3866_vm2, %v3867_v42  ;;  %vm1126_vm3 = vcmask 261120   ;;  %v1206_v45 = vld [vmem:[#allocation2] sm:$0xff]  ;;  %vm1210_vm4 = vcmask 64512   ;;  %v2556_v49 = vld [vmem:[#allocation12] ss:$0 sm:$0xff] }
 0x3f3   : > { %2806 = vmatprep.subr.bf16.mxu0 %v3865_v39  ;;  %2694 = vmatprep.mubr.msk.f32.mxu0 %vm3866_vm2, %v3867_v42  ;;  %v2800_v43 = vpack.c.bf16 %v1118_v41, %v1117_v38  ;;  %v4654_v44 = vld [vmem:[%s4568_s3] sm:$0xff]  ;;  %vm4663_vm5 = vmpackc.low %vm1210_vm4, %vm1210_vm4  ;;  %v1379_v50 = vld [vmem:[#allocation2 + $0x10] sm:$0xff]  ;;  %s4980_s0 = sld [smem:[#allocation56_spill]]  ;;  %s3868_s9 = smov 120   ;;  %v1203_v59 = vand.u32 127, %v1202_v58  ;;  %vm1293_vm7 = vcmask 130048  }
 0x3f4   : > { %2798 = vmatpush3.bf16.msra.mxu1 %v2797_v40  ;;  %v1207_v46 = vld [vmem:[#allocation2 + $0x8] sm:$0xff]  ;;  %v1380_v51 = vld [vmem:[#allocation2 + $0x18] sm:$0xff]  ;;  %v1208_v11 = vld [vmem:[#allocation3] sm:$0xff]  ;;  %s3869_s5 = smov 112   ;;  %s3870_s21 = smov 104   ;;  %vm1905_vm8 = vcmask 195584  }
 0x3f5   : > { %2799 = vmatprep.subr.bf16.mxu1 %v3865_v39  ;;  %v2803_v47 = vpack.c.bf16 %v1207_v46, %v1206_v45  ;;  %v2810_v55 = vpack.c.bf16 %v1380_v51, %v1379_v50  ;;  %v1209_v12 = vld [vmem:[#allocation3 + $0x8] sm:$0xff]  ;;  %v1382_v20 = vld [vmem:[#allocation3 + $0x10] sm:$0xff]  ;;  %v1383_v21 = vld [vmem:[#allocation3 + $0x18] sm:$0xff]  ;;  %s3871_s14 = smov 8   ;;  %s3872_s17 = smov 16   ;;  %vm2122_vm9 = vcmask 523264  }
 0x3f6   : > { %v2807_v13 = vpack.c.bf16 %v1209_v12, %v1208_v11  ;;  %v2814_v23 = vpack.c.bf16 %v1383_v21, %v1382_v20  ;;  %v1550_v26 = vld [vmem:[#allocation2 + $0x20] sm:$0xff]  ;;  %v1551_v27 = vld [vmem:[#allocation2 + $0x28] sm:$0xff]  ;;  %v1907_v11 = vld [vmem:[#allocation20] sm:$0xff]  ;;  %s3873_s3 = smov 24   ;;  %s4983_s15 = sld [smem:[#allocation55_spill]] }
 0x3f7   : > { %v2817_v29 = vpack.c.bf16 %v1551_v27, %v1550_v26  ;;  %v1554_v50 = vld [vmem:[#allocation3 + $0x28] sm:$0xff]  ;;  %v1908_v12 = vld [vmem:[#allocation20 + $0x8] sm:$0xff]  ;;  %s2243_s27 = sshll.u32 %s4619_s6, 4  ;;  %s4984_s12 = sld [smem:[#allocation80_spill]]  ;;  %s4762_s27 = int_to_ptr.vmem [resolvable:$true] %s2243_s27 }
 0x3f8   : > { %2801 = vmatpush3.bf16.msra.mxu1 %v2800_v43  ;;  %2808 = vmatpush3.bf16.msra.mxu0 %v2807_v13  ;;  %v1909_v13 = vld [vmem:[#allocation20 + $0x10] sm:$0xff]  ;;  %s2228_s29 = scalar_lea.sflag [#allocation8], %s4564_s20  ;;  %s3675_s26 = scalar_lea.vmem %s4762_s27, 128 }
 0x3f9   : > { %2802 = vmatprep.subr.bf16.mxu1 %v3865_v39  ;;  %s1201_s19 = sld [smem:[#allocation5 + %s4980_s0]]  ;;  %2813 = vmatprep.subr.bf16.mxu0 %v3865_v39  ;;  %s2585_s24 = sshll.u32 %s4980_s0, 1 }
 0x3fa   : > { %p3676_p6 = scmp.ne.s32.totalorder %s4762_s27, %s3675_s26  ;;  %p4985_p2 = scmp.ne.s32.totalorder %s4944_s7, 0 }
 0x3fb   : > { %2681 = vmatmul.mubr.msk.f32.vlgmr.msra.gmra.mrb[0].mxu1 %vm1126_vm3, %v4654_v44  ;;  %s3874_s0 = smov [#allocation35]  }
 0x3fc   : > { %2687 = vmatprep.mubr.msk.f32.mxu1 %vm3866_vm2, %v3867_v42  ;;  %s2239_s8 = sadd.s32 %s4983_s15, %s2585_s24  ;;  %p3677_p3 = pnand %p3676_p6, %p4985_p2 }
 0x3fd   : > { %s2586_s4 = sshll.u32 %s2239_s8, 7 }
 0x3fe   : > { %s4760_s22 = scalar_lea.hbm %s4984_s12, %s2586_s4  ;;  %p3678_p5 = pneg %p3677_p3 }
 0x3ff   : > { %v1204_v60 = vstv %s1201_s19 }
 0x400   : > { %vm4684_vm6 = vcmp.lt.s32.totalorder %v1203_v59, %v1204_v60 }
 0x401   : > { %2805 = vmatpush3.bf16.xpose.msk.msra.mxu1 %vm4663_vm5, %v2803_v47 }
 0x402   : > { %2809 = vmatprep.subr.bf16.mxu1 %v3865_v39 }
 0x4ce   : > { %v1196_v52 = vpop.f32.mrb[0].mxu1 }
 0x4cf   : > { %v1197_v53 = vadd.f32 %v2556_v49, %v1196_v52  ;;  %v2682_v54 = vpop.f32.mrb[1].mxu1  ;;  %v1553_v49 = vld [vmem:[#allocation3 + $0x20] sm:$0xff] }
 0x4d0   : > { %v2821_v51 = vpack.c.bf16 %v1554_v50, %v1553_v49  ;;  %v1722_v54 = vld [vmem:[#allocation2 + $0x38] sm:$0xff] }
 0x4d1   : > { %v4670_v56 = vmul.f32 0.35355338, %v1197_v53  ;;  %v1721_v53 = vld [vmem:[#allocation2 + $0x30] sm:$0xff]  ;;  %v2111_v50 = vld [vmem:[#allocation29 + $0x20] sm:$0xff] }
 0x4d3   : > { %1384 = vrot.lane.b32.xlu0 %v4670_v56, %s3868_s9  ;;  %2688 = vmatmul.mubr.msk.f32.vlgmr.msra.gmra.mrb[2].mxu1 %vm1210_vm4, %v4670_v56  ;;  %s3679_s9 = sshll.u32 %s3874_s0, 4  ;;  %s3680_s9 = int_to_ptr.vmem [resolvable:$false] %s3679_s9 }
 0x4d4   : > { %2812 = vmatpush3.bf16.xpose.msk.msra.mxu1 %vm4663_vm5, %v2810_v55  ;;  %2701 = vmatprep.mubr.msk.f32.mxu1 %vm3866_vm2, %v3867_v42  ;;  %s3681_s19 = scalar_lea.vmem %s3680_s9, 256  ;;  %p3682_p4 = scmp.lt.s32.totalorder %s4762_s27, %s3680_s9 }
 0x4d5   : > { %2820 = vmatprep.subr.bf16.mxu1 %v3865_v39  ;;  %p3683_p11 = scmp.lt.s32.totalorder %s3681_s19, %s3675_s26 }
 0x4d7   : > { %p3684_p10 = por %p3683_p11, %p3682_p4 }
 0x4d9   : > { %p3685_p9 = pnand %p3684_p10, %p3678_p5 }
 0x545   : > { %v1385_v57 = vpop.permute.xlu0 %1384 }
 0x546   : > { %2702 = vmatmul.mubr.msk.f32.vlgmr.msra.gmra.mrb[4].mxu1 %vm1210_vm4, %v1385_v57  ;;  %v2824_v57 = vpack.c.bf16 %v1722_v54, %v1721_v53 }
 0x547   : > { %2722 = vmatprep.mubr.msk.f32.mxu1 %vm3866_vm2, %v3867_v42  ;;  %2822 = vmatpush3.bf16.msra.mxu1 %v2821_v51  ;;  %v2112_v51 = vld [vmem:[#allocation29 + $0x28] sm:$0xff] }
 0x548   : > { %2823 = vmatprep.subr.bf16.mxu1 %v3865_v39 }
 0x5a6   : > { %v1286_v62 = vpop.f32.mrb[2].mxu1 }
 0x5a7   : > { %v1292_v63 = vsel %vm4684_vm6, %v1286_v62, -1e+09  ;;  %v2689_v0 = vpop.f32.mrb[3].mxu1 }
 0x5a8   : > { %v1294_v1 = vsel %vm1293_vm7, %v1292_v63, -inf }
 0x5a9   : > { %1295 = vmax.xlane.f32.xlu0 %v1294_v1 }
 0x619   : > { %v1460_v2 = vpop.f32.mrb[4].mxu1 }
 0x61a   : > { %v1464_v3 = vsel %vm4684_vm6, %v1460_v2, -1e+09  ;;  %v2703_v4 = vpop.f32.mrb[5].mxu1 }
 0x61b   : > { %v1465_v5 = vsel %vm1293_vm7, %v1464_v3, -inf }
 0x61c   : > { %1466 = vmax.xlane.f32.xlu1 %v1465_v5 }
 0x636   : > { %v1296_v6 = vpop.xlane.xlu0 %1295 }
 0x637   : > { %v1297_v7 = vsub.f32 %v1292_v63, %v1296_v6  ;;  %v1724_v6 = vld [vmem:[#allocation3 + $0x30] sm:$0xff] }
 0x639   : > { %v1298_v8 = vmul.f32 1.442695, %v1297_v7  ;;  %v1725_v7 = vld [vmem:[#allocation3 + $0x38] sm:$0xff] }
 0x63a   : > { %v2828_v61 = vpack.c.bf16 %v1725_v7, %v1724_v6 }
 0x63b   : > { %3137 = vpow2.f32 %v1298_v8 }
 0x645   : > { %v3138_v9 = vpop.eup %3137 }
 0x646   : > { %v1300_v10 = vsel %vm1293_vm7, %v3138_v9, 0.0 }
 0x647   : > { %1301 = vadd.xlane.f32.xlu1 %v1300_v10 }
 0x6a9   : > { %v1467_v14 = vpop.xlane.xlu1 %1466 }
 0x6aa   : > { %v1468_v15 = vsub.f32 %v1464_v3, %v1467_v14  ;;  %v2831_v14 = vpack.c.bf16 %v1908_v12, %v1907_v11 }
 0x6ac   : > { %v1469_v16 = vmul.f32 1.442695, %v1468_v15  ;;  %v1910_v15 = vld [vmem:[#allocation20 + $0x18] sm:$0xff] }
 0x6ae   : > { %3139 = vpow2.f32 %v1469_v16  ;;  %v2834_v16 = vpack.c.bf16 %v1910_v15, %v1909_v13 }
 0x6b8   : > { %v3140_v17 = vpop.eup %3139 }
 0x6b9   : > { %v1471_v18 = vsel %vm1293_vm7, %v3140_v17, 0.0 }
 0x6ba   : > { %1472 = vadd.xlane.f32.xlu1 %v1471_v18 }
 0x6cb   : > { %1555 = vrot.lane.b32.xlu1 %v4670_v56, %s3869_s5 }
 0x6d4   : > { %v1302_v19 = vpop.xlane.xlu1 %1301 }
 0x6d5   : > { %3141 = vrcp.f32 %v1302_v19 }
 0x6df   : > { %v3142_v22 = vpop.eup %3141 }
 0x6e0   : > { %v1304_v24 = vmul.f32 %v3142_v22, %v3138_v9 }
 0x6e2   : > { %2695 = vmatmul.mubr.msk.f32.vlgmr.msra.gmra.mrb[0].mxu0 %vm1293_vm7, %v1304_v24 }
 0x6e3   : > { %2815 = vmatpush3.bf16.msra.mxu0 %v2814_v23  ;;  %2708 = vmatprep.mubr.msk.f32.mxu0 %vm3866_vm2, %v3867_v42 }
 0x6e4   : > { %2816 = vmatprep.subr.bf16.mxu0 %v3865_v39 }
 0x747   : > { %v1473_v25 = vpop.xlane.xlu1 %1472 }
 0x748   : > { %3143 = vrcp.f32 %v1473_v25  ;;  %v2574_v25 = vld [vmem:[#allocation21] ss:$0 sm:$0xff] }
 0x74b   : > { %v1556_v31 = vpop.permute.xlu1 %1555 }
 0x752   : > { %v3144_v28 = vpop.eup %3143 }
 0x753   : > { %v1475_v30 = vmul.f32 %v3144_v28, %v3140_v17 }
 0x755   : > { %2709 = vmatmul.mubr.msk.f32.vlgmr.msra.gmra.mrb[2].mxu0 %vm1293_vm7, %v1475_v30 }
 0x756   : > { %2819 = vmatpush3.bf16.xpose.msk.msra.mxu0 %vm4663_vm5, %v2817_v29  ;;  %2715 = vmatprep.mubr.msk.f32.mxu0 %vm3866_vm2, %v3867_v42 }
 0x757   : > { %2827 = vmatprep.subr.bf16.mxu0 %v3865_v39 }
 0x75d   : > { %2716 = vmatmul.mubr.msk.f32.vlgmr.msra.gmra.mrb[4].mxu0 %vm1210_vm4, %v1556_v31 }
 0x75e   : > { %2736 = vmatprep.mubr.msk.f32.mxu0 %vm3866_vm2, %v3867_v42  ;;  %2829 = vmatpush3.bf16.msra.mxu0 %v2828_v61 }
 0x75f   : > { %2830 = vmatprep.subr.bf16.mxu0 %v3865_v39 }
 0x7b5   : > { %v4711_v32 = vpop.f32.mrb[0].mxu0 }
 0x7b6   : > { %v2696_v33 = vpop.f32.mrb[1].mxu0 }
 0x828   : > { %v1545_v34 = vpop.f32.mrb[2].mxu0 }
 0x829   : > { %v2710_v35 = vpop.f32.mrb[3].mxu0 }
 0x830   : > { %v1631_v36 = vpop.f32.mrb[4].mxu0 }
 0x831   : > { %v1635_v37 = vsel %vm4684_vm6, %v1631_v36, -1e+09  ;;  %v2717_v38 = vpop.f32.mrb[5].mxu0  ;;  %v2022_v36 = vld [vmem:[#allocation26] sm:$0xff] }
 0x832   : > { %v1636_v40 = vsel %vm1293_vm7, %v1635_v37, -inf }
 0x833   : > { %1637 = vmax.xlane.f32.xlu1 %v1636_v40  ;;  %v2025_v40 = vld [vmem:[#allocation26 + $0x18] sm:$0xff] }
 0x8c0   : > { %v1638_v41 = vpop.xlane.xlu1 %1637 }
 0x8c1   : > { %v1639_v43 = vsub.f32 %v1635_v37, %v1638_v41  ;;  %v2023_v37 = vld [vmem:[#allocation26 + $0x8] sm:$0xff] }
 0x8c2   : > { %v2837_v38 = vpack.c.bf16 %v2023_v37, %v2022_v36 }
 0x8c3   : > { %v1640_v45 = vmul.f32 1.442695, %v1639_v43  ;;  %v2108_v43 = vld [vmem:[#allocation29 + $0x8] sm:$0xff] }
 0x8c5   : > { %3145 = vpow2.f32 %v1640_v45  ;;  %v2109_v45 = vld [vmem:[#allocation29 + $0x10] sm:$0xff] }
 0x8cf   : > { %v3146_v46 = vpop.eup %3145 }
 0x8d0   : > { %v1642_v47 = vsel %vm1293_vm7, %v3146_v46, 0.0 }
 0x8d1   : > { %1643 = vadd.xlane.f32.xlu0 %v1642_v47  ;;  %v2110_v47 = vld [vmem:[#allocation29 + $0x18] sm:$0xff] }
 0x8d2   : > { %v2846_v49 = vpack.c.bf16 %v2110_v47, %v2109_v45 }
 0x8e7   : > { %1726 = vrot.lane.b32.xlu0 %v4670_v56, %s3870_s21 }
 0x95e   : > { %v1644_v52 = vpop.xlane.xlu0 %1643 }
 0x95f   : > { %3147 = vrcp.f32 %v1644_v52  ;;  %v2849_v52 = vpack.c.bf16 %v2112_v51, %v2111_v50 }
 0x962   : > { %v1727_v59 = vpop.permute.xlu0 %1726 }
 0x969   : > { %v3148_v55 = vpop.eup %3147 }
 0x96a   : > { %v1646_v58 = vmul.f32 %v3148_v55, %v3146_v46 }
 0x96c   : > { %2723 = vmatmul.mubr.msk.f32.vlgmr.msra.gmra.mrb[6].mxu1 %vm1293_vm7, %v1646_v58  ;;  %v2576_v58 = vld [vmem:[#allocation23] ss:$0 sm:$0xff] }
 0x96d   : > { %2826 = vmatpush3.bf16.xpose.msk.msra.mxu1 %vm4663_vm5, %v2824_v57  ;;  %2729 = vmatprep.mubr.msk.f32.mxu1 %vm3866_vm2, %v3867_v42 }
 0x96e   : > { %2836 = vmatprep.subr.bf16.mxu1 %v3865_v39 }
 0x974   : > { %2730 = vmatmul.mubr.msk.f32.vlgmr.msra.gmra.mrb[8].mxu1 %vm1210_vm4, %v1727_v59 }
 0x975   : > { %2758 = vmatprep.mubr.msk.f32.mxu1 %vm3866_vm2, %v3867_v42  ;;  %2838 = vmatpush3.bf16.msra.mxu1 %v2837_v38 }
 0x976   : > { %2839 = vmatprep.subr.bf16.mxu1 %v3865_v39 }
 0xa3f   : > { %v1716_v56 = vpop.f32.mrb[6].mxu1 }
 0xa40   : > { %v2724_v60 = vpop.f32.mrb[7].mxu1 }
 0xa47   : > { %v1802_v62 = vpop.f32.mrb[8].mxu1 }
 0xa48   : > { %v1806_v63 = vsel %vm4684_vm6, %v1802_v62, -1e+09  ;;  %v2731_v0 = vpop.f32.mrb[9].mxu1 }
 0xa49   : > { %v1807_v48 = vsel %vm1293_vm7, %v1806_v63, -inf  ;;  %v2114_v0 = vld [vmem:[#allocation29 + $0x38] sm:$0xff] }
 0xa4a   : > { %1808 = vmax.xlane.f32.xlu0 %v1807_v48 }
 0xad7   : > { %v1809_v1 = vpop.xlane.xlu0 %1808 }
 0xad8   : > { %v1810_v2 = vsub.f32 %v1806_v63, %v1809_v1  ;;  %v2113_v63 = vld [vmem:[#allocation29 + $0x30] sm:$0xff]  ;;  %v2578_v1 = vld [vmem:[#allocation27] ss:$0 sm:$0xff] }
 0xad9   : > { %v2852_v48 = vpack.c.bf16 %v2114_v0, %v2113_v63 }
 0xada   : > { %v1811_v3 = vmul.f32 1.442695, %v1810_v2 }
 0xadc   : > { %3149 = vpow2.f32 %v1811_v3 }
 0xae6   : > { %v3150_v4 = vpop.eup %3149 }
 0xae7   : > { %v1813_v5 = vsel %vm1293_vm7, %v3150_v4, 0.0 }
 0xae8   : > { %1814 = vadd.xlane.f32.xlu1 %v1813_v5  ;;  %v2580_v5 = vld [vmem:[#allocation30] ss:$0 sm:$0xff] }
 0xaf9   : > { %1892 = vrot.lane.b32.xlu1 %v1545_v34, %s3871_s14 }
 0xafd   : > { %1896 = vrot.lane.b32.xlu1 %v1716_v56, %s3872_s17  ;;  %v2577_v56 = vld [vmem:[#allocation24] ss:$0 sm:$0xff] }
 0xb75   : > { %v1815_v8 = vpop.xlane.xlu1 %1814 }
 0xb76   : > { %3151 = vrcp.f32 %v1815_v8 }
 0xb79   : > { %v1893_v19 = vpop.permute.xlu1 %1892 }
 0xb7a   : > { %v1903_v21 = vsel %vm1210_vm4, %v4711_v32, %v1893_v19  ;;  %v2582_v19 = vld [vmem:[#allocation32] ss:$0 sm:$0xff] }
 0xb7d   : > { %v1897_v20 = vpop.permute.xlu1 %1896 }
 0xb7e   : > { %v1904_v22 = vsel %vm1293_vm7, %v1903_v21, %v1897_v20  ;;  %v2583_v21 = vld [vmem:[#allocation33] ss:$0 sm:$0xff] }
 0xb80   : > { %v3152_v9 = vpop.eup %3151 }
 0xb81   : > { %v1817_v10 = vmul.f32 %v3152_v9, %v3150_v4 }
 0xb83   : > { %2737 = vmatmul.mubr.msk.f32.vlgmr.msra.gmra.mrb[6].mxu0 %vm1293_vm7, %v1817_v10 }
 0xb84   : > { %2747 = vmatprep.mubr.msk.f32.mxu0 %vm3866_vm2, %v3867_v42  ;;  %2832 = vmatpush3.bf16.msra.mxu0 %v2831_v14 }
 0xb85   : > { %2833 = vmatprep.subr.bf16.mxu0 %v3865_v39 }
 0xb88   : > { %2835 = vmatpush3.bf16.msra.mxu0 %v2834_v16 }
 0xb89   : > { %2842 = vmatprep.subr.bf16.mxu0 %v3865_v39 }
 0xc56   : > { %v1887_v17 = vpop.f32.mrb[6].mxu0 }
 0xc57   : > { %1900 = vrot.lane.b32.xlu1 %v1887_v17, %s3873_s3  ;;  %v2738_v18 = vpop.f32.mrb[7].mxu0 }
 0xcc9   : > { %v1901_v23 = vpop.permute.xlu1 %1900 }
 0xcca   : > { %v1906_v24 = vsel %vm1905_vm8, %v1904_v22, %v1901_v23 }
 0xccb   : > { %2748 = vmatmul.mubr.msk.f32.vlgmr.msra.gmra.mrb[8].mxu0 %vm1126_vm3, %v1906_v24 }
 0xccc   : > { %2777 = vmatprep.mubr.msk.f32.mxu0 %vm3866_vm2, %v3867_v42  ;;  %v2024_v42 = vld [vmem:[#allocation26 + $0x10] sm:$0xff] }
 0xccd   : > { %v2840_v41 = vpack.c.bf16 %v2025_v40, %v2024_v42 }
 0xccf   : > { %2841 = vmatpush3.bf16.msra.mxu1 %v2840_v41 }
 0xd9e   : > { %v1987_v26 = vpop.f32.mrb[8].mxu0 }
 0xd9f   : > { %v1988_v27 = vadd.f32 %v2574_v25, %v1987_v26  ;;  %v2749_v28 = vpop.f32.mrb[9].mxu0 }
 0xda1   : > { %v1991_v29 = vadd.f32 %v1988_v27, %v4654_v44  ;;  %v2107_v44 = vld [vmem:[#allocation29] sm:$0xff] }
 0xda2   : > { %v2843_v46 = vpack.c.bf16 %v2108_v43, %v2107_v44 }
 0xda3   : > { %v1994_v30 = vsel %vm1126_vm3, %v1991_v29, 0.0 }
 0xda4   : > { %1995 = vadd.xlane.f32.xlu0 %v1994_v30  ;;  %2844 = vmatpush3.bf16.msra.mxu0 %v2843_v46 }
 0xda5   : > { %2845 = vmatprep.subr.bf16.mxu0 %v3865_v39 }
 0xda8   : > { %2847 = vmatpush3.bf16.msra.mxu0 %v2846_v49 }
 0xda9   : > { %2848 = vmatprep.subr.bf16.mxu0 %v3865_v39 }
 0xdac   : > { %2850 = vmatpush3.bf16.msra.mxu0 %v2849_v52 }
 0xdad   : > { %2851 = vmatprep.subr.bf16.mxu0 %v3865_v39 }
 0xdb0   : > { %2853 = vmatpush3.bf16.msra.mxu0 %v2852_v48 }
 0xe31   : > { %v1996_v31 = vpop.xlane.xlu0 %1995 }
 0xe32   : > { %v1998_v32 = vmul.f32 0.03125, %v1996_v31 }
 0xe34   : > { %v1999_v33 = vsub.f32 %v1991_v29, %v1998_v32 }
 0xe36   : > { %v2000_v34 = vmul.f32 %v1999_v33, %v1999_v33 }
 0xe38   : > { %v2001_v35 = vsel %vm1126_vm3, %v2000_v34, 0.0 }
 0xe39   : > { %2002 = vadd.xlane.f32.xlu1 %v2001_v35 }
 0xec6   : > { %v2003_v53 = vpop.xlane.xlu1 %2002 }
 0xec7   : > { %v2004_v54 = vmul.f32 0.03125, %v2003_v53 }
 0xec9   : > { %v2005_v55 = vadd.f32 1e-05, %v2004_v54 }
 0xecb   : > { %3153 = vrsqrt.f32 %v2005_v55 }
 0xed5   : > { %v3154_v57 = vpop.eup %3153 }
 0xed6   : > { %v2007_v59 = vmul.f32 %v3154_v57, %v1999_v33 }
 0xed8   : > { %v2014_v60 = vmul.f32 %v2576_v58, %v2007_v59 }
 0xeda   : > { %v2021_v62 = vadd.f32 %v2577_v56, %v2014_v60 }
 0xedc   : > { %2759 = vmatmul.mubr.msk.f32.vlgmr.msra.gmra.mrb[10].mxu1 %vm1126_vm3, %v2021_v62 }
 0xfaf   : > { %v2102_v2 = vpop.f32.mrb[10].mxu1 }
 0xfb0   : > { %v2103_v3 = vadd.f32 %v2578_v1, %v2102_v2  ;;  %v2760_v39 = vpop.f32.mrb[11].mxu1 }
 0xfb2   : > { %v2106_v4 = vmax.f32 %v2103_v3, 0.0 }
 0xfb4   : > { %2778 = vmatmul.mubr.msk.f32.vlgmr.msra.gmra.mrb[10].mxu0 %vm2122_vm9, %v2106_v4 }
0x1087   : > { %v2192_v6 = vpop.f32.mrb[10].mxu0 }
0x1088   : > { %v2193_v7 = vadd.f32 %v2580_v5, %v2192_v6  ;;  %v2779_v61 = vpop.f32.mrb[11].mxu0 }
0x108a   : > { %v2196_v8 = vadd.f32 %v2193_v7, %v2021_v62 }
0x108c   : > { %v2199_v9 = vsel %vm1126_vm3, %v2196_v8, 0.0 }
0x108d   : > { %2200 = vadd.xlane.f32.xlu0 %v2199_v9 }
0x111a   : > { %v2201_v10 = vpop.xlane.xlu0 %2200 }
0x111b   : > { %v2202_v11 = vmul.f32 0.03125, %v2201_v10 }
0x111d   : > { %v2203_v12 = vsub.f32 %v2196_v8, %v2202_v11 }
0x111f   : > { %v2204_v13 = vmul.f32 %v2203_v12, %v2203_v12 }
0x1121   : > { %v2205_v14 = vsel %vm1126_vm3, %v2204_v13, 0.0 }
0x1122   : > { %2206 = vadd.xlane.f32.xlu0 %v2205_v14 }
0x11af   : > { %v2207_v15 = vpop.xlane.xlu0 %2206 }
0x11b0   : > { %v2208_v16 = vmul.f32 0.03125, %v2207_v15 }
0x11b2   : > { %v2209_v17 = vadd.f32 1e-05, %v2208_v16 }
0x11b4   : > { %3155 = vrsqrt.f32 %v2209_v17 }
0x11be   : > { %v3156_v18 = vpop.eup %3155 }
0x11bf   : > { %v2211_v20 = vmul.f32 %v3156_v18, %v2203_v12 }
0x11c1   : > { %v2218_v22 = vmul.f32 %v2582_v19, %v2211_v20 }
0x11c3   : > { %v2225_v23 = vadd.f32 %v2583_v21, %v2218_v22 }
0x11c5   : > { %2226 = vst.msk [vmem:[%s4619_s6] sm:$0xff] %vm1126_vm3, %v2225_v23 }
0x11c6   : > { %3688 = shalt.err (!%p3685_p9)
}
0x11c7   : > { %s3689_s20 = scalar_lea.hbm %s4760_s22, 128  ;;  %s3693_s21 = scalar_lea.hbm %s4984_s12, 512 }
0x11c8   : > { %p3690_p0 = scmp.ne.s32.totalorder %s4760_s22, %s3689_s20  ;;  %p3694_p7 = scmp.lt.u32.totalorder %s4760_s22, %s4984_s12 }
0x11c9   : > { %p3695_p1 = scmp.lt.u32.totalorder %s3693_s21, %s3689_s20  ;;  %p3697_p6 = scmp.lt.u32.totalorder %s3689_s20, %s4760_s22 }
0x11ca   : > { %p3691_p13 = pnand %p3690_p0, %p4985_p2 }
0x11cb   : > { %p3696_p12 = por %p3695_p1, %p3694_p7 }
0x11cc   : > { %p3692_p8 = pneg %p3691_p13 }
0x11cd   : > { %p3698_p3 = por %p3697_p6, %p3696_p12 }
0x11cf   : > { %p3699_p5 = pnand %p3698_p3, %p3692_p8 }
0x11d1   : > { %3702 = shalt.err (!%p3699_p5)
}
0x11d2   : > { %2922 = dma.vmem_to_hbm [thread:$0]  (%p4985_p2), %s4762_s27, 128, %s4760_s22, %s2228_s29  }
0x11d3 PF: > { %s4986_s3 = sld [smem:[#allocation59_spill]]  ;;  %s4987_s15 = sld [smem:[#allocation52_spill]] }
0x11d4   : > { %p4988_p11 = scmp.ne.s32.totalorder %s4945_s2, 0 }
0x11d9   : > { %p3017_p4 = scmp.ge.s32.totalorder %s4986_s3, 2  ;;  %s2255_s24 = sand.u32 1, %s4987_s15  }
0x11da   : > { %s2256_s8 = scalar_lea.sflag [#allocation8], %s2255_s24 }
0x11db   : > { %p2981_p10 = pnand %p3017_p4, %p4988_p11 }
0x11dd   : > { %3794 = dma.done.wait (!%p2981_p10), %s2256_s8, 128  }
0x11de   : > { %3796 = vsyncadd (!%p2981_p10), %s2256_s8, 4294967168  ;;  %s50_s4 = sadd.s32 1, %s4986_s3   ;;  %s4989_s30 = sld [smem:[#allocation50_spill]] }
0x11df   : > { %p47_p9 = scmp.ge.s32.totalorder %s50_s4, 6   ;;  %s4990_s3 = sld [smem:[#allocation51_spill]] }
0x11e0   : > { %s4991_s27 = sld [smem:[#allocation53_spill]]  ;;  %s4992_s28 = sld [smem:[#allocation54_spill]] }
0x11e1   : > { %s4993_s0 = sld [smem:[#allocation57_spill]]  ;;  %s4994_s7 = sld [smem:[#allocation58_spill]] }
0x11e2   : > { %s4995_s22 = smov %s5008_s13  ;;  %s4997_s26 = smov %s4438_s10 }
0x11e3   : > { %s4998_s29 = smov %s4441_s11  ;;  %s5000_s20 = smov %s5004_s1 }
0x11e4   : > { %s4996_s13 = smov %s4989_s30  ;;  %s5001_s21 = smov %s4995_s22 }
0x11e5   : > { %s5002_s1 = smov %s50_s4  ;;  %49 = sbr.rel (!%p47_p9) target bundleno = 45 (0x2d), region = 230 }
0x11e7   : > { %s4999_s30 = smov %s4994_s7 }
0x11ec   :  { %2261 = vsyncpa [#allocation7], 1 }
0x11ed   :  { %2263 = vsyncpa [#allocation7 + $0x1], 1 }
0x11ee   :  { %2264 = vsyncpa [#allocation10], 1 }
0x11ef   :  { %2266 = vsyncpa [#allocation10 + $0x1], 1 }
0x11f0   :  { %2267 = vsyncpa [#allocation13], 1 }
0x11f1   :  { %2268 = vsyncpa [#allocation16], 1 }
0x11f2   :  { %2269 = vsyncpa [#allocation19], 1 }
0x11f3   :  { %2270 = vsyncpa [#allocation22], 1 }
0x11f4   :  { %2271 = vsyncpa [#allocation25], 1 }
0x11f5   :  { %2272 = vsyncpa [#allocation28], 1 }
0x11f6   :  { %2273 = vsyncpa [#allocation31], 1 }
0x11f7   :  { %2274 = vsyncpa [#allocation34], 1 }
0x11f8   :  { %2275 = vsyncpa [#allocation8], 1 }
0x11f9   :  { %2277 = vsyncpa [#allocation8 + $0x1], 1 }

// kernel: tpu_custom_call.1
= control target key start
LH: loop header
LB: loop body
LE: loop exit
PB: predicated region body
PF: predicated region fallthrough
CT: control target
= control target key end

     0   :  { %s4825_s0 = inlined_call_operand.hbm [shape: s32[2], index: 0, kind: input, shape index: {}]   ;;  %s4826_s1 = inlined_call_operand.hbm [shape: f32[2,16,32], index: 1, kind: input, shape index: {}]   ;;  %s4827_s2 = inlined_call_operand.hbm [shape: f32[2,16,32], index: 2, kind: input, shape index: {}]   ;;  %s4828_s3 = inlined_call_operand.hbm [shape: f32[32,32], index: 3, kind: input, shape index: {}]   ;;  %s4829_s4 = inlined_call_operand.hbm [shape: f32[1,32], index: 4, kind: input, shape index: {}]   ;;  %s4830_s5 = inlined_call_operand.hbm [shape: f32[32,32], index: 5, kind: input, shape index: {}]   ;;  %s4831_s6 = inlined_call_operand.hbm [shape: f32[1,32], index: 6, kind: input, shape index: {}]   ;;  %s4832_s7 = inlined_call_operand.hbm [shape: f32[32,32], index: 7, kind: input, shape index: {}]   ;;  %s4833_s8 = inlined_call_operand.hbm [shape: f32[1,32], index: 8, kind: input, shape index: {}]   ;;  %s4834_s9 = inlined_call_operand.hbm [shape: f32[32,32], index: 9, kind: input, shape index: {}]   ;;  %s4835_s10 = inlined_call_operand.hbm [shape: f32[1,32], index: 10, kind: input, shape index: {}]   ;;  %s4836_s11 = inlined_call_operand.hbm [shape: f32[1,32], index: 11, kind: input, shape index: {}]   ;;  %s4837_s12 = inlined_call_operand.hbm [shape: f32[1,32], index: 12, kind: input, shape index: {}]   ;;  %s4838_s13 = inlined_call_operand.hbm [shape: f32[32,64], index: 13, kind: input, shape index: {}]   ;;  %s4839_s14 = inlined_call_operand.hbm [shape: f32[1,64], index: 14, kind: input, shape index: {}]   ;;  %s4840_s15 = inlined_call_operand.hbm [shape: f32[64,32], index: 15, kind: input, shape index: {}]   ;;  %s4841_s16 = inlined_call_operand.hbm [shape: f32[1,32], index: 16, kind: input, shape index: {}]   ;;  %s4842_s17 = inlined_call_operand.hbm [shape: f32[1,32], index: 17, kind: input, shape index: {}]   ;;  %s4843_s18 = inlined_call_operand.hbm [shape: f32[1,32], index: 18, kind: input, shape index: {}]   ;;  %s4844_s19 = inlined_call_operand.hbm [shape: f32[2,16,32], index: 19, kind: output, shape index: {}]  }
   0x1   :  { %4875 = sst [smem:[#allocation62_spill]] %s4825_s0 }
   0x2   :  { %4876 = sst [smem:[#allocation63_spill]] %s4826_s1  ;;  %s4894_s20 = sld [smem:[#allocation62_spill]] }
   0x3   :  { %4877 = sst [smem:[#allocation64_spill]] %s4827_s2 }
   0x4   :  { %4878 = sst [smem:[#allocation65_spill]] %s4828_s3 }
   0x5   :  { %4879 = sst [smem:[#allocation66_spill]] %s4829_s4 }
   0x6   :  { %4880 = sst [smem:[#allocation67_spill]] %s4830_s5 }
   0x7   :  { %4881 = sst [smem:[#allocation68_spill]] %s4831_s6 }
   0x8   :  { %4882 = sst [smem:[#allocation69_spill]] %s4832_s7 }
   0x9   :  { %4883 = sst [smem:[#allocation70_spill]] %s4833_s8 }
   0xa   :  { %4884 = sst [smem:[#allocation71_spill]] %s4834_s9 }
   0xb   :  { %4885 = sst [smem:[#allocation72_spill]] %s4835_s10 }
   0xc   :  { %4886 = sst [smem:[#allocation73_spill]] %s4836_s11 }
   0xd   :  { %4887 = sst [smem:[#allocation74_spill]] %s4837_s12 }
   0xe   :  { %4888 = sst [smem:[#allocation75_spill]] %s4838_s13  ;;  %s3157_s13 = scalar_lea.hbm %s4894_s20, 16 }
   0xf   :  { %4889 = sst [smem:[#allocation76_spill]] %s4839_s14  ;;  %p3158_p0 = scmp.ne.s32.totalorder %s4894_s20, %s3157_s13 }
  0x10   :  { %4890 = sst [smem:[#allocation77_spill]] %s4840_s15  ;;  %p3161_p1 = scmp.lt.u32.totalorder %s3157_s13, %s4894_s20 }
  0x11   :  { %4891 = sst [smem:[#allocation78_spill]] %s4841_s16 }
  0x12   :  { %4892 = sst [smem:[#allocation79_spill]] %s4842_s17  ;;  %p3163_p2 = pnand %p3161_p1, %p3158_p0 }
  0x13   :  { %4893 = sst [smem:[#allocation80_spill]] %s4844_s19 }
  0x14   :  { %3166 = shalt.err (!%p3163_p2)  }
  0x15   :  { %s3841_s23 = smov [#allocation5]  }
  0x16   :  { %25 = dma.hbm_to_smem %s4894_s20, 16, %s3841_s23, [#allocation4] }
  0x17   :  { %3747 = dma.done.wait [#allocation4], 16 }
  0x18   :  { %3748 = vsyncadd [#allocation4], 4294967280 }
  0x19   :  { %27 = sfence }
  0x1a   :  { %28 = vsyncpa [#allocation7], 0 }
  0x1b   :  { %30 = vsyncpa [#allocation7 + $0x1], 0 }
  0x1c   :  { %31 = vsyncpa [#allocation10], 0 }
  0x1d   :  { %33 = vsyncpa [#allocation10 + $0x1], 0 }
  0x1e   :  { %34 = vsyncpa [#allocation13], 0 }
  0x1f   :  { %35 = vsyncpa [#allocation16], 0 }
  0x20   :  { %36 = vsyncpa [#allocation19], 0 }
  0x21   :  { %37 = vsyncpa [#allocation22], 0 }
  0x22   :  { %38 = vsyncpa [#allocation25], 0 }
  0x23   :  { %39 = vsyncpa [#allocation28], 0 }
  0x24   :  { %40 = vsyncpa [#allocation31], 0 }
  0x25   :  { %41 = vsyncpa [#allocation34], 0 }
  0x26   :  { %42 = vsyncpa [#allocation8], 0 }
  0x27   :  { %44 = vsyncpa [#allocation8 + $0x1], 0  ;;  %s3987_s13 = smov 0   ;;  %s3989_s3 = smov 0  }
  0x28   :  { %s3991_s26 = smov 0   ;;  %s3993_s27 = smov 0  }
  0x29   :  { %s3995_s28 = smov 0   ;;  %s3997_s29 = smov 0  }
  0x2a   :  { %s3999_s0 = smov 0   ;;  %s4001_s30 = smov 0  }
  0x2b   :  { %s4003_s20 = smov 0   ;;  %s4005_s21 = smov 0  }
  0x2c   :  { %s4007_s1 = smov 0  }
  0x2d LB: > { %4895 = sst [smem:[#allocation49_spill]] %s3799_s13  ;;  %s4043_s22 = sadd.s32 4294967295, %s3839_s1   ;;  %s3839_s1 = sphi %s4007_s1, %s5002_s1   ;;  %s3835_s21 = sphi %s4005_s21, %s5001_s21   ;;  %s3831_s20 = sphi %s4003_s20, %s5000_s20   ;;  %s3827_s30 = sphi %s4001_s30, %s4999_s30   ;;  %s3823_s0 = sphi %s3999_s0, %s4993_s0   ;;  %s3819_s29 = sphi %s3997_s29, %s4998_s29   ;;  %s3815_s28 = sphi %s3995_s28, %s4992_s28   ;;  %s3811_s27 = sphi %s3993_s27, %s4991_s27   ;;  %s3807_s26 = sphi %s3991_s26, %s4997_s26   ;;  %s3803_s3 = sphi %s3989_s3, %s4990_s3   ;;  %s3799_s13 = sphi %s3987_s13, %s4996_s13  }
  0x2e   : > { %4896 = sst [smem:[#allocation50_spill]] %s3803_s3  ;;  %p2505_p3 = scmp.ge.s32.totalorder %s3839_s1, 1 }
  0x2f   : > { %4897 = sst [smem:[#allocation51_spill]] %s3807_s26  ;;  %p4866_p4 = scmp.eq.s32.totalorder %s4043_s22, 0 }
  0x30   : > { %4898 = sst [smem:[#allocation52_spill]] %s3811_s27  ;;  %p485_p5 = scmp.lt.s32.totalorder %s3839_s1, 5 }
  0x31   : > { %4899 = sst [smem:[#allocation53_spill]] %s3815_s28  ;;  %s3842_s23 = smov [#allocation11]  }
  0x32   : > { %4900 = sst [smem:[#allocation54_spill]] %s3819_s29  ;;  %p4048_p6 = pnand %p2505_p3, %p485_p5 }
  0x33   : > { %4901 = sst [smem:[#allocation55_spill]] %s3823_s0  ;;  %s497_s24 = sshll.u32 %s3842_s23, 4  ;;  %s4052_s24 = int_to_ptr.vmem [resolvable:$true] %s497_s24 }
  0x34   : > { %4902 = sst [smem:[#allocation56_spill]] %s3827_s30  ;;  %p2924_p7 = pneg %p4048_p6 }
  0x35   : > { %4903 = sst [smem:[#allocation57_spill]] %s3831_s20  ;;  %s3843_s19 = smov [#allocation12]  }
  0x36   : > { %4904 = sst [smem:[#allocation58_spill]] %s3835_s21  ;;  %p4058_p8 = pnand %p2924_p7, %p4866_p4 }
  0x37   : > { %4905 = sst [smem:[#allocation59_spill]] %s3839_s1  ;;  %s511_s30 = sshll.u32 %s3843_s19, 4  ;;  %s4062_s30 = int_to_ptr.vmem [resolvable:$true] %s511_s30 }
  0x38   : > { %4906 = sst [smem:[#allocation60_spill]] %s4043_s22  ;;  %s3844_s0 = smov [#allocation15]  }
  0x39   : > { %s4907_s2 = scalar_select %p4048_p6, 1, 0 }
  0x3a   : > { %s4064_s13 = sshll.u32 %s3844_s0, 4  ;;  %s4910_s23 = sld [smem:[#allocation65_spill]]  ;;  %s536_s13 = int_to_ptr.vmem [resolvable:$true] %s4064_s13 }
  0x3b   : > { %4908 = sst [smem:[#allocation61_spill]] %s4907_s2  ;;  %p4074_p10 = pneg %p4058_p8 }
  0x40   : > { %s3167_s27 = scalar_lea.hbm %s4910_s23, 512 }
  0x41   : > { %p3168_p9 = scmp.ne.s32.totalorder %s4910_s23, %s3167_s27  ;;  %p3174_p13 = scmp.lt.u32.totalorder %s3167_s27, %s4910_s23 }
  0x43   : > { %p3170_p11 = pnand %p4074_p10, %p3168_p9 }
  0x45   : > { %p3171_p12 = pneg %p3170_p11 }
  0x47   : > { %p3176_p0 = pnand %p3174_p13, %p3171_p12 }
  0x49   : > { %3179 = shalt.err (!%p3176_p0)
}
  0x4a   : > { %s3180_s3 = scalar_lea.vmem %s4052_s24, 512  ;;  %p3188_p5 = scmp.lt.s32.totalorder %s4052_s24, %s4052_s24 }
  0x4b   : > { %p3181_p1 = scmp.ne.s32.totalorder %s4052_s24, %s3180_s3  ;;  %p3189_p7 = scmp.lt.s32.totalorder %s3180_s3, %s3180_s3 }
  0x4d   : > { %p3183_p2 = pnand %p3181_p1, %p4074_p10  ;;  %p3190_p9 = por %p3189_p7, %p3188_p5 }
  0x4f   : > { %p3184_p3 = pneg %p3183_p2 }
  0x51   : > { %p3191_p11 = pnand %p3190_p9, %p3184_p3 }
  0x53   : > { %3194 = shalt.err (!%p3191_p11)
}
  0x54   : > { %s4868_s26 = smov 128   ;;  %s4870_s27 = smov 8  }
  0x55   : > { %2927 = dma.hbm_to_vmem [thread:$0]  (!%p4058_p8), %s4910_s23, 512, %s4052_s24, [#allocation10], %s4868_s26, %s4868_s26, %s4870_s27  }
  0x56   : > { %s4912_s4 = sld [smem:[#allocation66_spill]] }
  0x5c   : > { %s3195_s3 = scalar_lea.hbm %s4912_s4, 16 }
  0x5d   : > { %p3196_p12 = scmp.ne.s32.totalorder %s4912_s4, %s3195_s3  ;;  %p3202_p1 = scmp.lt.u32.totalorder %s3195_s3, %s4912_s4 }
  0x5f   : > { %p3198_p13 = pnand %p3196_p12, %p4074_p10 }
  0x61   : > { %p3199_p0 = pneg %p3198_p13 }
  0x63   : > { %p3204_p2 = pnand %p3202_p1, %p3199_p0 }
  0x65   : > { %3207 = shalt.err (!%p3204_p2)
}
  0x66   : > { %s3208_s24 = scalar_lea.vmem %s4062_s30, 16  ;;  %s3215_s29 = scalar_lea.vmem %s4062_s30, 32 }
  0x67   : > { %p3209_p3 = scmp.ne.s32.totalorder %s4062_s30, %s3208_s24  ;;  %p3216_p9 = scmp.lt.s32.totalorder %s4062_s30, %s4062_s30 }
  0x68   : > { %p3217_p11 = scmp.lt.s32.totalorder %s3215_s29, %s3208_s24 }
  0x69   : > { %p3211_p5 = pnand %p3209_p3, %p4074_p10 }
  0x6a   : > { %p3218_p12 = por %p3217_p11, %p3216_p9 }
  0x6b   : > { %p3212_p7 = pneg %p3211_p5 }
  0x6d   : > { %p3219_p13 = pnand %p3218_p12, %p3212_p7 }
  0x6f   : > { %3222 = shalt.err (!%p3219_p13)
}
  0x70   : > { %2930 = dma.hbm_to_vmem [thread:$0]  (!%p4058_p8), %s4912_s4, 16, %s4062_s30, [#allocation13]  }
  0x71   : > { %s4913_s6 = sld [smem:[#allocation68_spill]] }
  0x77   : > { %s3223_s2 = scalar_lea.hbm %s4913_s6, 16 }
  0x78   : > { %p3224_p0 = scmp.ne.s32.totalorder %s4913_s6, %s3223_s2  ;;  %p3230_p3 = scmp.lt.u32.totalorder %s3223_s2, %s4913_s6 }
  0x7a   : > { %p3226_p1 = pnand %p3224_p0, %p4074_p10 }
  0x7c   : > { %p3227_p2 = pneg %p3226_p1 }
  0x7e   : > { %p3232_p5 = pnand %p3230_p3, %p3227_p2 }
  0x80   : > { %3235 = shalt.err (!%p3232_p5)
}
  0x81   : > { %s3236_s29 = scalar_lea.vmem %s536_s13, 16  ;;  %s3243_s30 = scalar_lea.vmem %s536_s13, 32 }
  0x82   : > { %p3237_p7 = scmp.ne.s32.totalorder %s536_s13, %s3236_s29  ;;  %p3244_p12 = scmp.lt.s32.totalorder %s536_s13, %s536_s13 }
  0x83   : > { %p3245_p13 = scmp.lt.s32.totalorder %s3243_s30, %s3236_s29 }
  0x84   : > { %p3239_p9 = pnand %p3237_p7, %p4074_p10 }
  0x85   : > { %p3246_p4 = por %p3245_p13, %p3244_p12 }
  0x86   : > { %p3240_p11 = pneg %p3239_p9 }
  0x88   : > { %p3247_p6 = pnand %p3246_p4, %p3240_p11 }
  0x8a   : > { %3250 = shalt.err (!%p3247_p6)
}
  0x8b   : > { %2936 = dma.hbm_to_vmem [thread:$0]  (!%p4058_p8), %s4913_s6, 16, %s536_s13, [#allocation16]  }
  0x8c   : > { %s3847_s1 = smov [#allocation18]   ;;  %s3848_s2 = smov [#allocation21]  }
  0x8d   : > { %s559_s28 = sshll.u32 %s3847_s1, 4  ;;  %s583_s19 = sshll.u32 %s3848_s2, 4  ;;  %s560_s28 = int_to_ptr.vmem [resolvable:$true] %s559_s28  ;;  %s584_s19 = int_to_ptr.vmem [resolvable:$true] %s583_s19 }
  0x8e   : > { %s4914_s8 = sld [smem:[#allocation70_spill]] }
  0x94   : > { %s3251_s24 = scalar_lea.hbm %s4914_s8, 16 }
  0x95   : > { %p3252_p4 = scmp.ne.s32.totalorder %s4914_s8, %s3251_s24  ;;  %p3258_p1 = scmp.lt.u32.totalorder %s3251_s24, %s4914_s8 }
  0x97   : > { %p3254_p6 = pnand %p3252_p4, %p4074_p10 }
  0x99   : > { %p3255_p0 = pneg %p3254_p6 }
  0x9b   : > { %p3260_p2 = pnand %p3258_p1, %p3255_p0 }
  0x9d   : > { %3263 = shalt.err (!%p3260_p2)
}
  0x9e   : > { %s3264_s13 = scalar_lea.vmem %s560_s28, 16  ;;  %s3271_s21 = scalar_lea.vmem %s560_s28, 32 }
  0x9f   : > { %p3265_p3 = scmp.ne.s32.totalorder %s560_s28, %s3264_s13  ;;  %p3272_p9 = scmp.lt.s32.totalorder %s560_s28, %s560_s28 }
  0xa0   : > { %p3273_p11 = scmp.lt.s32.totalorder %s3271_s21, %s3264_s13 }
  0xa1   : > { %p3267_p5 = pnand %p3265_p3, %p4074_p10 }
  0xa2   : > { %p3274_p12 = por %p3273_p11, %p3272_p9 }
  0xa3   : > { %p3268_p7 = pneg %p3267_p5 }
  0xa5   : > { %p3275_p13 = pnand %p3274_p12, %p3268_p7 }
  0xa7   : > { %3278 = shalt.err (!%p3275_p13)
}
  0xa8   : > { %2942 = dma.hbm_to_vmem [thread:$0]  (!%p4058_p8), %s4914_s8, 16, %s560_s28, [#allocation19]  }
  0xa9   : > { %s4915_s10 = sld [smem:[#allocation72_spill]] }
  0xaf   : > { %s3279_s3 = scalar_lea.hbm %s4915_s10, 16 }
  0xb0   : > { %p3280_p4 = scmp.ne.s32.totalorder %s4915_s10, %s3279_s3  ;;  %p3286_p1 = scmp.lt.u32.totalorder %s3279_s3, %s4915_s10 }
  0xb2   : > { %p3282_p6 = pnand %p3280_p4, %p4074_p10 }
  0xb4   : > { %p3283_p0 = pneg %p3282_p6 }
  0xb6   : > { %p3288_p2 = pnand %p3286_p1, %p3283_p0 }
  0xb8   : > { %3291 = shalt.err (!%p3288_p2)
}
  0xb9   : > { %s3292_s13 = scalar_lea.vmem %s584_s19, 16  ;;  %s3299_s28 = scalar_lea.vmem %s584_s19, 32 }
  0xba   : > { %p3293_p3 = scmp.ne.s32.totalorder %s584_s19, %s3292_s13  ;;  %p3300_p9 = scmp.lt.s32.totalorder %s584_s19, %s584_s19 }
  0xbb   : > { %p3301_p11 = scmp.lt.s32.totalorder %s3299_s28, %s3292_s13 }
  0xbc   : > { %p3295_p5 = pnand %p3293_p3, %p4074_p10 }
  0xbd   : > { %p3302_p12 = por %p3301_p11, %p3300_p9 }
  0xbe   : > { %p3296_p7 = pneg %p3295_p5 }
  0xc0   : > { %p3303_p13 = pnand %p3302_p12, %p3296_p7 }
  0xc2   : > { %3306 = shalt.err (!%p3303_p13)
}
  0xc3   : > { %2948 = dma.hbm_to_vmem [thread:$0]  (!%p4058_p8), %s4915_s10, 16, %s584_s19, [#allocation22]  }
  0xc4   : > { %s3849_s2 = smov [#allocation24]   ;;  %s3850_s0 = smov [#allocation27]  }
  0xc5   : > { %s605_s26 = sshll.u32 %s3849_s2, 4  ;;  %s629_s3 = sshll.u32 %s3850_s0, 4  ;;  %s606_s26 = int_to_ptr.vmem [resolvable:$true] %s605_s26  ;;  %s630_s3 = int_to_ptr.vmem [resolvable:$true] %s629_s3 }
  0xc6   : > { %s4916_s12 = sld [smem:[#allocation74_spill]] }
  0xcc   : > { %s3307_s30 = scalar_lea.hbm %s4916_s12, 16 }
  0xcd   : > { %p3308_p4 = scmp.ne.s32.totalorder %s4916_s12, %s3307_s30  ;;  %p3314_p1 = scmp.lt.u32.totalorder %s3307_s30, %s4916_s12 }
  0xcf   : > { %p3310_p6 = pnand %p3308_p4, %p4074_p10 }
  0xd1   : > { %p3311_p0 = pneg %p3310_p6 }
  0xd3   : > { %p3316_p2 = pnand %p3314_p1, %p3311_p0 }
  0xd5   : > { %3319 = shalt.err (!%p3316_p2)
}
  0xd6   : > { %s3320_s19 = scalar_lea.vmem %s606_s26, 16  ;;  %s3327_s1 = scalar_lea.vmem %s606_s26, 32 }
  0xd7   : > { %p3321_p3 = scmp.ne.s32.totalorder %s606_s26, %s3320_s19  ;;  %p3328_p9 = scmp.lt.s32.totalorder %s606_s26, %s606_s26 }
  0xd8   : > { %p3329_p11 = scmp.lt.s32.totalorder %s3327_s1, %s3320_s19 }
  0xd9   : > { %p3323_p5 = pnand %p3321_p3, %p4074_p10 }
  0xda   : > { %p3330_p12 = por %p3329_p11, %p3328_p9 }
  0xdb   : > { %p3324_p7 = pneg %p3323_p5 }
  0xdd   : > { %p3331_p13 = pnand %p3330_p12, %p3324_p7 }
  0xdf   : > { %3334 = shalt.err (!%p3331_p13)
}
  0xe0   : > { %2954 = dma.hbm_to_vmem [thread:$0]  (!%p4058_p8), %s4916_s12, 16, %s606_s26, [#allocation25]  }
  0xe1   : > { %s4917_s14 = sld [smem:[#allocation76_spill]] }
  0xe7   : > { %s3335_s30 = scalar_lea.hbm %s4917_s14, 16 }
  0xe8   : > { %p3336_p4 = scmp.ne.s32.totalorder %s4917_s14, %s3335_s30  ;;  %p3342_p1 = scmp.lt.u32.totalorder %s3335_s30, %s4917_s14 }
  0xea   : > { %p3338_p6 = pnand %p3336_p4, %p4074_p10 }
  0xec   : > { %p3339_p0 = pneg %p3338_p6 }
  0xee   : > { %p3344_p2 = pnand %p3342_p1, %p3339_p0 }
  0xf0   : > { %3347 = shalt.err (!%p3344_p2)
}
  0xf1   : > { %s3348_s19 = scalar_lea.vmem %s630_s3, 16  ;;  %s3355_s26 = scalar_lea.vmem %s630_s3, 32 }
  0xf2   : > { %p3349_p3 = scmp.ne.s32.totalorder %s630_s3, %s3348_s19  ;;  %p3356_p9 = scmp.lt.s32.totalorder %s630_s3, %s630_s3 }
  0xf3   : > { %p3357_p11 = scmp.lt.s32.totalorder %s3355_s26, %s3348_s19 }
  0xf4   : > { %p3351_p5 = pnand %p3349_p3, %p4074_p10 }
  0xf5   : > { %p3358_p12 = por %p3357_p11, %p3356_p9 }
  0xf6   : > { %p3352_p7 = pneg %p3351_p5 }
  0xf8   : > { %p3359_p13 = pnand %p3358_p12, %p3352_p7 }
  0xfa   : > { %3362 = shalt.err (!%p3359_p13)
}
  0xfb   : > { %2960 = dma.hbm_to_vmem [thread:$0]  (!%p4058_p8), %s4917_s14, 16, %s630_s3, [#allocation28]  }
  0xfc   : > { %s3851_s0 = smov [#allocation30]   ;;  %s3852_s29 = smov [#allocation14]  }
  0xfd   : > { %s653_s24 = sshll.u32 %s3851_s0, 4  ;;  %s521_s30 = sshll.u32 %s3852_s29, 4  ;;  %s654_s24 = int_to_ptr.vmem [resolvable:$true] %s653_s24  ;;  %s522_s30 = int_to_ptr.vmem [resolvable:$true] %s521_s30 }
  0xfe   : > { %s4918_s16 = sld [smem:[#allocation78_spill]] }
 0x104   : > { %s3363_s28 = scalar_lea.hbm %s4918_s16, 16 }
 0x105   : > { %p3364_p4 = scmp.ne.s32.totalorder %s4918_s16, %s3363_s28  ;;  %p3370_p1 = scmp.lt.u32.totalorder %s3363_s28, %s4918_s16 }
 0x107   : > { %p3366_p6 = pnand %p3364_p4, %p4074_p10 }
 0x109   : > { %p3367_p0 = pneg %p3366_p6 }
 0x10b   : > { %p3372_p2 = pnand %p3370_p1, %p3367_p0 }
 0x10d   : > { %3375 = shalt.err (!%p3372_p2)
}
 0x10e   : > { %s3376_s3 = scalar_lea.vmem %s654_s24, 16  ;;  %s3383_s2 = scalar_lea.vmem %s654_s24, 32 }
 0x10f   : > { %p3377_p3 = scmp.ne.s32.totalorder %s654_s24, %s3376_s3  ;;  %p3384_p9 = scmp.lt.s32.totalorder %s654_s24, %s654_s24 }
 0x110   : > { %p3385_p11 = scmp.lt.s32.totalorder %s3383_s2, %s3376_s3 }
 0x111   : > { %p3379_p5 = pnand %p3377_p3, %p4074_p10 }
 0x112   : > { %p3386_p12 = por %p3385_p11, %p3384_p9 }
 0x113   : > { %p3380_p7 = pneg %p3379_p5 }
 0x115   : > { %p3387_p13 = pnand %p3386_p12, %p3380_p7 }
 0x117   : > { %3390 = shalt.err (!%p3387_p13)
}
 0x118   : > { %2966 = dma.hbm_to_vmem [thread:$0]  (!%p4058_p8), %s4918_s16, 16, %s654_s24, [#allocation31]  }
 0x119   : > { %s4919_s5 = sld [smem:[#allocation67_spill]] }
 0x11f   : > { %s3391_s28 = scalar_lea.hbm %s4919_s5, 512 }
 0x120   : > { %p3392_p4 = scmp.ne.s32.totalorder %s4919_s5, %s3391_s28  ;;  %p3398_p1 = scmp.lt.u32.totalorder %s3391_s28, %s4919_s5 }
 0x122   : > { %p3394_p6 = pnand %p3392_p4, %p4074_p10 }
 0x124   : > { %p3395_p0 = pneg %p3394_p6 }
 0x126   : > { %p3400_p2 = pnand %p3398_p1, %p3395_p0 }
 0x128   : > { %3403 = shalt.err (!%p3400_p2)
}
 0x129   : > { %s3404_s3 = scalar_lea.vmem %s522_s30, 512  ;;  %p3412_p9 = scmp.lt.s32.totalorder %s522_s30, %s522_s30 }
 0x12a   : > { %p3405_p3 = scmp.ne.s32.totalorder %s522_s30, %s3404_s3  ;;  %p3413_p11 = scmp.lt.s32.totalorder %s3404_s3, %s3404_s3 }
 0x12c   : > { %p3407_p5 = pnand %p3405_p3, %p4074_p10  ;;  %p3414_p12 = por %p3413_p11, %p3412_p9 }
 0x12e   : > { %p3408_p7 = pneg %p3407_p5 }
 0x130   : > { %p3415_p13 = pnand %p3414_p12, %p3408_p7 }
 0x132   : > { %3418 = shalt.err (!%p3415_p13)
}
 0x133   : > { %s4920_s24 = smov 128   ;;  %s3853_s29 = smov [#allocation17]  }
 0x134   : > { %2933 = dma.hbm_to_vmem [thread:$0]  (!%p4058_p8), %s4919_s5, 512, %s522_s30, [#allocation13], %s4920_s24, %s4920_s24, %s4870_s27  }
 0x135   : > { %s545_s20 = sshll.u32 %s3853_s29, 4  ;;  %s3854_s13 = smov [#allocation20]   ;;  %s546_s20 = int_to_ptr.vmem [resolvable:$true] %s545_s20 }
 0x136   : > { %s569_s28 = sshll.u32 %s3854_s13, 4  ;;  %s4921_s7 = sld [smem:[#allocation69_spill]]  ;;  %s570_s28 = int_to_ptr.vmem [resolvable:$true] %s569_s28 }
 0x13c   : > { %s3419_s26 = scalar_lea.hbm %s4921_s7, 512 }
 0x13d   : > { %p3420_p4 = scmp.ne.s32.totalorder %s4921_s7, %s3419_s26  ;;  %p3426_p1 = scmp.lt.u32.totalorder %s3419_s26, %s4921_s7 }
 0x13f   : > { %p3422_p6 = pnand %p3420_p4, %p4074_p10 }
 0x141   : > { %p3423_p0 = pneg %p3422_p6 }
 0x143   : > { %p3428_p2 = pnand %p3426_p1, %p3423_p0 }
 0x145   : > { %3431 = shalt.err (!%p3428_p2)
}
 0x146   : > { %s3432_s30 = scalar_lea.vmem %s546_s20, 512  ;;  %p3440_p9 = scmp.lt.s32.totalorder %s546_s20, %s546_s20 }
 0x147   : > { %p3433_p3 = scmp.ne.s32.totalorder %s546_s20, %s3432_s30  ;;  %p3441_p11 = scmp.lt.s32.totalorder %s3432_s30, %s3432_s30 }
 0x149   : > { %p3435_p5 = pnand %p3433_p3, %p4074_p10  ;;  %p3442_p12 = por %p3441_p11, %p3440_p9 }
 0x14b   : > { %p3436_p7 = pneg %p3435_p5 }
 0x14d   : > { %p3443_p13 = pnand %p3442_p12, %p3436_p7 }
 0x14f   : > { %3446 = shalt.err (!%p3443_p13)
}
 0x150   : > { %2939 = dma.hbm_to_vmem [thread:$0]  (!%p4058_p8), %s4921_s7, 512, %s546_s20, [#allocation16], %s4920_s24, %s4920_s24, %s4870_s27  }
 0x151   : > { %s4922_s9 = sld [smem:[#allocation71_spill]] }
 0x157   : > { %s3447_s21 = scalar_lea.hbm %s4922_s9, 512 }
 0x158   : > { %p3448_p4 = scmp.ne.s32.totalorder %s4922_s9, %s3447_s21  ;;  %p3454_p1 = scmp.lt.u32.totalorder %s3447_s21, %s4922_s9 }
 0x15a   : > { %p3450_p6 = pnand %p3448_p4, %p4074_p10 }
 0x15c   : > { %p3451_p0 = pneg %p3450_p6 }
 0x15e   : > { %p3456_p2 = pnand %p3454_p1, %p3451_p0 }
 0x160   : > { %3459 = shalt.err (!%p3456_p2)
}
 0x161   : > { %s3460_s2 = scalar_lea.vmem %s570_s28, 512  ;;  %p3468_p9 = scmp.lt.s32.totalorder %s570_s28, %s570_s28 }
 0x162   : > { %p3461_p3 = scmp.ne.s32.totalorder %s570_s28, %s3460_s2  ;;  %p3469_p11 = scmp.lt.s32.totalorder %s3460_s2, %s3460_s2 }
 0x164   : > { %p3463_p5 = pnand %p3461_p3, %p4074_p10  ;;  %p3470_p12 = por %p3469_p11, %p3468_p9 }
 0x166   : > { %p3464_p7 = pneg %p3463_p5 }
 0x168   : > { %p3471_p13 = pnand %p3470_p12, %p3464_p7 }
 0x16a   : > { %3474 = shalt.err (!%p3471_p13)
}
 0x16b   : > { %2945 = dma.hbm_to_vmem [thread:$0]  (!%p4058_p8), %s4922_s9, 512, %s570_s28, [#allocation19], %s4920_s24, %s4920_s24, %s4870_s27  }
 0x16c   : > { %s3855_s4 = smov [#allocation23]   ;;  %s3856_s29 = smov [#allocation26]  }
 0x16d   : > { %s594_s0 = sshll.u32 %s3855_s4, 4  ;;  %s615_s13 = sshll.u32 %s3856_s29, 4  ;;  %s595_s0 = int_to_ptr.vmem [resolvable:$true] %s594_s0  ;;  %s616_s13 = int_to_ptr.vmem [resolvable:$true] %s615_s13 }
 0x16e   : > { %s4923_s11 = sld [smem:[#allocation73_spill]] }
 0x174   : > { %s3475_s26 = scalar_lea.hbm %s4923_s11, 16 }
 0x175   : > { %p3476_p4 = scmp.ne.s32.totalorder %s4923_s11, %s3475_s26  ;;  %p3482_p1 = scmp.lt.u32.totalorder %s3475_s26, %s4923_s11 }
 0x177   : > { %p3478_p6 = pnand %p3476_p4, %p4074_p10 }
 0x179   : > { %p3479_p0 = pneg %p3478_p6 }
 0x17b   : > { %p3484_p2 = pnand %p3482_p1, %p3479_p0 }
 0x17d   : > { %3487 = shalt.err (!%p3484_p2)
}
 0x17e   : > { %s3488_s28 = scalar_lea.vmem %s595_s0, 16  ;;  %s3495_s30 = scalar_lea.vmem %s595_s0, 32 }
 0x17f   : > { %p3489_p3 = scmp.ne.s32.totalorder %s595_s0, %s3488_s28  ;;  %p3496_p9 = scmp.lt.s32.totalorder %s595_s0, %s595_s0 }
 0x180   : > { %p3497_p11 = scmp.lt.s32.totalorder %s3495_s30, %s3488_s28 }
 0x181   : > { %p3491_p5 = pnand %p3489_p3, %p4074_p10 }
 0x182   : > { %p3498_p12 = por %p3497_p11, %p3496_p9 }
 0x183   : > { %p3492_p7 = pneg %p3491_p5 }
 0x185   : > { %p3499_p13 = pnand %p3498_p12, %p3492_p7 }
 0x187   : > { %3502 = shalt.err (!%p3499_p13)
}
 0x188   : > { %2951 = dma.hbm_to_vmem [thread:$0]  (!%p4058_p8), %s4923_s11, 16, %s595_s0, [#allocation22]  }
 0x189   : > { %s4924_s26 = sld [smem:[#allocation75_spill]] }
 0x18f   : > { %s4925_s2 = smov %s4924_s26  ;;  %s3503_s1 = scalar_lea.hbm %s4924_s26, 512 }
 0x190   : > { %p3504_p4 = scmp.ne.s32.totalorder %s4925_s2, %s3503_s1  ;;  %p3510_p1 = scmp.lt.u32.totalorder %s3503_s1, %s4925_s2 }
 0x192   : > { %p3506_p6 = pnand %p3504_p4, %p4074_p10 }
 0x194   : > { %p3507_p0 = pneg %p3506_p6 }
 0x196   : > { %p3512_p2 = pnand %p3510_p1, %p3507_p0 }
 0x198   : > { %3515 = shalt.err (!%p3512_p2)
}
 0x199   : > { %s3516_s4 = scalar_lea.vmem %s616_s13, 512  ;;  %p3524_p9 = scmp.lt.s32.totalorder %s616_s13, %s616_s13 }
 0x19a   : > { %p3517_p3 = scmp.ne.s32.totalorder %s616_s13, %s3516_s4  ;;  %p3525_p11 = scmp.lt.s32.totalorder %s3516_s4, %s3516_s4 }
 0x19c   : > { %p3519_p5 = pnand %p3517_p3, %p4074_p10  ;;  %p3526_p12 = por %p3525_p11, %p3524_p9 }
 0x19e   : > { %p3520_p7 = pneg %p3519_p5 }
 0x1a0   : > { %p3527_p13 = pnand %p3526_p12, %p3520_p7 }
 0x1a2   : > { %3530 = shalt.err (!%p3527_p13)
}
 0x1a3   : > { %2957 = dma.hbm_to_vmem [thread:$0]  (!%p4058_p8), %s4925_s2, 512, %s616_s13, [#allocation25], %s4920_s24, %s4920_s24, %s4870_s27  }
 0x1a4   : > { %s3857_s21 = smov [#allocation29]   ;;  %s3858_s26 = smov [#allocation32]  }
 0x1a5   : > { %s639_s19 = sshll.u32 %s3857_s21, 4  ;;  %s664_s1 = sshll.u32 %s3858_s26, 4  ;;  %s640_s19 = int_to_ptr.vmem [resolvable:$true] %s639_s19  ;;  %s665_s1 = int_to_ptr.vmem [resolvable:$true] %s664_s1 }
 0x1a6   : > { %s4926_s15 = sld [smem:[#allocation77_spill]] }
 0x1ac   : > { %s3531_s28 = scalar_lea.hbm %s4926_s15, 1024 }
 0x1ad   : > { %p3532_p4 = scmp.ne.s32.totalorder %s4926_s15, %s3531_s28  ;;  %p3538_p1 = scmp.lt.u32.totalorder %s3531_s28, %s4926_s15 }
 0x1af   : > { %p3534_p6 = pnand %p3532_p4, %p4074_p10 }
 0x1b1   : > { %p3535_p0 = pneg %p3534_p6 }
 0x1b3   : > { %p3540_p2 = pnand %p3538_p1, %p3535_p0 }
 0x1b5   : > { %3543 = shalt.err (!%p3540_p2)
}
 0x1b6   : > { %s3544_s13 = scalar_lea.vmem %s640_s19, 1024  ;;  %p3552_p9 = scmp.lt.s32.totalorder %s640_s19, %s640_s19 }
 0x1b7   : > { %p3545_p3 = scmp.ne.s32.totalorder %s640_s19, %s3544_s13  ;;  %p3553_p11 = scmp.lt.s32.totalorder %s3544_s13, %s3544_s13 }
 0x1b9   : > { %p3547_p5 = pnand %p3545_p3, %p4074_p10  ;;  %p3554_p12 = por %p3553_p11, %p3552_p9 }
 0x1bb   : > { %p3548_p7 = pneg %p3547_p5 }
 0x1bd   : > { %p3555_p13 = pnand %p3554_p12, %p3548_p7 }
 0x1bf   : > { %3558 = shalt.err (!%p3555_p13)
}
 0x1c0   : > { %2963 = dma.hbm_to_vmem [thread:$0]  (!%p4058_p8), %s4926_s15, 1024, %s640_s19, [#allocation28], %s4920_s24, %s4920_s24, %s4870_s27  }
 0x1c1   : > { %s4927_s17 = sld [smem:[#allocation79_spill]] }
 0x1c7   : > { %s3559_s3 = scalar_lea.hbm %s4927_s17, 16 }
 0x1c8   : > { %p3560_p4 = scmp.ne.s32.totalorder %s4927_s17, %s3559_s3  ;;  %p3566_p1 = scmp.lt.u32.totalorder %s3559_s3, %s4927_s17 }
 0x1ca   : > { %p3562_p6 = pnand %p3560_p4, %p4074_p10 }
 0x1cc   : > { %p3563_p0 = pneg %p3562_p6 }
 0x1ce   : > { %p3568_p2 = pnand %p3566_p1, %p3563_p0 }
 0x1d0   : > { %3571 = shalt.err (!%p3568_p2)
}
 0x1d1   : > { %s3572_s0 = scalar_lea.vmem %s665_s1, 16  ;;  %s3579_s19 = scalar_lea.vmem %s665_s1, 32 }
 0x1d2   : > { %p3573_p3 = scmp.ne.s32.totalorder %s665_s1, %s3572_s0  ;;  %p3580_p9 = scmp.lt.s32.totalorder %s665_s1, %s665_s1 }
 0x1d3   : > { %p3581_p11 = scmp.lt.s32.totalorder %s3579_s19, %s3572_s0 }
 0x1d4   : > { %p3575_p5 = pnand %p3573_p3, %p4074_p10 }
 0x1d5   : > { %p3582_p12 = por %p3581_p11, %p3580_p9 }
 0x1d6   : > { %p3576_p7 = pneg %p3575_p5 }
 0x1d8   : > { %p3583_p13 = pnand %p3582_p12, %p3576_p7 }
 0x1da   : > { %3586 = shalt.err (!%p3583_p13)
}
 0x1db   : > { %2969 = dma.hbm_to_vmem [thread:$0]  (!%p4058_p8), %s4927_s17, 16, %s665_s1, [#allocation31]  }
 0x1dc   : > { %s3859_s29 = smov [#allocation33]   ;;  %s3587_s20 = scalar_lea.hbm %s4843_s18, 16 }
 0x1dd   : > { %s675_s21 = sshll.u32 %s3859_s29, 4  ;;  %p3588_p4 = scmp.ne.s32.totalorder %s4843_s18, %s3587_s20  ;;  %s676_s21 = int_to_ptr.vmem [resolvable:$true] %s675_s21 }
 0x1de   : > { %p3594_p1 = scmp.lt.u32.totalorder %s3587_s20, %s4843_s18 }
 0x1df   : > { %p3590_p6 = pnand %p3588_p4, %p4074_p10 }
 0x1e1   : > { %p3591_p0 = pneg %p3590_p6 }
 0x1e3   : > { %p3596_p2 = pnand %p3594_p1, %p3591_p0 }
 0x1e5   : > { %3599 = shalt.err (!%p3596_p2)
}
 0x1e6   : > { %s3600_s1 = scalar_lea.vmem %s676_s21, 16  ;;  %s3607_s19 = scalar_lea.vmem %s676_s21, 32 }
 0x1e7   : > { %p3601_p3 = scmp.ne.s32.totalorder %s676_s21, %s3600_s1  ;;  %p3608_p9 = scmp.lt.s32.totalorder %s676_s21, %s676_s21 }
 0x1e8   : > { %p3609_p11 = scmp.lt.s32.totalorder %s3607_s19, %s3600_s1 }
 0x1e9   : > { %p3603_p5 = pnand %p3601_p3, %p4074_p10 }
 0x1ea   : > { %p3610_p12 = por %p3609_p11, %p3608_p9 }
 0x1eb   : > { %p3604_p7 = pneg %p3603_p5 }
 0x1ed   : > { %p3611_p13 = pnand %p3610_p12, %p3604_p7 }
 0x1ef   : > { %3614 = shalt.err (!%p3611_p13)
}
 0x1f0   : > { %s4928_s29 = sld [smem:[#allocation59_spill]]  ;;  %s4929_s26 = sld [smem:[#allocation57_spill]] }
 0x1f1   : > { %s4930_s3 = sld [smem:[#allocation58_spill]]  ;;  %s4931_s20 = sld [smem:[#allocation54_spill]] }
 0x1f2   : > { %s4932_s28 = sld [smem:[#allocation53_spill]]  ;;  %s4933_s22 = sld [smem:[#allocation52_spill]] }
 0x1f3   : > { %s4934_s30 = sld [smem:[#allocation51_spill]]  ;;  %s4935_s25 = sld [smem:[#allocation60_spill]] }
 0x1f4   : > { %2972 = dma.hbm_to_vmem [thread:$0]  (!%p4058_p8), %s4843_s18, 16, %s676_s21, [#allocation34]  }
 0x1f5   : > { %s4936_s0 = sld [smem:[#allocation50_spill]]  ;;  %s4937_s19 = sld [smem:[#allocation49_spill]] }
 0x1f6   : > { %s2504_s4 = sadd.s32 4294967294, %s4928_s29   ;;  %s59_s1 = sadd.s32 1, %s4929_s26 }
 0x1f7   : > { %p60_p10 = scmp.ge.s32.totalorder %s59_s1, 2  ;;  %s62_s13 = sadd.s32 1, %s4930_s3 }
 0x1f8   : > { %s71_s5 = sadd.s32 1, %s4931_s20  ;;  %p78_p4 = scmp.ne.s32.totalorder %s4931_s20, %s4932_s28 }
 0x1f9   : > { %s5004_s1 = smov (%p60_p10, %s59_s1), 0  ;;  %s5006_s13 = smov (!%p60_p10, %s62_s13), %s4930_s3 }
 0x1fa   : > { %s67_s21 = ssub.s32 %s4929_s26, %s5004_s1  ;;  %p79_p8 = scmp.eq.s32.totalorder %s4928_s29, 0 }
 0x1fb   : > { %p64_p6 = scmp.ge.s32.totalorder %s5006_s13, 2  ;;  %p84_p0 = scmp.ne.s32.totalorder %s4932_s28, %s4933_s22 }
 0x1fc   : > { %p4409_p1 = por %p79_p8, %p78_p4  ;;  %s97_s2 = sadd.s32 1, %s4934_s30 }
 0x1fd   : > { %s5008_s13 = smov (%p64_p6, %s5006_s13), 0  ;;  %p4939_p2 = scmp.eq.s32.totalorder %s4935_s25, 0 }
 0x1fe   : > { %p104_p5 = scmp.ne.s32.totalorder %s4934_s30, %s4936_s0  ;;  %s66_s7 = ssub.s32 %s4930_s3, %s5008_s13 }
 0x1ff   : > { %p4421_p3 = por %p4939_p2, %p84_p0  ;;  %p110_p7 = scmp.ne.s32.totalorder %s4936_s0, %s4937_s19 }
 0x200   : > { %s68_s8 = sor.u32 %s67_s21, %s66_s7  ;;  %p95_p9 = scmp.eq.s32.totalorder %s66_s7, 0 }
 0x201   : > { %s4940_s6 = scalar_select %p4421_p3, 1, 0 }
 0x202   : > { %p69_p11 = scmp.eq.s32.totalorder %s68_s8, 0  ;;  %p4433_p12 = por %p104_p5, %p79_p8 }
 0x203   : > { %s4438_s10 = scalar_select %p95_p9, %s4934_s30, %s97_s2  }
 0x204   : > { %s4441_s11 = scalar_select %p69_p11, %s4931_s20, %s71_s5  }
 0x205   : > { %p4942_p13 = pmov %p4939_p2  ;;  %p472_p6 = scmp.eq.s32.totalorder %s4935_s25, 3 }
 0x206   : > { %p478_p2 = scmp.eq.s32.totalorder %s2504_s4, 3  ;;  %p3000_p8 = scmp.lt.s32.totalorder %s4928_s29, 4 }
 0x207   : > { %p4445_p10 = por %p110_p7, %p4942_p13  ;;  %p4454_p5 = por %p472_p6, %p78_p4 }
 0x208   : > { %s686_s8 = sand.u32 1, %s4931_s20   ;;  %p4462_p9 = por %p478_p2, %p84_p0 }
 0x209   : > { %s4943_s12 = scalar_select %p4445_p10, 1, 0 }
 0x20a   : > { %s4944_s7 = scalar_select %p4454_p5, 1, 0 }
 0x20b   : > { %s4945_s2 = scalar_select %p4462_p9, 1, 0 }
 0x20c   : > { %s2523_s0 = sshll.u32 %s686_s8, 3  ;;  %s2524_s19 = sshll.u32 %s4930_s3, 1 }
 0x20d   : > { %s695_s5 = sadd.s32 %s4929_s26, %s2524_s19  ;;  %s690_s25 = scalar_lea.vmem [#allocation6], %s2523_s0 }
 0x20e   : > { %s2525_s21 = sshll.u32 %s695_s5, 7  ;;  %s699_s14 = sshll.u32 %s690_s25, 4  ;;  %s4473_s14 = int_to_ptr.vmem [resolvable:$true] %s699_s14 }
 0x20f   : > { %s4946_s16 = sld [smem:[#allocation63_spill]]  ;;  %p4479_p4 = pnand %p3000_p8, %p4409_p1 }
 0x210   : > { %p4487_p0 = pnand %p3000_p8, %p4433_p12  ;;  %s706_s26 = sand.u32 1, %s4928_s29  }
 0x211   : > { %s708_s28 = sand.u32 1, %s4934_s30   ;;  %s687_s22 = scalar_lea.sflag [#allocation7], %s686_s8 }
 0x212   : > { %p3617_p11 = pneg %p4479_p4 }
 0x215   : > { %s4471_s17 = scalar_lea.hbm %s4946_s16, %s2525_s21  ;;  %s3620_s19 = scalar_lea.hbm %s4946_s16, 512 }
 0x216   : > { %s3615_s0 = scalar_lea.hbm %s4471_s17, 128  ;;  %p3621_p12 = scmp.lt.u32.totalorder %s4471_s17, %s4946_s16 }
 0x217   : > { %p3616_p7 = scmp.ne.s32.totalorder %s4471_s17, %s3615_s0  ;;  %p3622_p6 = scmp.lt.u32.totalorder %s3620_s19, %s3615_s0 }
 0x218   : > { %p3624_p8 = scmp.lt.u32.totalorder %s3615_s0, %s4471_s17 }
 0x219   : > { %p3618_p1 = pnand %p3617_p11, %p3616_p7  ;;  %p3623_p2 = por %p3622_p6, %p3621_p12 }
 0x21b   : > { %p3619_p13 = pneg %p3618_p1  ;;  %p3625_p9 = por %p3624_p8, %p3623_p2 }
 0x21d   : > { %p3626_p5 = pnand %p3625_p9, %p3619_p13 }
 0x21f   : > { %3629 = shalt.err (!%p3626_p5)
}
 0x220   : > { %s3630_s8 = scalar_lea.vmem %s4473_s14, 128  ;;  %s3860_s25 = smov [#allocation6]  }
 0x221   : > { %p3631_p7 = scmp.ne.s32.totalorder %s4473_s14, %s3630_s8  ;;  %s3635_s4 = sshll.u32 %s3860_s25, 4  ;;  %s3636_s4 = int_to_ptr.vmem [resolvable:$false] %s3635_s4 }
 0x222   : > { %s3637_s27 = scalar_lea.vmem %s3636_s4, 256  ;;  %p3638_p3 = scmp.lt.s32.totalorder %s4473_s14, %s3636_s4 }
 0x223   : > { %p3633_p1 = pnand %p3631_p7, %p3617_p11  ;;  %p3639_p12 = scmp.lt.s32.totalorder %s3637_s27, %s3630_s8 }
 0x225   : > { %p3634_p10 = pneg %p3633_p1  ;;  %p3640_p6 = por %p3639_p12, %p3638_p3 }
 0x227   : > { %p3641_p2 = pnand %p3640_p6, %p3634_p10 }
 0x229   : > { %3644 = shalt.err (!%p3641_p2)
}
 0x22a   : > { %2976 = dma.hbm_to_vmem [thread:$0]  (!%p4479_p4), %s4471_s17, 128, %s4473_s14, %s687_s22  }
 0x22b   : > { %s2526_s0 = sshll.u32 %s708_s28, 4  ;;  %s2589_s9 = sshll.u32 %s4930_s3, 8 }
 0x22c   : > { %s4949_s21 = sld [smem:[#allocation64_spill]]  ;;  %s710_s20 = scalar_lea.vmem [#allocation9], %s2526_s0 }
 0x22d   : > { %s717_s4 = sshll.u32 %s710_s20, 4  ;;  %s4530_s27 = scalar_lea.sflag [#allocation10], %s706_s26  ;;  %s4526_s4 = int_to_ptr.vmem [resolvable:$true] %s717_s4 }
 0x22e   : > { %p3647_p10 = pneg %p4487_p0 }
 0x232   : > { %s4950_s25 = smov %s4949_s21  ;;  %s4524_s8 = scalar_lea.hbm %s4949_s21, %s2589_s9 }
 0x233   : > { %s3645_s14 = scalar_lea.hbm %s4524_s8, 256  ;;  %s3650_s30 = scalar_lea.hbm %s4950_s25, 512 }
 0x234   : > { %p3646_p3 = scmp.ne.s32.totalorder %s4524_s8, %s3645_s14  ;;  %p3651_p4 = scmp.lt.u32.totalorder %s4524_s8, %s4950_s25 }
 0x235   : > { %p3652_p11 = scmp.lt.u32.totalorder %s3650_s30, %s3645_s14  ;;  %p3654_p8 = scmp.lt.u32.totalorder %s3645_s14, %s4524_s8 }
 0x236   : > { %p3648_p5 = pnand %p3647_p10, %p3646_p3 }
 0x237   : > { %p3653_p13 = por %p3652_p11, %p3651_p4 }
 0x238   : > { %p3649_p9 = pneg %p3648_p5 }
 0x239   : > { %p3655_p7 = por %p3654_p8, %p3653_p13 }
 0x23b   : > { %p3656_p1 = pnand %p3655_p7, %p3649_p9 }
 0x23d   : > { %3659 = shalt.err (!%p3656_p1)
}
 0x23e   : > { %s3660_s29 = scalar_lea.vmem %s4526_s4, 256  ;;  %s3861_s26 = smov [#allocation9]  }
 0x23f   : > { %p3661_p12 = scmp.ne.s32.totalorder %s4526_s4, %s3660_s29  ;;  %s3665_s0 = sshll.u32 %s3861_s26, 4  ;;  %s3666_s0 = int_to_ptr.vmem [resolvable:$false] %s3665_s0 }
 0x240   : > { %s3667_s9 = scalar_lea.vmem %s3666_s0, 512  ;;  %p3668_p3 = scmp.lt.s32.totalorder %s4526_s4, %s3666_s0 }
 0x241   : > { %p3663_p6 = pnand %p3661_p12, %p3647_p10  ;;  %p3669_p5 = scmp.lt.s32.totalorder %s3667_s9, %s3660_s29 }
 0x243   : > { %p3664_p2 = pneg %p3663_p6  ;;  %p3670_p4 = por %p3669_p5, %p3668_p3 }
 0x245   : > { %p3671_p11 = pnand %p3670_p4, %p3664_p2 }
 0x247   : > { %3674 = shalt.err (!%p3671_p11)
}
 0x248   : > { %s4951_s19 = smov 8   ;;  %s4952_s5 = sld [smem:[#allocation61_spill]] }
 0x249   : > { %2979 = dma.hbm_to_vmem [thread:$0]  (!%p4487_p0), %s4524_s8, 256, %s4526_s4, %s4530_s27, %s4920_s24, %s4920_s24, %s4951_s19  }
 0x24e   : > { %p4953_p10 = scmp.ne.s32.totalorder %s4952_s5, 0 }
 0x24f   : > { %s4954_s21 = sld [smem:[#allocation53_spill]] (!%p4953_p10)  ;;  %p4955_p9 = scmp.ne.s32.totalorder (!%p4953_p10), %s4940_s6, 0 }
 0x250   : > { %729 = sbr.rel (%p4953_p10) target bundleno = 4563 (0x11d3), region = 92 }
 0x255   : > { %s4564_s20 = sand.u32 (!%p4953_p10), 1, %s4954_s21  }
 0x256   : > { %s2530_s14 = sshll.u32 (!%p4953_p10), %s4564_s20, 3  ;;  %s732_s17 = scalar_lea.sflag (!%p4953_p10), [#allocation7], %s4564_s20 }
 0x257   : > { %s4568_s3 = scalar_lea.vmem [#allocation6], %s2530_s14 }
 0x258   : > { %3750 = dma.done.wait (%p4955_p9), %s732_s17, 128  }
 0x259   : > { %3752 = vsyncadd (%p4955_p9), %s732_s17, 4294967168  ;;  %s4956_s15 = sld [smem:[#allocation60_spill]]  ;;  %s4957_s24 = sld [smem:[#allocation50_spill]] }
 0x25a   : > { %p4958_p0 = scmp.ne.s32.totalorder %s4943_s12, 0 }
 0x25f   : > { %s740_s8 = sand.u32 1, %s4956_s15   ;;  %s742_s4 = sand.u32 1, %s4957_s24  }
 0x260   : > { %s4576_s27 = sshll.u32 %s742_s4, 4  ;;  %s741_s30 = scalar_lea.sflag [#allocation10], %s740_s8 }
 0x261   : > { %s744_s28 = scalar_lea.vmem [#allocation9], %s4576_s27 }
 0x262   : > { %3754 = dma.done.wait (%p4958_p0), %s741_s30, 256  }
 0x263   : > { %3756 = vsyncadd (%p4958_p0), %s741_s30, 4294967040  ;;  %p4959_p13 = scmp.eq.s32.totalorder %s4956_s15, 0 }
 0x265   : > { %3758 = dma.done.wait (%p4959_p13), [#allocation10], 512   ;;  %p4960_p8 = pmov %p4959_p13 }
 0x267   : > { %3760 = vsyncadd (%p4960_p8), [#allocation10], 4294966784  ;;  %p4961_p7 = pmov %p4960_p8 }
 0x269   : > { %3762 = dma.done.wait (%p4961_p7), [#allocation13], 528   ;;  %p4962_p1 = pmov %p4961_p7 }
 0x26b   : > { %3764 = vsyncadd (%p4962_p1), [#allocation13], 4294966768  ;;  %p4963_p12 = pmov %p4962_p1 }
 0x26c   : > { %p4964_p6 = pmov %p4962_p1 }
 0x26d   : > { %3766 = dma.done.wait (%p4963_p12), [#allocation16], 528  }
 0x26e   : > { %3768 = vsyncadd (%p4964_p6), [#allocation16], 4294966768  ;;  %p4965_p2 = pmov %p4962_p1 }
 0x26f   : > { %p4966_p3 = pmov %p4962_p1 }
 0x270   : > { %3770 = dma.done.wait (%p4965_p2), [#allocation19], 528  }
 0x271   : > { %3772 = vsyncadd (%p4966_p3), [#allocation19], 4294966768  ;;  %p4967_p5 = pmov %p4962_p1 }
 0x272   : > { %p4968_p4 = pmov %p4962_p1 }
 0x273   : > { %3774 = dma.done.wait (%p4967_p5), [#allocation22], 32  }
 0x274   : > { %3776 = vsyncadd (%p4968_p4), [#allocation22], 4294967264  ;;  %p4969_p11 = pmov %p4962_p1 }
 0x275   : > { %p4970_p10 = pmov %p4962_p1 }
 0x276   : > { %3778 = dma.done.wait (%p4969_p11), [#allocation25], 528  }
 0x277   : > { %3780 = vsyncadd (%p4970_p10), [#allocation25], 4294966768  ;;  %p4971_p9 = pmov %p4962_p1 }
 0x278   : > { %p4972_p0 = pmov %p4962_p1 }
 0x279   : > { %3782 = dma.done.wait (%p4971_p9), [#allocation28], 1040  }
 0x27a   : > { %3784 = vsyncadd (%p4972_p0), [#allocation28], 4294966256  ;;  %p4973_p13 = pmov %p4972_p0 }
 0x27b   : > { %p4974_p8 = pmov %p4972_p0 }
 0x27c   : > { %3786 = dma.done.wait (%p4973_p13), [#allocation31], 32  }
 0x27d   : > { %3788 = vsyncadd (%p4974_p8), [#allocation31], 4294967264  ;;  %p4975_p7 = pmov %p4972_p0 }
 0x27e   : > { %p4976_p1 = pmov %p4972_p0 }
 0x27f   : > { %3790 = dma.done.wait (%p4975_p7), [#allocation34], 16  }
 0x280   : > { %3792 = vsyncadd (%p4976_p1), [#allocation34], 4294967280  ;;  %s4619_s6 = scalar_lea.vmem [#allocation35], %s2530_s14  ;;  %s4977_s12 = sld [smem:[#allocation55_spill]] }
 0x286   : > { %p2549_p12 = scmp.ne.s32.totalorder %s4977_s12, 0 }
 0x287   : > { %v872_v0 = vld [vmem:[#allocation14] sm:$0xff] (!%p2549_p12)  ;;  %v873_v1 = vld [vmem:[#allocation14 + $0x8] sm:$0xff] (!%p2549_p12)  ;;  %vm883_vm0 = vcmask (!%p2549_p12), 261120   ;;  %v874_v5 = vld [vmem:[#allocation14 + $0x10] sm:$0xff] (!%p2549_p12)  ;;  %vm1051_vm1 = vcmask (!%p2549_p12), 64512   ;;  %s3862_s22 = smov (!%p2549_p12), 120  }
 0x288   : > { %869 = sbr.rel (%p2549_p12) target bundleno = 1009 (0x3f1), region = 168  ;;  %v965_v2 = vld [vmem:[#allocation17] sm:$0xff] (!%p2549_p12)  ;;  %v2780_v3 = vpack.c.bf16 (!%p2549_p12), %v873_v1, %v872_v0  ;;  %v966_v4 = vld [vmem:[#allocation17 + $0x8] sm:$0xff] (!%p2549_p12)  ;;  %v875_v6 = vld [vmem:[#allocation14 + $0x18] sm:$0xff] (!%p2549_p12)  ;;  %s3863_s29 = smov (!%p2549_p12), 112  }
 0x289   : > { %v2788_v7 = vpack.c.bf16 (!%p2549_p12), %v966_v4, %v965_v2  ;;  %v2784_v8 = vpack.c.bf16 (!%p2549_p12), %v875_v6, %v874_v5  ;;  %v967_v9 = vld [vmem:[#allocation17 + $0x10] sm:$0xff] (!%p2549_p12)  ;;  %v968_v10 = vld [vmem:[#allocation17 + $0x18] sm:$0xff] (!%p2549_p12)  ;;  %v2553_v15 = vld [vmem:[#allocation18] ss:$0 sm:$0xff] (!%p2549_p12)  ;;  %s3864_s26 = smov (!%p2549_p12), 104  }
 0x28a   : > { %v870_v11 = vld [vmem:[%s744_s28] sm:$0xff] (!%p2549_p12)  ;;  %2781 = vmatprep.subr.bf16.mxu0 (!%p2549_p12), %v2780_v3  ;;  %v2792_v12 = vpack.c.bf16 (!%p2549_p12), %v968_v10, %v967_v9  ;;  %v871_v13 = vld [vmem:[%s744_s28 + $0x8] sm:$0xff] (!%p2549_p12) }
 0x28b   : > { %2658 = vmatprep.mubr.msk.f32.mxu0 (!%p2549_p12), %vm883_vm0, %v870_v11  ;;  %2789 = vmatprep.subr.bf16.mxu1 (!%p2549_p12), %v2788_v7  ;;  %v2550_v14 = vld [vmem:[#allocation15] ss:$0 sm:$0xff] (!%p2549_p12) }
 0x28c   : > { %2783 = vmatpush3.bf16.msra.mxu0 (!%p2549_p12), %v2780_v3  ;;  %2791 = vmatpush3.bf16.msra.mxu1 (!%p2549_p12), %v2788_v7 }
 0x28d   : > { %2785 = vmatprep.subr.bf16.mxu0 (!%p2549_p12), %v2784_v8  ;;  %2793 = vmatprep.subr.bf16.mxu1 (!%p2549_p12), %v2792_v12 }
 0x28e   : > { %2669 = vmatprep.mubr.msk.f32.mxu1 (!%p2549_p12), %vm883_vm0, %v870_v11 }
 0x290   : > { %2787 = vmatpush3.bf16.msra.mxu0 %v2784_v8  ;;  %2795 = vmatpush3.bf16.msra.mxu1 %v2792_v12 }
 0x293   : > { %2659 = vmatmul.mubr.msk.f32.vlgmr.msra.gmra.mrb[0].mxu0 %vm883_vm0, %v871_v13  ;;  %2670 = vmatmul.mubr.msk.f32.vlgmr.msra.gmra.mrb[0].mxu1 %vm883_vm0, %v871_v13 }
 0x366   : > { %v2660_v16 = vpop.f32.mrb[0].mxu0  ;;  %v2671_v18 = vpop.f32.mrb[0].mxu1 }
 0x367   : > { %v962_v17 = vadd.f32 %v2660_v16, %v2550_v14  ;;  %v956_v19 = vpop.f32.mrb[1].mxu0  ;;  %v1048_v20 = vadd.f32 %v2671_v18, %v2553_v15  ;;  %v1042_v22 = vpop.f32.mrb[1].mxu1 }
 0x368   : > { %v957_v21 = vadd.f32 %v2550_v14, %v956_v19  ;;  %v1043_v23 = vadd.f32 %v2553_v15, %v1042_v22 }
 0x369   : > { %1053 = vst.msk [vmem:[#allocation2 + $0x8] sm:$0xff] %vm1051_vm1, %v962_v17  ;;  %1060 = vrot.lane.b32.xlu0 %v962_v17, %s3862_s22  ;;  %1055 = vst.msk [vmem:[#allocation3 + $0x8] sm:$0xff] %vm1051_vm1, %v1048_v20  ;;  %1071 = vrot.lane.b32.xlu1 %v1048_v20, %s3862_s22 }
 0x36a   : > { %1052 = vst.msk [vmem:[#allocation2] sm:$0xff] %vm1051_vm1, %v957_v21  ;;  %1054 = vst.msk [vmem:[#allocation3] sm:$0xff] %vm1051_vm1, %v1043_v23 }
 0x36d   : > { %1058 = vrot.lane.b32.xlu0 %v957_v21, %s3862_s22  ;;  %1080 = vrot.lane.b32.xlu1 %v962_v17, %s3863_s29 }
 0x371   : > { %1078 = vrot.lane.b32.xlu0 %v957_v21, %s3863_s29  ;;  %1089 = vrot.lane.b32.xlu1 %v1048_v20, %s3863_s29 }
 0x375   : > { %1087 = vrot.lane.b32.xlu0 %v1043_v23, %s3863_s29  ;;  %1098 = vrot.lane.b32.xlu1 %v962_v17, %s3864_s26 }
 0x379   : > { %1096 = vrot.lane.b32.xlu0 %v957_v21, %s3864_s26  ;;  %1069 = vrot.lane.b32.xlu1 %v1043_v23, %s3862_s22 }
 0x37d   : > { %1105 = vrot.lane.b32.xlu0 %v1043_v23, %s3864_s26  ;;  %1107 = vrot.lane.b32.xlu1 %v1048_v20, %s3864_s26 }
 0x3db   : > { %v1061_v24 = vpop.permute.xlu0 %1060  ;;  %v1072_v25 = vpop.permute.xlu1 %1071 }
 0x3dc   : > { %1066 = vst.msk [vmem:[#allocation2 + $0x18] sm:$0xff] %vm1051_vm1, %v1061_v24  ;;  %1077 = vst.msk [vmem:[#allocation3 + $0x18] sm:$0xff] %vm1051_vm1, %v1072_v25 }
 0x3df   : > { %v1059_v26 = vpop.permute.xlu0 %1058  ;;  %v1081_v27 = vpop.permute.xlu1 %1080 }
 0x3e0   : > { %1065 = vst.msk [vmem:[#allocation2 + $0x10] sm:$0xff] %vm1051_vm1, %v1059_v26  ;;  %1086 = vst.msk [vmem:[#allocation2 + $0x28] sm:$0xff] %vm1051_vm1, %v1081_v27 }
 0x3e3   : > { %v1079_v28 = vpop.permute.xlu0 %1078  ;;  %v1090_v29 = vpop.permute.xlu1 %1089 }
 0x3e4   : > { %1085 = vst.msk [vmem:[#allocation2 + $0x20] sm:$0xff] %vm1051_vm1, %v1079_v28  ;;  %1095 = vst.msk [vmem:[#allocation3 + $0x28] sm:$0xff] %vm1051_vm1, %v1090_v29 }
 0x3e7   : > { %v1088_v30 = vpop.permute.xlu0 %1087  ;;  %v1099_v31 = vpop.permute.xlu1 %1098 }
 0x3e8   : > { %1094 = vst.msk [vmem:[#allocation3 + $0x20] sm:$0xff] %vm1051_vm1, %v1088_v30  ;;  %1104 = vst.msk [vmem:[#allocation2 + $0x38] sm:$0xff] %vm1051_vm1, %v1099_v31 }
 0x3eb   : > { %v1097_v32 = vpop.permute.xlu0 %1096  ;;  %v1070_v33 = vpop.permute.xlu1 %1069 }
 0x3ec   : > { %1103 = vst.msk [vmem:[#allocation2 + $0x30] sm:$0xff] %vm1051_vm1, %v1097_v32  ;;  %1076 = vst.msk [vmem:[#allocation3 + $0x10] sm:$0xff] %vm1051_vm1, %v1070_v33 }
 0x3ef   : > { %v1106_v34 = vpop.permute.xlu0 %1105  ;;  %v1108_v35 = vpop.permute.xlu1 %1107 }
 0x3f0   : > { %1112 = vst.msk [vmem:[#allocation3 + $0x30] sm:$0xff] %vm1051_vm1, %v1106_v34  ;;  %1113 = vst.msk [vmem:[#allocation3 + $0x38] sm:$0xff] %vm1051_vm1, %v1108_v35 }
 0x3f1 PF: > { %v1115_v36 = vld [vmem:[#allocation11] sm:$0xff]  ;;  %v1116_v37 = vld [vmem:[#allocation11 + $0x8] sm:$0xff]  ;;  %v1117_v38 = vld [vmem:[#allocation11 + $0x10] sm:$0xff]  ;;  %v3865_v39 = vmov 0.0|0.0   ;;  %vm3866_vm2 = vmmov 0   ;;  %v3867_v42 = vmov 0.0   ;;  %v1202_v58 = vlaneseq }
 0x3f2   : > { %2796 = vmatprep.subr.bf16.mxu1 %v3865_v39  ;;  %v2797_v40 = vpack.c.bf16 %v1116_v37, %v1115_v36  ;;  %v1118_v41 = vld [vmem:[#allocation11 + $0x18] sm:$0xff]  ;;  %2680 = vmatprep.mubr.msk.f32.mxu1 %vm3866_vm2, %v3867_v42  ;;  %vm1126_vm3 = vcmask 261120   ;;  %v1206_v45 = vld [vmem:[#allocation2] sm:$0xff]  ;;  %vm1210_vm4 = vcmask 64512   ;;  %v2556_v49 = vld [vmem:[#allocation12] ss:$0 sm:$0xff] }
 0x3f3   : > { %2806 = vmatprep.subr.bf16.mxu0 %v3865_v39  ;;  %2694 = vmatprep.mubr.msk.f32.mxu0 %vm3866_vm2, %v3867_v42  ;;  %v2800_v43 = vpack.c.bf16 %v1118_v41, %v1117_v38  ;;  %v4654_v44 = vld [vmem:[%s4568_s3] sm:$0xff]  ;;  %vm4663_vm5 = vmpackc.low %vm1210_vm4, %vm1210_vm4  ;;  %v1379_v50 = vld [vmem:[#allocation2 + $0x10] sm:$0xff]  ;;  %s4980_s0 = sld [smem:[#allocation56_spill]]  ;;  %s3868_s9 = smov 120   ;;  %v1203_v59 = vand.u32 127, %v1202_v58  ;;  %vm1293_vm7 = vcmask 130048  }
 0x3f4   : > { %2798 = vmatpush3.bf16.msra.mxu1 %v2797_v40  ;;  %v1207_v46 = vld [vmem:[#allocation2 + $0x8] sm:$0xff]  ;;  %v1380_v51 = vld [vmem:[#allocation2 + $0x18] sm:$0xff]  ;;  %v1208_v11 = vld [vmem:[#allocation3] sm:$0xff]  ;;  %s3869_s5 = smov 112   ;;  %s3870_s21 = smov 104   ;;  %vm1905_vm8 = vcmask 195584  }
 0x3f5   : > { %2799 = vmatprep.subr.bf16.mxu1 %v3865_v39  ;;  %v2803_v47 = vpack.c.bf16 %v1207_v46, %v1206_v45  ;;  %v2810_v55 = vpack.c.bf16 %v1380_v51, %v1379_v50  ;;  %v1209_v12 = vld [vmem:[#allocation3 + $0x8] sm:$0xff]  ;;  %v1382_v20 = vld [vmem:[#allocation3 + $0x10] sm:$0xff]  ;;  %v1383_v21 = vld [vmem:[#allocation3 + $0x18] sm:$0xff]  ;;  %s3871_s14 = smov 8   ;;  %s3872_s17 = smov 16   ;;  %vm2122_vm9 = vcmask 523264  }
 0x3f6   : > { %v2807_v13 = vpack.c.bf16 %v1209_v12, %v1208_v11  ;;  %v2814_v23 = vpack.c.bf16 %v1383_v21, %v1382_v20  ;;  %v1550_v26 = vld [vmem:[#allocation2 + $0x20] sm:$0xff]  ;;  %v1551_v27 = vld [vmem:[#allocation2 + $0x28] sm:$0xff]  ;;  %v1907_v11 = vld [vmem:[#allocation20] sm:$0xff]  ;;  %s3873_s3 = smov 24   ;;  %s4983_s15 = sld [smem:[#allocation55_spill]] }
 0x3f7   : > { %v2817_v29 = vpack.c.bf16 %v1551_v27, %v1550_v26  ;;  %v1554_v50 = vld [vmem:[#allocation3 + $0x28] sm:$0xff]  ;;  %v1908_v12 = vld [vmem:[#allocation20 + $0x8] sm:$0xff]  ;;  %s2243_s27 = sshll.u32 %s4619_s6, 4  ;;  %s4984_s12 = sld [smem:[#allocation80_spill]]  ;;  %s4762_s27 = int_to_ptr.vmem [resolvable:$true] %s2243_s27 }
 0x3f8   : > { %2801 = vmatpush3.bf16.msra.mxu1 %v2800_v43  ;;  %2808 = vmatpush3.bf16.msra.mxu0 %v2807_v13  ;;  %v1909_v13 = vld [vmem:[#allocation20 + $0x10] sm:$0xff]  ;;  %s2228_s29 = scalar_lea.sflag [#allocation8], %s4564_s20  ;;  %s3675_s26 = scalar_lea.vmem %s4762_s27, 128 }
 0x3f9   : > { %2802 = vmatprep.subr.bf16.mxu1 %v3865_v39  ;;  %s1201_s19 = sld [smem:[#allocation5 + %s4980_s0]]  ;;  %2813 = vmatprep.subr.bf16.mxu0 %v3865_v39  ;;  %s2585_s24 = sshll.u32 %s4980_s0, 1 }
 0x3fa   : > { %p3676_p6 = scmp.ne.s32.totalorder %s4762_s27, %s3675_s26  ;;  %p4985_p2 = scmp.ne.s32.totalorder %s4944_s7, 0 }
 0x3fb   : > { %2681 = vmatmul.mubr.msk.f32.vlgmr.msra.gmra.mrb[0].mxu1 %vm1126_vm3, %v4654_v44  ;;  %s3874_s0 = smov [#allocation35]  }
 0x3fc   : > { %2687 = vmatprep.mubr.msk.f32.mxu1 %vm3866_vm2, %v3867_v42  ;;  %s2239_s8 = sadd.s32 %s4983_s15, %s2585_s24  ;;  %p3677_p3 = pnand %p3676_p6, %p4985_p2 }
 0x3fd   : > { %s2586_s4 = sshll.u32 %s2239_s8, 7 }
 0x3fe   : > { %s4760_s22 = scalar_lea.hbm %s4984_s12, %s2586_s4  ;;  %p3678_p5 = pneg %p3677_p3 }
 0x3ff   : > { %v1204_v60 = vstv %s1201_s19 }
 0x400   : > { %vm4684_vm6 = vcmp.lt.s32.totalorder %v1203_v59, %v1204_v60 }
 0x401   : > { %2805 = vmatpush3.bf16.xpose.msk.msra.mxu1 %vm4663_vm5, %v2803_v47 }
 0x402   : > { %2809 = vmatprep.subr.bf16.mxu1 %v3865_v39 }
 0x4ce   : > { %v1196_v52 = vpop.f32.mrb[0].mxu1 }
 0x4cf   : > { %v1197_v53 = vadd.f32 %v2556_v49, %v1196_v52  ;;  %v2682_v54 = vpop.f32.mrb[1].mxu1  ;;  %v1553_v49 = vld [vmem:[#allocation3 + $0x20] sm:$0xff] }
 0x4d0   : > { %v2821_v51 = vpack.c.bf16 %v1554_v50, %v1553_v49  ;;  %v1722_v54 = vld [vmem:[#allocation2 + $0x38] sm:$0xff] }
 0x4d1   : > { %v4670_v56 = vmul.f32 0.35355338, %v1197_v53  ;;  %v1721_v53 = vld [vmem:[#allocation2 + $0x30] sm:$0xff]  ;;  %v2111_v50 = vld [vmem:[#allocation29 + $0x20] sm:$0xff] }
 0x4d3   : > { %1384 = vrot.lane.b32.xlu0 %v4670_v56, %s3868_s9  ;;  %2688 = vmatmul.mubr.msk.f32.vlgmr.msra.gmra.mrb[2].mxu1 %vm1210_vm4, %v4670_v56  ;;  %s3679_s9 = sshll.u32 %s3874_s0, 4  ;;  %s3680_s9 = int_to_ptr.vmem [resolvable:$false] %s3679_s9 }
 0x4d4   : > { %2812 = vmatpush3.bf16.xpose.msk.msra.mxu1 %vm4663_vm5, %v2810_v55  ;;  %2701 = vmatprep.mubr.msk.f32.mxu1 %vm3866_vm2, %v3867_v42  ;;  %s3681_s19 = scalar_lea.vmem %s3680_s9, 256  ;;  %p3682_p4 = scmp.lt.s32.totalorder %s4762_s27, %s3680_s9 }
 0x4d5   : > { %2820 = vmatprep.subr.bf16.mxu1 %v3865_v39  ;;  %p3683_p11 = scmp.lt.s32.totalorder %s3681_s19, %s3675_s26 }
 0x4d7   : > { %p3684_p10 = por %p3683_p11, %p3682_p4 }
 0x4d9   : > { %p3685_p9 = pnand %p3684_p10, %p3678_p5 }
 0x545   : > { %v1385_v57 = vpop.permute.xlu0 %1384 }
 0x546   : > { %2702 = vmatmul.mubr.msk.f32.vlgmr.msra.gmra.mrb[4].mxu1 %vm1210_vm4, %v1385_v57  ;;  %v2824_v57 = vpack.c.bf16 %v1722_v54, %v1721_v53 }
 0x547   : > { %2722 = vmatprep.mubr.msk.f32.mxu1 %vm3866_vm2, %v3867_v42  ;;  %2822 = vmatpush3.bf16.msra.mxu1 %v2821_v51  ;;  %v2112_v51 = vld [vmem:[#allocation29 + $0x28] sm:$0xff] }
 0x548   : > { %2823 = vmatprep.subr.bf16.mxu1 %v3865_v39 }
 0x5a6   : > { %v1286_v62 = vpop.f32.mrb[2].mxu1 }
 0x5a7   : > { %v1292_v63 = vsel %vm4684_vm6, %v1286_v62, -1e+09  ;;  %v2689_v0 = vpop.f32.mrb[3].mxu1 }
 0x5a8   : > { %v1294_v1 = vsel %vm1293_vm7, %v1292_v63, -inf }
 0x5a9   : > { %1295 = vmax.xlane.f32.xlu0 %v1294_v1 }
 0x619   : > { %v1460_v2 = vpop.f32.mrb[4].mxu1 }
 0x61a   : > { %v1464_v3 = vsel %vm4684_vm6, %v1460_v2, -1e+09  ;;  %v2703_v4 = vpop.f32.mrb[5].mxu1 }
 0x61b   : > { %v1465_v5 = vsel %vm1293_vm7, %v1464_v3, -inf }
 0x61c   : > { %1466 = vmax.xlane.f32.xlu1 %v1465_v5 }
 0x636   : > { %v1296_v6 = vpop.xlane.xlu0 %1295 }
 0x637   : > { %v1297_v7 = vsub.f32 %v1292_v63, %v1296_v6  ;;  %v1724_v6 = vld [vmem:[#allocation3 + $0x30] sm:$0xff] }
 0x639   : > { %v1298_v8 = vmul.f32 1.442695, %v1297_v7  ;;  %v1725_v7 = vld [vmem:[#allocation3 + $0x38] sm:$0xff] }
 0x63a   : > { %v2828_v61 = vpack.c.bf16 %v1725_v7, %v1724_v6 }
 0x63b   : > { %3137 = vpow2.f32 %v1298_v8 }
 0x645   : > { %v3138_v9 = vpop.eup %3137 }
 0x646   : > { %v1300_v10 = vsel %vm1293_vm7, %v3138_v9, 0.0 }
 0x647   : > { %1301 = vadd.xlane.f32.xlu1 %v1300_v10 }
 0x6a9   : > { %v1467_v14 = vpop.xlane.xlu1 %1466 }
 0x6aa   : > { %v1468_v15 = vsub.f32 %v1464_v3, %v1467_v14  ;;  %v2831_v14 = vpack.c.bf16 %v1908_v12, %v1907_v11 }
 0x6ac   : > { %v1469_v16 = vmul.f32 1.442695, %v1468_v15  ;;  %v1910_v15 = vld [vmem:[#allocation20 + $0x18] sm:$0xff] }
 0x6ae   : > { %3139 = vpow2.f32 %v1469_v16  ;;  %v2834_v16 = vpack.c.bf16 %v1910_v15, %v1909_v13 }
 0x6b8   : > { %v3140_v17 = vpop.eup %3139 }
 0x6b9   : > { %v1471_v18 = vsel %vm1293_vm7, %v3140_v17, 0.0 }
 0x6ba   : > { %1472 = vadd.xlane.f32.xlu1 %v1471_v18 }
 0x6cb   : > { %1555 = vrot.lane.b32.xlu1 %v4670_v56, %s3869_s5 }
 0x6d4   : > { %v1302_v19 = vpop.xlane.xlu1 %1301 }
 0x6d5   : > { %3141 = vrcp.f32 %v1302_v19 }
 0x6df   : > { %v3142_v22 = vpop.eup %3141 }
 0x6e0   : > { %v1304_v24 = vmul.f32 %v3142_v22, %v3138_v9 }
 0x6e2   : > { %2695 = vmatmul.mubr.msk.f32.vlgmr.msra.gmra.mrb[0].mxu0 %vm1293_vm7, %v1304_v24 }
 0x6e3   : > { %2815 = vmatpush3.bf16.msra.mxu0 %v2814_v23  ;;  %2708 = vmatprep.mubr.msk.f32.mxu0 %vm3866_vm2, %v3867_v42 }
 0x6e4   : > { %2816 = vmatprep.subr.bf16.mxu0 %v3865_v39 }
 0x747   : > { %v1473_v25 = vpop.xlane.xlu1 %1472 }
 0x748   : > { %3143 = vrcp.f32 %v1473_v25  ;;  %v2574_v25 = vld [vmem:[#allocation21] ss:$0 sm:$0xff] }
 0x74b   : > { %v1556_v31 = vpop.permute.xlu1 %1555 }
 0x752   : > { %v3144_v28 = vpop.eup %3143 }
 0x753   : > { %v1475_v30 = vmul.f32 %v3144_v28, %v3140_v17 }
 0x755   : > { %2709 = vmatmul.mubr.msk.f32.vlgmr.msra.gmra.mrb[2].mxu0 %vm1293_vm7, %v1475_v30 }
 0x756   : > { %2819 = vmatpush3.bf16.xpose.msk.msra.mxu0 %vm4663_vm5, %v2817_v29  ;;  %2715 = vmatprep.mubr.msk.f32.mxu0 %vm3866_vm2, %v3867_v42 }
 0x757   : > { %2827 = vmatprep.subr.bf16.mxu0 %v3865_v39 }
 0x75d   : > { %2716 = vmatmul.mubr.msk.f32.vlgmr.msra.gmra.mrb[4].mxu0 %vm1210_vm4, %v1556_v31 }
 0x75e   : > { %2736 = vmatprep.mubr.msk.f32.mxu0 %vm3866_vm2, %v3867_v42  ;;  %2829 = vmatpush3.bf16.msra.mxu0 %v2828_v61 }
 0x75f   : > { %2830 = vmatprep.subr.bf16.mxu0 %v3865_v39 }
 0x7b5   : > { %v4711_v32 = vpop.f32.mrb[0].mxu0 }
 0x7b6   : > { %v2696_v33 = vpop.f32.mrb[1].mxu0 }
 0x828   : > { %v1545_v34 = vpop.f32.mrb[2].mxu0 }
 0x829   : > { %v2710_v35 = vpop.f32.mrb[3].mxu0 }
 0x830   : > { %v1631_v36 = vpop.f32.mrb[4].mxu0 }
 0x831   : > { %v1635_v37 = vsel %vm4684_vm6, %v1631_v36, -1e+09  ;;  %v2717_v38 = vpop.f32.mrb[5].mxu0  ;;  %v2022_v36 = vld [vmem:[#allocation26] sm:$0xff] }
 0x832   : > { %v1636_v40 = vsel %vm1293_vm7, %v1635_v37, -inf }
 0x833   : > { %1637 = vmax.xlane.f32.xlu1 %v1636_v40  ;;  %v2025_v40 = vld [vmem:[#allocation26 + $0x18] sm:$0xff] }
 0x8c0   : > { %v1638_v41 = vpop.xlane.xlu1 %1637 }
 0x8c1   : > { %v1639_v43 = vsub.f32 %v1635_v37, %v1638_v41  ;;  %v2023_v37 = vld [vmem:[#allocation26 + $0x8] sm:$0xff] }
 0x8c2   : > { %v2837_v38 = vpack.c.bf16 %v2023_v37, %v2022_v36 }
 0x8c3   : > { %v1640_v45 = vmul.f32 1.442695, %v1639_v43  ;;  %v2108_v43 = vld [vmem:[#allocation29 + $0x8] sm:$0xff] }
 0x8c5   : > { %3145 = vpow2.f32 %v1640_v45  ;;  %v2109_v45 = vld [vmem:[#allocation29 + $0x10] sm:$0xff] }
 0x8cf   : > { %v3146_v46 = vpop.eup %3145 }
 0x8d0   : > { %v1642_v47 = vsel %vm1293_vm7, %v3146_v46, 0.0 }
 0x8d1   : > { %1643 = vadd.xlane.f32.xlu0 %v1642_v47  ;;  %v2110_v47 = vld [vmem:[#allocation29 + $0x18] sm:$0xff] }
 0x8d2   : > { %v2846_v49 = vpack.c.bf16 %v2110_v47, %v2109_v45 }
 0x8e7   : > { %1726 = vrot.lane.b32.xlu0 %v4670_v56, %s3870_s21 }
 0x95e   : > { %v1644_v52 = vpop.xlane.xlu0 %1643 }
 0x95f   : > { %3147 = vrcp.f32 %v1644_v52  ;;  %v2849_v52 = vpack.c.bf16 %v2112_v51, %v2111_v50 }
 0x962   : > { %v1727_v59 = vpop.permute.xlu0 %1726 }
 0x969   : > { %v3148_v55 = vpop.eup %3147 }
 0x96a   : > { %v1646_v58 = vmul.f32 %v3148_v55, %v3146_v46 }
 0x96c   : > { %2723 = vmatmul.mubr.msk.f32.vlgmr.msra.gmra.mrb[6].mxu1 %vm1293_vm7, %v1646_v58  ;;  %v2576_v58 = vld [vmem:[#allocation23] ss:$0 sm:$0xff] }
 0x96d   : > { %2826 = vmatpush3.bf16.xpose.msk.msra.mxu1 %vm4663_vm5, %v2824_v57  ;;  %2729 = vmatprep.mubr.msk.f32.mxu1 %vm3866_vm2, %v3867_v42 }
 0x96e   : > { %2836 = vmatprep.subr.bf16.mxu1 %v3865_v39 }
 0x974   : > { %2730 = vmatmul.mubr.msk.f32.vlgmr.msra.gmra.mrb[8].mxu1 %vm1210_vm4, %v1727_v59 }
 0x975   : > { %2758 = vmatprep.mubr.msk.f32.mxu1 %vm3866_vm2, %v3867_v42  ;;  %2838 = vmatpush3.bf16.msra.mxu1 %v2837_v38 }
 0x976   : > { %2839 = vmatprep.subr.bf16.mxu1 %v3865_v39 }
 0xa3f   : > { %v1716_v56 = vpop.f32.mrb[6].mxu1 }
 0xa40   : > { %v2724_v60 = vpop.f32.mrb[7].mxu1 }
 0xa47   : > { %v1802_v62 = vpop.f32.mrb[8].mxu1 }
 0xa48   : > { %v1806_v63 = vsel %vm4684_vm6, %v1802_v62, -1e+09  ;;  %v2731_v0 = vpop.f32.mrb[9].mxu1 }
 0xa49   : > { %v1807_v48 = vsel %vm1293_vm7, %v1806_v63, -inf  ;;  %v2114_v0 = vld [vmem:[#allocation29 + $0x38] sm:$0xff] }
 0xa4a   : > { %1808 = vmax.xlane.f32.xlu0 %v1807_v48 }
 0xad7   : > { %v1809_v1 = vpop.xlane.xlu0 %1808 }
 0xad8   : > { %v1810_v2 = vsub.f32 %v1806_v63, %v1809_v1  ;;  %v2113_v63 = vld [vmem:[#allocation29 + $0x30] sm:$0xff]  ;;  %v2578_v1 = vld [vmem:[#allocation27] ss:$0 sm:$0xff] }
 0xad9   : > { %v2852_v48 = vpack.c.bf16 %v2114_v0, %v2113_v63 }
 0xada   : > { %v1811_v3 = vmul.f32 1.442695, %v1810_v2 }
 0xadc   : > { %3149 = vpow2.f32 %v1811_v3 }
 0xae6   : > { %v3150_v4 = vpop.eup %3149 }
 0xae7   : > { %v1813_v5 = vsel %vm1293_vm7, %v3150_v4, 0.0 }
 0xae8   : > { %1814 = vadd.xlane.f32.xlu1 %v1813_v5  ;;  %v2580_v5 = vld [vmem:[#allocation30] ss:$0 sm:$0xff] }
 0xaf9   : > { %1892 = vrot.lane.b32.xlu1 %v1545_v34, %s3871_s14 }
 0xafd   : > { %1896 = vrot.lane.b32.xlu1 %v1716_v56, %s3872_s17  ;;  %v2577_v56 = vld [vmem:[#allocation24] ss:$0 sm:$0xff] }
 0xb75   : > { %v1815_v8 = vpop.xlane.xlu1 %1814 }
 0xb76   : > { %3151 = vrcp.f32 %v1815_v8 }
 0xb79   : > { %v1893_v19 = vpop.permute.xlu1 %1892 }
 0xb7a   : > { %v1903_v21 = vsel %vm1210_vm4, %v4711_v32, %v1893_v19  ;;  %v2582_v19 = vld [vmem:[#allocation32] ss:$0 sm:$0xff] }
 0xb7d   : > { %v1897_v20 = vpop.permute.xlu1 %1896 }
 0xb7e   : > { %v1904_v22 = vsel %vm1293_vm7, %v1903_v21, %v1897_v20  ;;  %v2583_v21 = vld [vmem:[#allocation33] ss:$0 sm:$0xff] }
 0xb80   : > { %v3152_v9 = vpop.eup %3151 }
 0xb81   : > { %v1817_v10 = vmul.f32 %v3152_v9, %v3150_v4 }
 0xb83   : > { %2737 = vmatmul.mubr.msk.f32.vlgmr.msra.gmra.mrb[6].mxu0 %vm1293_vm7, %v1817_v10 }
 0xb84   : > { %2747 = vmatprep.mubr.msk.f32.mxu0 %vm3866_vm2, %v3867_v42  ;;  %2832 = vmatpush3.bf16.msra.mxu0 %v2831_v14 }
 0xb85   : > { %2833 = vmatprep.subr.bf16.mxu0 %v3865_v39 }
 0xb88   : > { %2835 = vmatpush3.bf16.msra.mxu0 %v2834_v16 }
 0xb89   : > { %2842 = vmatprep.subr.bf16.mxu0 %v3865_v39 }
 0xc56   : > { %v1887_v17 = vpop.f32.mrb[6].mxu0 }
 0xc57   : > { %1900 = vrot.lane.b32.xlu1 %v1887_v17, %s3873_s3  ;;  %v2738_v18 = vpop.f32.mrb[7].mxu0 }
 0xcc9   : > { %v1901_v23 = vpop.permute.xlu1 %1900 }
 0xcca   : > { %v1906_v24 = vsel %vm1905_vm8, %v1904_v22, %v1901_v23 }
 0xccb   : > { %2748 = vmatmul.mubr.msk.f32.vlgmr.msra.gmra.mrb[8].mxu0 %vm1126_vm3, %v1906_v24 }
 0xccc   : > { %2777 = vmatprep.mubr.msk.f32.mxu0 %vm3866_vm2, %v3867_v42  ;;  %v2024_v42 = vld [vmem:[#allocation26 + $0x10] sm:$0xff] }
 0xccd   : > { %v2840_v41 = vpack.c.bf16 %v2025_v40, %v2024_v42 }
 0xccf   : > { %2841 = vmatpush3.bf16.msra.mxu1 %v2840_v41 }
 0xd9e   : > { %v1987_v26 = vpop.f32.mrb[8].mxu0 }
 0xd9f   : > { %v1988_v27 = vadd.f32 %v2574_v25, %v1987_v26  ;;  %v2749_v28 = vpop.f32.mrb[9].mxu0 }
 0xda1   : > { %v1991_v29 = vadd.f32 %v1988_v27, %v4654_v44  ;;  %v2107_v44 = vld [vmem:[#allocation29] sm:$0xff] }
 0xda2   : > { %v2843_v46 = vpack.c.bf16 %v2108_v43, %v2107_v44 }
 0xda3   : > { %v1994_v30 = vsel %vm1126_vm3, %v1991_v29, 0.0 }
 0xda4   : > { %1995 = vadd.xlane.f32.xlu0 %v1994_v30  ;;  %2844 = vmatpush3.bf16.msra.mxu0 %v2843_v46 }
 0xda5   : > { %2845 = vmatprep.subr.bf16.mxu0 %v3865_v39 }
 0xda8   : > { %2847 = vmatpush3.bf16.msra.mxu0 %v2846_v49 }
 0xda9   : > { %2848 = vmatprep.subr.bf16.mxu0 %v3865_v39 }
 0xdac   : > { %2850 = vmatpush3.bf16.msra.mxu0 %v2849_v52 }
 0xdad   : > { %2851 = vmatprep.subr.bf16.mxu0 %v3865_v39 }
 0xdb0   : > { %2853 = vmatpush3.bf16.msra.mxu0 %v2852_v48 }
 0xe31   : > { %v1996_v31 = vpop.xlane.xlu0 %1995 }
 0xe32   : > { %v1998_v32 = vmul.f32 0.03125, %v1996_v31 }
 0xe34   : > { %v1999_v33 = vsub.f32 %v1991_v29, %v1998_v32 }
 0xe36   : > { %v2000_v34 = vmul.f32 %v1999_v33, %v1999_v33 }
 0xe38   : > { %v2001_v35 = vsel %vm1126_vm3, %v2000_v34, 0.0 }
 0xe39   : > { %2002 = vadd.xlane.f32.xlu1 %v2001_v35 }
 0xec6   : > { %v2003_v53 = vpop.xlane.xlu1 %2002 }
 0xec7   : > { %v2004_v54 = vmul.f32 0.03125, %v2003_v53 }
 0xec9   : > { %v2005_v55 = vadd.f32 1e-05, %v2004_v54 }
 0xecb   : > { %3153 = vrsqrt.f32 %v2005_v55 }
 0xed5   : > { %v3154_v57 = vpop.eup %3153 }
 0xed6   : > { %v2007_v59 = vmul.f32 %v3154_v57, %v1999_v33 }
 0xed8   : > { %v2014_v60 = vmul.f32 %v2576_v58, %v2007_v59 }
 0xeda   : > { %v2021_v62 = vadd.f32 %v2577_v56, %v2014_v60 }
 0xedc   : > { %2759 = vmatmul.mubr.msk.f32.vlgmr.msra.gmra.mrb[10].mxu1 %vm1126_vm3, %v2021_v62 }
 0xfaf   : > { %v2102_v2 = vpop.f32.mrb[10].mxu1 }
 0xfb0   : > { %v2103_v3 = vadd.f32 %v2578_v1, %v2102_v2  ;;  %v2760_v39 = vpop.f32.mrb[11].mxu1 }
 0xfb2   : > { %v2106_v4 = vmax.f32 %v2103_v3, 0.0 }
 0xfb4   : > { %2778 = vmatmul.mubr.msk.f32.vlgmr.msra.gmra.mrb[10].mxu0 %vm2122_vm9, %v2106_v4 }
0x1087   : > { %v2192_v6 = vpop.f32.mrb[10].mxu0 }
0x1088   : > { %v2193_v7 = vadd.f32 %v2580_v5, %v2192_v6  ;;  %v2779_v61 = vpop.f32.mrb[11].mxu0 }
0x108a   : > { %v2196_v8 = vadd.f32 %v2193_v7, %v2021_v62 }
0x108c   : > { %v2199_v9 = vsel %vm1126_vm3, %v2196_v8, 0.0 }
0x108d   : > { %2200 = vadd.xlane.f32.xlu0 %v2199_v9 }
0x111a   : > { %v2201_v10 = vpop.xlane.xlu0 %2200 }
0x111b   : > { %v2202_v11 = vmul.f32 0.03125, %v2201_v10 }
0x111d   : > { %v2203_v12 = vsub.f32 %v2196_v8, %v2202_v11 }
0x111f   : > { %v2204_v13 = vmul.f32 %v2203_v12, %v2203_v12 }
0x1121   : > { %v2205_v14 = vsel %vm1126_vm3, %v2204_v13, 0.0 }
0x1122   : > { %2206 = vadd.xlane.f32.xlu0 %v2205_v14 }
0x11af   : > { %v2207_v15 = vpop.xlane.xlu0 %2206 }
0x11b0   : > { %v2208_v16 = vmul.f32 0.03125, %v2207_v15 }
0x11b2   : > { %v2209_v17 = vadd.f32 1e-05, %v2208_v16 }
0x11b4   : > { %3155 = vrsqrt.f32 %v2209_v17 }
0x11be   : > { %v3156_v18 = vpop.eup %3155 }
0x11bf   : > { %v2211_v20 = vmul.f32 %v3156_v18, %v2203_v12 }
0x11c1   : > { %v2218_v22 = vmul.f32 %v2582_v19, %v2211_v20 }
0x11c3   : > { %v2225_v23 = vadd.f32 %v2583_v21, %v2218_v22 }
0x11c5   : > { %2226 = vst.msk [vmem:[%s4619_s6] sm:$0xff] %vm1126_vm3, %v2225_v23 }
0x11c6   : > { %3688 = shalt.err (!%p3685_p9)
}
0x11c7   : > { %s3689_s20 = scalar_lea.hbm %s4760_s22, 128  ;;  %s3693_s21 = scalar_lea.hbm %s4984_s12, 512 }
0x11c8   : > { %p3690_p0 = scmp.ne.s32.totalorder %s4760_s22, %s3689_s20  ;;  %p3694_p7 = scmp.lt.u32.totalorder %s4760_s22, %s4984_s12 }
0x11c9   : > { %p3695_p1 = scmp.lt.u32.totalorder %s3693_s21, %s3689_s20  ;;  %p3697_p6 = scmp.lt.u32.totalorder %s3689_s20, %s4760_s22 }
0x11ca   : > { %p3691_p13 = pnand %p3690_p0, %p4985_p2 }
0x11cb   : > { %p3696_p12 = por %p3695_p1, %p3694_p7 }
0x11cc   : > { %p3692_p8 = pneg %p3691_p13 }
0x11cd   : > { %p3698_p3 = por %p3697_p6, %p3696_p12 }
0x11cf   : > { %p3699_p5 = pnand %p3698_p3, %p3692_p8 }
0x11d1   : > { %3702 = shalt.err (!%p3699_p5)
}
0x11d2   : > { %2922 = dma.vmem_to_hbm [thread:$0]  (%p4985_p2), %s4762_s27, 128, %s4760_s22, %s2228_s29  }
0x11d3 PF: > { %s4986_s3 = sld [smem:[#allocation59_spill]]  ;;  %s4987_s15 = sld [smem:[#allocation52_spill]] }
0x11d4   : > { %p4988_p11 = scmp.ne.s32.totalorder %s4945_s2, 0 }
0x11d9   : > { %p3017_p4 = scmp.ge.s32.totalorder %s4986_s3, 2  ;;  %s2255_s24 = sand.u32 1, %s4987_s15  }
0x11da   : > { %s2256_s8 = scalar_lea.sflag [#allocation8], %s2255_s24 }
0x11db   : > { %p2981_p10 = pnand %p3017_p4, %p4988_p11 }
0x11dd   : > { %3794 = dma.done.wait (!%p2981_p10), %s2256_s8, 128  }
0x11de   : > { %3796 = vsyncadd (!%p2981_p10), %s2256_s8, 4294967168  ;;  %s50_s4 = sadd.s32 1, %s4986_s3   ;;  %s4989_s30 = sld [smem:[#allocation50_spill]] }
0x11df   : > { %p47_p9 = scmp.ge.s32.totalorder %s50_s4, 6   ;;  %s4990_s3 = sld [smem:[#allocation51_spill]] }
0x11e0   : > { %s4991_s27 = sld [smem:[#allocation53_spill]]  ;;  %s4992_s28 = sld [smem:[#allocation54_spill]] }
0x11e1   : > { %s4993_s0 = sld [smem:[#allocation57_spill]]  ;;  %s4994_s7 = sld [smem:[#allocation58_spill]] }
0x11e2   : > { %s4995_s22 = smov %s5008_s13  ;;  %s4997_s26 = smov %s4438_s10 }
0x11e3   : > { %s4998_s29 = smov %s4441_s11  ;;  %s5000_s20 = smov %s5004_s1 }
0x11e4   : > { %s4996_s13 = smov %s4989_s30  ;;  %s5001_s21 = smov %s4995_s22 }
0x11e5   : > { %s5002_s1 = smov %s50_s4  ;;  %49 = sbr.rel (!%p47_p9) target bundleno = 45 (0x2d), region = 230 }
0x11e7   : > { %s4999_s30 = smov %s4994_s7 }
0x11ec   :  { %2261 = vsyncpa [#allocation7], 1 }
0x11ed   :  { %2263 = vsyncpa [#allocation7 + $0x1], 1 }
0x11ee   :  { %2264 = vsyncpa [#allocation10], 1 }
0x11ef   :  { %2266 = vsyncpa [#allocation10 + $0x1], 1 }
0x11f0   :  { %2267 = vsyncpa [#allocation13], 1 }
0x11f1   :  { %2268 = vsyncpa [#allocation16], 1 }
0x11f2   :  { %2269 = vsyncpa [#allocation19], 1 }
0x11f3   :  { %2270 = vsyncpa [#allocation22], 1 }
0x11f4   :  { %2271 = vsyncpa [#allocation25], 1 }
0x11f5   :  { %2272 = vsyncpa [#allocation28], 1 }
0x11f6   :  { %2273 = vsyncpa [#allocation31], 1 }
0x11f7   :  { %2274 = vsyncpa [#allocation34], 1 }
0x11f8   :  { %2275 = vsyncpa [#allocation8], 1 }
0x11f9   :  { %2277 = vsyncpa [#allocation8 + $0x1], 1 }

</bundles_post_ra>
